<compile_context>
chip_gen: v5e
topology: v5e:2x2
jax: 0.10.0
libtpu: 0.0.40
codegen_flags: <defaults>
</compile_context>

<pallas_src>
import functools

import numpy as np

import jax
import jax.numpy as jnp
from jax.experimental import pallas as pl
from jax.experimental.pallas import tpu as pltpu


GROUPS = 4
EPS = 1e-6
OUTPUT_SCALE_FACTOR = 1.0


# ----------------------------------------------------------------------------
# Host-side constant builders (pure layout / masks, baked in as constants)
# ----------------------------------------------------------------------------
def _conv_to_matrix(w_hwio):
    """(3, 3, Cin, Cout) HWIO conv weights -> (Cout, 9*Cin) im2col matmul matrix."""
    kh, kw, cin, cout = w_hwio.shape
    return jnp.transpose(w_hwio.reshape(kh * kw * cin, cout), (1, 0)).astype(jnp.float32)


def _group_matrix(c, groups):
    """(C, C) 0/1 same-group indicator matrix for GroupNorm group sums."""
    gid = np.arange(c) // (c // groups)
    return jnp.asarray((gid[:, None] == gid[None, :]).astype(np.float32))


def _shift_masks(h, w):
    """(9, H*W) validity masks for the 3x3 taps (zero-padding halo handling)."""
    pos = np.arange(h * w)
    y, x = pos // w, pos % w
    rows = []
    for dy in (-1, 0, 1):
        for dx in (-1, 0, 1):
            valid = (y + dy >= 0) & (y + dy < h) & (x + dx >= 0) & (x + dx < w)
            rows.append(valid)
    return jnp.asarray(np.stack(rows, axis=0).astype(np.float32))


def _upsample_matrix(h, w):
    """(H*W, 4*H*W) selection matrix: up[c, q] = x[c, (Y//2)*W + X//2]."""
    hw = h * w
    q = np.arange(4 * hw)
    src = ((q // (2 * w)) // 2) * w + (q % (2 * w)) // 2
    return jnp.asarray((np.arange(hw)[:, None] == src[None, :]).astype(np.float32))


# ----------------------------------------------------------------------------
# Fused Pallas kernel: one batch element per grid step, lane-dense (C, H*W)
# ----------------------------------------------------------------------------
def _upblock_kernel(
    hid_ref, res_ref, temb_ref,
    g1_ref, b1_ref, gmat1_ref,
    w1_ref, bias1_ref,
    g2_ref, b2_ref, gmat2_ref,
    w2_ref, wsc_ref, bias_res_ref,
    sel_ref, wup_ref, bup_ref,
    mask_lo_ref, mask_hi_ref,
    out_res_ref, out_up_ref,
    *, H, W, groups, eps, scale,
):
    hw = H * W

    def shift_lanes(x, s):
        # circular shift on the minor (lane) dim: result[:, i] = x[:, (i + s) % S]
        size = x.shape[1]
        s = s % size
        if s == 0:
            return x
        return jnp.concatenate([x[:, s:], x[:, :s]], axis=1)

    def im2col(x, mask, w_line):
        # x: (Cin, S) flattened image; mask: (9, S) tap-validity; returns (9*Cin, S).
        cols = []
        k = 0
        for dy in (-1, 0, 1):
            for dx in (-1, 0, 1):
                s = dy * w_line + dx
                if s == 0:
                    cols.append(x)                       # center tap: always valid
                else:
                    # wrapped lanes are exactly the masked (zero-padding) ones
                    cols.append(shift_lanes(x, s) * mask[k:k + 1, :])
                k += 1
        return jnp.concatenate(cols, axis=0)

    def group_norm_silu(x, gamma, beta, gmat):
        # x: (C, S); gamma/beta: (C, 1); gmat: (C, C) same-group indicator.
        c, s = x.shape
        inv_cnt = 1.0 / float((c // groups) * s)
        # two-pass variance (numerically safer than E[x^2]-E[x]^2)
        mean = jnp.sum(jnp.dot(gmat, x, preferred_element_type=jnp.float32),
                       axis=1, keepdims=True) * inv_cnt
        d = x - mean
        var = jnp.sum(jnp.dot(gmat, d * d, preferred_element_type=jnp.float32),
                      axis=1, keepdims=True) * inv_cnt
        y = d * jax.lax.rsqrt(var + eps) * gamma + beta
        return y * jax.nn.sigmoid(y)                     # SiLU / swish

    # concat([hidden, skip]) along the channel (sublane) dim
    x = jnp.concatenate([hid_ref[0], res_ref[0]], axis=0).astype(jnp.float32)
    mask_lo = mask_lo_ref[...]
    mask_hi = mask_hi_ref[...]

    # --- GroupNorm1 + SiLU + Conv3x3_1 (time-embedding fused into the matmul) ---
    h = group_norm_silu(x, g1_ref[...], b1_ref[...], gmat1_ref[...])
    t_sil = jax.nn.silu(temb_ref[0].astype(jnp.float32))                # (T, 1)
    t_rows = jnp.broadcast_to(t_sil, (t_sil.shape[0], hw))              # (T, HW)
    patches = jnp.concatenate([im2col(h, mask_lo, W), t_rows], axis=0)  # (9*Cin+T, HW)
    h = jnp.dot(w1_ref[...], patches,
                preferred_element_type=jnp.float32) + bias1_ref[...]    # (Cout, HW)

    # --- GroupNorm2 + SiLU + Conv3x3_2 ---
    h = group_norm_silu(h, g2_ref[...], b2_ref[...], gmat2_ref[...])
    h = jnp.dot(w2_ref[...], im2col(h, mask_lo, W),
                preferred_element_type=jnp.float32)

    # --- 1x1 shortcut + residual merge (biases pre-folded) ---
    res_out = (jnp.dot(wsc_ref[...], x, preferred_element_type=jnp.float32)
               + h + bias_res_ref[...])
    if scale != 1.0:                                     # output_scale_factor == 1.0
        res_out = res_out * scale
    out_res_ref[0] = res_out.astype(out_res_ref.dtype)

    # --- fused nearest-2x upsample (selection matmul) + Conv3x3 up ---
    up = jnp.dot(res_out, sel_ref[...], preferred_element_type=jnp.float32)  # (Cout, 4HW)
    up = jnp.dot(wup_ref[...], im2col(up, mask_hi, 2 * W),
                 preferred_element_type=jnp.float32) + bup_ref[...]
    out_up_ref[0] = up.astype(out_up_ref.dtype)


# ----------------------------------------------------------------------------
# Wrapper: NCHW API boundary, (C, H*W) flattened layout inside (free reshapes)
# ----------------------------------------------------------------------------
def upblock2d_forward(hidden_states, res_hidden_states_tuple, temb, params):
    f32 = jnp.float32
    n, c_prev, h, w = hidden_states.shape
    skip = res_hidden_states_tuple[-1]
    c_skip = skip.shape[1]
    c_cat = c_prev + c_skip
    c_out = params["conv1_w"].shape[-1]
    t_ch = params["temb_w"].shape[0]
    hw, hw_up = h * w, 4 * h * w

    hid = hidden_states.reshape(n, c_prev, hw).astype(f32)
    res = skip.reshape(n, c_skip, hw).astype(f32)
    temb3 = temb.reshape(n, t_ch, 1).astype(f32)

    # weight / constant preprocessing (layout only; fused biases)
    w1m = _conv_to_matrix(params["conv1_w"])                               # (Cout, 9*c_cat)
    w1aug = jnp.concatenate([w1m, jnp.transpose(params["temb_w"]).astype(f32)], axis=1)
    bias1 = (params["conv1_b"] + params["temb_b"]).reshape(c_out, 1).astype(f32)
    w2m = _conv_to_matrix(params["conv2_w"])
    wupm = _conv_to_matrix(params["up_w"])
    wsc = jnp.transpose(params["sc_w"]).astype(f32)                        # (Cout, c_cat)
    bias_res = (params["conv2_b"] + params["sc_b"]).reshape(c_out, 1).astype(f32)
    bup = params["up_b"].reshape(c_out, 1).astype(f32)
    g1 = params["norm1_g"].reshape(c_cat, 1).astype(f32)
    b1 = params["norm1_b"].reshape(c_cat, 1).astype(f32)
    g2 = params["norm2_g"].reshape(c_out, 1).astype(f32)
    b2 = params["norm2_b"].reshape(c_out, 1).astype(f32)
    gmat1 = _group_matrix(c_cat, GROUPS)
    gmat2 = _group_matrix(c_out, GROUPS)
    sel = _upsample_matrix(h, w)
    mask_lo = _shift_masks(h, w)
    mask_hi = _shift_masks(2 * h, 2 * w)

    kernel = functools.partial(
        _upblock_kernel, H=h, W=w, groups=GROUPS, eps=EPS,
        scale=1.0 / OUTPUT_SCALE_FACTOR)

    # Constants (weights, masks, selection matrix) use a constant index_map so
    # Pallas keeps them resident in VMEM across the batch grid.
    const2d = lambda: (lambda i: (0, 0))

    out_res, out_up = pl.pallas_call(
        kernel,
        out_shape=(jax.ShapeDtypeStruct((n, c_out, hw), f32),
                   jax.ShapeDtypeStruct((n, c_out, hw_up), f32)),
        grid=(n,),
        in_specs=[
            pl.BlockSpec((1, c_prev, hw), lambda i: (i, 0, 0)),
            pl.BlockSpec((1, c_skip, hw), lambda i: (i, 0, 0)),
            pl.BlockSpec((1, t_ch, 1), lambda i: (i, 0, 0)),
            pl.BlockSpec((c_cat, 1), const2d()),
            pl.BlockSpec((c_cat, 1), const2d()),
            pl.BlockSpec((c_cat, c_cat), const2d()),
            pl.BlockSpec((c_out, 9 * c_cat + t_ch), const2d()),
            pl.BlockSpec((c_out, 1), const2d()),
            pl.BlockSpec((c_out, 1), const2d()),
            pl.BlockSpec((c_out, 1), const2d()),
            pl.BlockSpec((c_out, c_out), const2d()),
            pl.BlockSpec((c_out, 9 * c_out), const2d()),
            pl.BlockSpec((c_out, c_cat), const2d()),
            pl.BlockSpec((c_out, 1), const2d()),
            pl.BlockSpec((hw, hw_up), const2d()),
            pl.BlockSpec((c_out, 9 * c_out), const2d()),
            pl.BlockSpec((c_out, 1), const2d()),
            pl.BlockSpec((9, hw), const2d()),
            pl.BlockSpec((9, hw_up), const2d()),
        ],
        out_specs=(pl.BlockSpec((1, c_out, hw), lambda i: (i, 0, 0)),
                   pl.BlockSpec((1, c_out, hw_up), lambda i: (i, 0, 0))),
        compiler_params=pltpu.CompilerParams(
            dimension_semantics=("parallel",)),
    )(hid, res, temb3, g1, b1, gmat1, w1aug, bias1, g2, b2, gmat2,
      w2m, wsc, bias_res, sel, wupm, bup, mask_lo, mask_hi)

    out_res_nchw = out_res.reshape(n, c_out, h, w)
    out_up_nchw = out_up.reshape(n, c_out, 2 * h, 2 * w)
    return out_up_nchw, (out_res_nchw, out_up_nchw)


# ----------------------------------------------------------------------------
# Pure-JAX reference (for correctness sanity check)
# ----------------------------------------------------------------------------
def _reference_forward(hidden_states, res_hidden, temb, p):
    def gn(v, gamma, beta):
        n, c, hh, ww = v.shape
        vg = v.reshape(n, GROUPS, (c // GROUPS) * hh * ww)
        mean = vg.mean(axis=2, keepdims=True)
        var = vg.var(axis=2, keepdims=True)
        vg = (vg - mean) * jax.lax.rsqrt(var + EPS)
        v = vg.reshape(n, c, hh, ww)
        return v * gamma[None, :, None, None] + beta[None, :, None, None]

    def conv3(v, w_hwio, b):
        out = jax.lax.conv_general_dilated(
            v, w_hwio, window_strides=(1, 1), padding="SAME",
            dimension_numbers=("NCHW", "HWIO", "NCHW"))
        return out + b[None, :, None, None]

    silu = jax.nn.silu
    x = jnp.concatenate([hidden_states, res_hidden], axis=1)
    hh = conv3(silu(gn(x, p["norm1_g"], p["norm1_b"])), p["conv1_w"], p["conv1_b"])
    tproj = silu(temb) @ p["temb_w"] + p["temb_b"]
    hh = hh + tproj[:, :, None, None]
    hh = conv3(silu(gn(hh, p["norm2_g"], p["norm2_b"])), p["conv2_w"], p["conv2_b"])
    sc = jnp.einsum("nchw,cd->ndhw", x, p["sc_w"]) + p["sc_b"][None, :, None, None]
    out_res = (sc + hh) / OUTPUT_SCALE_FACTOR
    up = jnp.repeat(jnp.repeat(out_res, 2, axis=2), 2, axis=3)
    out_up = conv3(up, p["up_w"], p["up_b"])
    return out_res, out_up


# ----------------------------------------------------------------------------
# Main
# ----------------------------------------------------------------------------
if __name__ == "__main__":
    N = 2
    IN_CH = 8            # skip-connection channels
    PREV_CH = 8          # prev_output_channel (current hidden_states channels)
    OUT_CH = 8
    TEMB_CH = 16
    H = W = 16
    CAT_CH = PREV_CH + IN_CH   # 16

    key = jax.random.PRNGKey(0)
    keys = jax.random.split(key, 16)

    def init(k, shape, scale=0.05):
        return (scale * jax.random.normal(k, shape)).astype(jnp.float32)

    params = {
        # ResnetBlock2D(in=16, out=8, temb=16, groups=4)
        "norm1_g": jnp.ones((CAT_CH,), jnp.float32),
        "norm1_b": jnp.zeros((CAT_CH,), jnp.float32),
        "conv1_w": init(keys[0], (3, 3, CAT_CH, OUT_CH)),   # HWIO
        "conv1_b": init(keys[1], (OUT_CH,)),
        "temb_w":  init(keys[2], (TEMB_CH, OUT_CH)),
        "temb_b":  init(keys[3], (OUT_CH,)),
        "norm2_g": jnp.ones((OUT_CH,), jnp.float32),
        "norm2_b": jnp.zeros((OUT_CH,), jnp.float32),
        "conv2_w": init(keys[4], (3, 3, OUT_CH, OUT_CH)),
        "conv2_b": init(keys[5], (OUT_CH,)),
        "sc_w":    init(keys[6], (CAT_CH, OUT_CH)),          # 1x1 shortcut conv
        "sc_b":    init(keys[7], (OUT_CH,)),
        # Upsample2D conv
        "up_w":    init(keys[8], (3, 3, OUT_CH, OUT_CH)),
        "up_b":    init(keys[9], (OUT_CH,)),
    }

    hidden_states = jax.random.normal(keys[10], (N, PREV_CH, H, W), jnp.float32)
    res_hidden = jax.random.normal(keys[11], (N, IN_CH, H, W), jnp.float32)
    temb = jax.random.normal(keys[12], (N, TEMB_CH), jnp.float32)

    fwd = jax.jit(upblock2d_forward)
    out, output_states = fwd(hidden_states, (res_hidden,), temb, params)
    out = jax.block_until_ready(out)
    for o in output_states:
        jax.block_until_ready(o)

    assert out.shape == (N, OUT_CH, 2 * H, 2 * W)
    assert output_states[0].shape == (N, OUT_CH, H, W)
    assert output_states[1].shape == (N, OUT_CH, 2 * H, 2 * W)
    assert bool(jnp.all(jnp.isfinite(out)))

    # correctness sanity check against a pure-JAX/XLA reference
    ref_res, ref_up = _reference_forward(hidden_states, res_hidden, temb, params)
    err_res = float(jnp.max(jnp.abs(output_states[0] - ref_res)))
    err_up = float(jnp.max(jnp.abs(out - ref_up)))
    assert err_res < 5e-2 and err_up < 5e-2, (err_res, err_up)

    print("KERNEL_OK")
</pallas_src>

<mosaic_0001>
module attributes {stable_mosaic.version = 11 : i64} {
  func.func @_upblock_kernel(%arg0: i32, %arg1: memref<1x8x256xf32, #tpu.memory_space<vmem>>, %arg2: memref<1x8x256xf32, #tpu.memory_space<vmem>>, %arg3: memref<1x16x1xf32, #tpu.memory_space<vmem>>, %arg4: memref<16x1xf32, #tpu.memory_space<vmem>>, %arg5: memref<16x1xf32, #tpu.memory_space<vmem>>, %arg6: memref<16x16xf32, #tpu.memory_space<vmem>>, %arg7: memref<8x160xf32, #tpu.memory_space<vmem>>, %arg8: memref<8x1xf32, #tpu.memory_space<vmem>>, %arg9: memref<8x1xf32, #tpu.memory_space<vmem>>, %arg10: memref<8x1xf32, #tpu.memory_space<vmem>>, %arg11: memref<8x8xf32, #tpu.memory_space<vmem>>, %arg12: memref<8x72xf32, #tpu.memory_space<vmem>>, %arg13: memref<8x16xf32, #tpu.memory_space<vmem>>, %arg14: memref<8x1xf32, #tpu.memory_space<vmem>>, %arg15: memref<256x1024xf32, #tpu.memory_space<vmem>>, %arg16: memref<8x72xf32, #tpu.memory_space<vmem>>, %arg17: memref<8x1xf32, #tpu.memory_space<vmem>>, %arg18: memref<9x256xf32, #tpu.memory_space<vmem>>, %arg19: memref<9x1024xf32, #tpu.memory_space<vmem>>, %arg20: memref<1x8x256xf32, #tpu.memory_space<vmem>>, %arg21: memref<1x8x1024xf32, #tpu.memory_space<vmem>>) attributes {dimension_semantics = [#tpu.dimension_semantics<parallel>], iteration_bounds = array<i64: 2>, scalar_prefetch = 0 : i64, scratch_operands = 0 : i64, tpu.core_type = #tpu.core_type<tc>, window_params = [{transform_indices = @transform_0, window_bounds = array<i64: 1, 8, 256>}, {transform_indices = @transform_1, window_bounds = array<i64: 1, 8, 256>}, {transform_indices = @transform_2, window_bounds = array<i64: 1, 16, 1>}, {pipeline_mode = #tpu.pipeline_mode<synchronous>, transform_indices = @transform_3, window_bounds = array<i64: 16, 1>}, {pipeline_mode = #tpu.pipeline_mode<synchronous>, transform_indices = @transform_4, window_bounds = array<i64: 16, 1>}, {pipeline_mode = #tpu.pipeline_mode<synchronous>, transform_indices = @transform_5, window_bounds = array<i64: 16, 16>}, {pipeline_mode = #tpu.pipeline_mode<synchronous>, transform_indices = @transform_6, window_bounds = array<i64: 8, 160>}, {pipeline_mode = #tpu.pipeline_mode<synchronous>, transform_indices = @transform_7, window_bounds = array<i64: 8, 1>}, {pipeline_mode = #tpu.pipeline_mode<synchronous>, transform_indices = @transform_8, window_bounds = array<i64: 8, 1>}, {pipeline_mode = #tpu.pipeline_mode<synchronous>, transform_indices = @transform_9, window_bounds = array<i64: 8, 1>}, {pipeline_mode = #tpu.pipeline_mode<synchronous>, transform_indices = @transform_10, window_bounds = array<i64: 8, 8>}, {pipeline_mode = #tpu.pipeline_mode<synchronous>, transform_indices = @transform_11, window_bounds = array<i64: 8, 72>}, {pipeline_mode = #tpu.pipeline_mode<synchronous>, transform_indices = @transform_12, window_bounds = array<i64: 8, 16>}, {pipeline_mode = #tpu.pipeline_mode<synchronous>, transform_indices = @transform_13, window_bounds = array<i64: 8, 1>}, {pipeline_mode = #tpu.pipeline_mode<synchronous>, transform_indices = @transform_14, window_bounds = array<i64: 256, 1024>}, {pipeline_mode = #tpu.pipeline_mode<synchronous>, transform_indices = @transform_15, window_bounds = array<i64: 8, 72>}, {pipeline_mode = #tpu.pipeline_mode<synchronous>, transform_indices = @transform_16, window_bounds = array<i64: 8, 1>}, {pipeline_mode = #tpu.pipeline_mode<synchronous>, transform_indices = @transform_17, window_bounds = array<i64: 9, 256>}, {pipeline_mode = #tpu.pipeline_mode<synchronous>, transform_indices = @transform_18, window_bounds = array<i64: 9, 1024>}, {transform_indices = @transform_19, window_bounds = array<i64: 1, 8, 256>}, {transform_indices = @transform_20, window_bounds = array<i64: 1, 8, 1024>}]} {
    %c0 = arith.constant 0 : index
    %c0_0 = arith.constant 0 : index
    %c0_1 = arith.constant 0 : index
    %0 = vector.load %arg1[%c0, %c0_0, %c0_1] : memref<1x8x256xf32, #tpu.memory_space<vmem>>, vector<1x8x256xf32>
    %1 = vector.shape_cast %0 : vector<1x8x256xf32> to vector<8x256xf32>
    %c0_2 = arith.constant 0 : index
    %c0_3 = arith.constant 0 : index
    %c0_4 = arith.constant 0 : index
    %2 = vector.load %arg2[%c0_2, %c0_3, %c0_4] : memref<1x8x256xf32, #tpu.memory_space<vmem>>, vector<1x8x256xf32>
    %3 = vector.shape_cast %2 : vector<1x8x256xf32> to vector<8x256xf32>
    %4 = tpu.concatenate %1, %3 in 0 : vector<8x256xf32>, vector<8x256xf32> -> vector<16x256xf32>
    %c0_5 = arith.constant 0 : index
    %c0_6 = arith.constant 0 : index
    %5 = vector.load %arg18[%c0_5, %c0_6] : memref<9x256xf32, #tpu.memory_space<vmem>>, vector<9x256xf32>
    %c0_7 = arith.constant 0 : index
    %c0_8 = arith.constant 0 : index
    %6 = vector.load %arg19[%c0_7, %c0_8] : memref<9x1024xf32, #tpu.memory_space<vmem>>, vector<9x1024xf32>
    %c0_9 = arith.constant 0 : index
    %c0_10 = arith.constant 0 : index
    %7 = vector.load %arg4[%c0_9, %c0_10] : memref<16x1xf32, #tpu.memory_space<vmem>>, vector<16x1xf32>
    %c0_11 = arith.constant 0 : index
    %c0_12 = arith.constant 0 : index
    %8 = vector.load %arg5[%c0_11, %c0_12] : memref<16x1xf32, #tpu.memory_space<vmem>>, vector<16x1xf32>
    %c0_13 = arith.constant 0 : index
    %c0_14 = arith.constant 0 : index
    %9 = vector.load %arg6[%c0_13, %c0_14] : memref<16x16xf32, #tpu.memory_space<vmem>>, vector<16x16xf32>
    %cst = arith.constant dense<0.000000e+00> : vector<16x256xf32>
    %10 = tpu.matmul %9, %4, %cst {dimension_numbers = #tpu.dot_dimension_numbers<[1], [0], [0], [1], [0, 0, 1, 1], [], []>} : vector<16x16xf32>, vector<16x256xf32>, vector<16x256xf32> -> vector<16x256xf32>
    %cst_15 = arith.constant dense<0.000000e+00> : vector<16xf32>
    %11 = vector.multi_reduction <add>, %10, %cst_15 [1] : vector<16x256xf32> to vector<16xf32>
    %12 = vector.shape_cast %11 : vector<16xf32> to vector<16x1xf32>
    %cst_16 = arith.constant 9.765625E-4 : f32
    %13 = vector.broadcast %cst_16 : f32 to vector<16x1xf32>
    %14 = arith.mulf %12, %13 : vector<16x1xf32>
    %15 = vector.broadcast %14 : vector<16x1xf32> to vector<16x256xf32>
    %16 = arith.subf %4, %15 : vector<16x256xf32>
    %17 = arith.mulf %16, %16 : vector<16x256xf32>
    %cst_17 = arith.constant dense<0.000000e+00> : vector<16x256xf32>
    %18 = tpu.matmul %9, %17, %cst_17 {dimension_numbers = #tpu.dot_dimension_numbers<[1], [0], [0], [1], [0, 0, 1, 1], [], []>} : vector<16x16xf32>, vector<16x256xf32>, vector<16x256xf32> -> vector<16x256xf32>
    %cst_18 = arith.constant dense<0.000000e+00> : vector<16xf32>
    %19 = vector.multi_reduction <add>, %18, %cst_18 [1] : vector<16x256xf32> to vector<16xf32>
    %20 = vector.shape_cast %19 : vector<16xf32> to vector<16x1xf32>
    %cst_19 = arith.constant 9.765625E-4 : f32
    %21 = vector.broadcast %cst_19 : f32 to vector<16x1xf32>
    %22 = arith.mulf %20, %21 : vector<16x1xf32>
    %cst_20 = arith.constant 9.99999997E-7 : f32
    %23 = vector.broadcast %cst_20 : f32 to vector<16x1xf32>
    %24 = arith.addf %22, %23 : vector<16x1xf32>
    %25 = math.rsqrt %24 : vector<16x1xf32>
    %26 = vector.broadcast %25 : vector<16x1xf32> to vector<16x256xf32>
    %27 = arith.mulf %16, %26 : vector<16x256xf32>
    %28 = vector.broadcast %7 : vector<16x1xf32> to vector<16x256xf32>
    %29 = arith.mulf %27, %28 : vector<16x256xf32>
    %30 = vector.broadcast %8 : vector<16x1xf32> to vector<16x256xf32>
    %31 = arith.addf %29, %30 : vector<16x256xf32>
    %32 = arith.negf %31 : vector<16x256xf32>
    %33 = math.exp %32 : vector<16x256xf32>
    %cst_21 = arith.constant 1.000000e+00 : f32
    %34 = vector.broadcast %cst_21 : f32 to vector<16x256xf32>
    %35 = arith.addf %34, %33 : vector<16x256xf32>
    %36 = arith.divf %34, %35 : vector<16x256xf32>
    %37 = arith.mulf %31, %36 : vector<16x256xf32>
    %c0_22 = arith.constant 0 : index
    %c0_23 = arith.constant 0 : index
    %c0_24 = arith.constant 0 : index
    %38 = vector.load %arg3[%c0_22, %c0_23, %c0_24] : memref<1x16x1xf32, #tpu.memory_space<vmem>>, vector<1x16x1xf32>
    %39 = vector.shape_cast %38 : vector<1x16x1xf32> to vector<16x1xf32>
    %40 = arith.negf %39 : vector<16x1xf32>
    %41 = math.exp %40 : vector<16x1xf32>
    %cst_25 = arith.constant 1.000000e+00 : f32
    %42 = vector.broadcast %cst_25 : f32 to vector<16x1xf32>
    %43 = arith.addf %42, %41 : vector<16x1xf32>
    %44 = arith.divf %42, %43 : vector<16x1xf32>
    %45 = arith.mulf %39, %44 : vector<16x1xf32>
    %46 = vector.shape_cast %45 : vector<16x1xf32> to vector<16x1xf32>
    %47 = vector.broadcast %46 : vector<16x1xf32> to vector<16x256xf32>
    %48 = vector.extract_strided_slice %37 {offsets = [0, 239], sizes = [16, 17], strides = [1, 1]} : vector<16x256xf32> to vector<16x17xf32>
    %49 = vector.extract_strided_slice %37 {offsets = [0, 0], sizes = [16, 239], strides = [1, 1]} : vector<16x256xf32> to vector<16x239xf32>
    %50 = tpu.concatenate %48, %49 in 1 : vector<16x17xf32>, vector<16x239xf32> -> vector<16x256xf32>
    %51 = vector.extract_strided_slice %5 {offsets = [0, 0], sizes = [1, 256], strides = [1, 1]} : vector<9x256xf32> to vector<1x256xf32>
    %52 = vector.broadcast %51 : vector<1x256xf32> to vector<16x256xf32>
    %53 = arith.mulf %50, %52 : vector<16x256xf32>
    %54 = vector.extract_strided_slice %37 {offsets = [0, 240], sizes = [16, 16], strides = [1, 1]} : vector<16x256xf32> to vector<16x16xf32>
    %55 = vector.extract_strided_slice %37 {offsets = [0, 0], sizes = [16, 240], strides = [1, 1]} : vector<16x256xf32> to vector<16x240xf32>
    %56 = tpu.concatenate %54, %55 in 1 : vector<16x16xf32>, vector<16x240xf32> -> vector<16x256xf32>
    %57 = vector.extract_strided_slice %5 {offsets = [1, 0], sizes = [1, 256], strides = [1, 1]} : vector<9x256xf32> to vector<1x256xf32>
    %58 = vector.broadcast %57 : vector<1x256xf32> to vector<16x256xf32>
    %59 = arith.mulf %56, %58 : vector<16x256xf32>
    %60 = vector.extract_strided_slice %37 {offsets = [0, 241], sizes = [16, 15], strides = [1, 1]} : vector<16x256xf32> to vector<16x15xf32>
    %61 = vector.extract_strided_slice %37 {offsets = [0, 0], sizes = [16, 241], strides = [1, 1]} : vector<16x256xf32> to vector<16x241xf32>
    %62 = tpu.concatenate %60, %61 in 1 : vector<16x15xf32>, vector<16x241xf32> -> vector<16x256xf32>
    %63 = vector.extract_strided_slice %5 {offsets = [2, 0], sizes = [1, 256], strides = [1, 1]} : vector<9x256xf32> to vector<1x256xf32>
    %64 = vector.broadcast %63 : vector<1x256xf32> to vector<16x256xf32>
    %65 = arith.mulf %62, %64 : vector<16x256xf32>
    %66 = vector.extract_strided_slice %37 {offsets = [0, 255], sizes = [16, 1], strides = [1, 1]} : vector<16x256xf32> to vector<16x1xf32>
    %67 = vector.extract_strided_slice %37 {offsets = [0, 0], sizes = [16, 255], strides = [1, 1]} : vector<16x256xf32> to vector<16x255xf32>
    %68 = tpu.concatenate %66, %67 in 1 : vector<16x1xf32>, vector<16x255xf32> -> vector<16x256xf32>
    %69 = vector.extract_strided_slice %5 {offsets = [3, 0], sizes = [1, 256], strides = [1, 1]} : vector<9x256xf32> to vector<1x256xf32>
    %70 = vector.broadcast %69 : vector<1x256xf32> to vector<16x256xf32>
    %71 = arith.mulf %68, %70 : vector<16x256xf32>
    %72 = vector.extract_strided_slice %37 {offsets = [0, 1], sizes = [16, 255], strides = [1, 1]} : vector<16x256xf32> to vector<16x255xf32>
    %73 = vector.extract_strided_slice %37 {offsets = [0, 0], sizes = [16, 1], strides = [1, 1]} : vector<16x256xf32> to vector<16x1xf32>
    %74 = tpu.concatenate %72, %73 in 1 : vector<16x255xf32>, vector<16x1xf32> -> vector<16x256xf32>
    %75 = vector.extract_strided_slice %5 {offsets = [5, 0], sizes = [1, 256], strides = [1, 1]} : vector<9x256xf32> to vector<1x256xf32>
    %76 = vector.broadcast %75 : vector<1x256xf32> to vector<16x256xf32>
    %77 = arith.mulf %74, %76 : vector<16x256xf32>
    %78 = vector.extract_strided_slice %37 {offsets = [0, 15], sizes = [16, 241], strides = [1, 1]} : vector<16x256xf32> to vector<16x241xf32>
    %79 = vector.extract_strided_slice %37 {offsets = [0, 0], sizes = [16, 15], strides = [1, 1]} : vector<16x256xf32> to vector<16x15xf32>
    %80 = tpu.concatenate %78, %79 in 1 : vector<16x241xf32>, vector<16x15xf32> -> vector<16x256xf32>
    %81 = vector.extract_strided_slice %5 {offsets = [6, 0], sizes = [1, 256], strides = [1, 1]} : vector<9x256xf32> to vector<1x256xf32>
    %82 = vector.broadcast %81 : vector<1x256xf32> to vector<16x256xf32>
    %83 = arith.mulf %80, %82 : vector<16x256xf32>
    %84 = vector.extract_strided_slice %37 {offsets = [0, 16], sizes = [16, 240], strides = [1, 1]} : vector<16x256xf32> to vector<16x240xf32>
    %85 = vector.extract_strided_slice %37 {offsets = [0, 0], sizes = [16, 16], strides = [1, 1]} : vector<16x256xf32> to vector<16x16xf32>
    %86 = tpu.concatenate %84, %85 in 1 : vector<16x240xf32>, vector<16x16xf32> -> vector<16x256xf32>
    %87 = vector.extract_strided_slice %5 {offsets = [7, 0], sizes = [1, 256], strides = [1, 1]} : vector<9x256xf32> to vector<1x256xf32>
    %88 = vector.broadcast %87 : vector<1x256xf32> to vector<16x256xf32>
    %89 = arith.mulf %86, %88 : vector<16x256xf32>
    %90 = vector.extract_strided_slice %37 {offsets = [0, 17], sizes = [16, 239], strides = [1, 1]} : vector<16x256xf32> to vector<16x239xf32>
    %91 = vector.extract_strided_slice %37 {offsets = [0, 0], sizes = [16, 17], strides = [1, 1]} : vector<16x256xf32> to vector<16x17xf32>
    %92 = tpu.concatenate %90, %91 in 1 : vector<16x239xf32>, vector<16x17xf32> -> vector<16x256xf32>
    %93 = vector.extract_strided_slice %5 {offsets = [8, 0], sizes = [1, 256], strides = [1, 1]} : vector<9x256xf32> to vector<1x256xf32>
    %94 = vector.broadcast %93 : vector<1x256xf32> to vector<16x256xf32>
    %95 = arith.mulf %92, %94 : vector<16x256xf32>
    %96 = tpu.concatenate %53, %59, %65, %71, %37, %77, %83, %89, %95 in 0 : vector<16x256xf32>, vector<16x256xf32>, vector<16x256xf32>, vector<16x256xf32>, vector<16x256xf32>, vector<16x256xf32>, vector<16x256xf32>, vector<16x256xf32>, vector<16x256xf32> -> vector<144x256xf32>
    %97 = tpu.concatenate %96, %47 in 0 : vector<144x256xf32>, vector<16x256xf32> -> vector<160x256xf32>
    %c0_26 = arith.constant 0 : index
    %c0_27 = arith.constant 0 : index
    %98 = vector.load %arg7[%c0_26, %c0_27] : memref<8x160xf32, #tpu.memory_space<vmem>>, vector<8x160xf32>
    %cst_28 = arith.constant dense<0.000000e+00> : vector<8x256xf32>
    %99 = tpu.matmul %98, %97, %cst_28 {dimension_numbers = #tpu.dot_dimension_numbers<[1], [0], [0], [1], [0, 0, 1, 1], [], []>} : vector<8x160xf32>, vector<160x256xf32>, vector<8x256xf32> -> vector<8x256xf32>
    %c0_29 = arith.constant 0 : index
    %c0_30 = arith.constant 0 : index
    %100 = vector.load %arg8[%c0_29, %c0_30] : memref<8x1xf32, #tpu.memory_space<vmem>>, vector<8x1xf32>
    %101 = vector.broadcast %100 : vector<8x1xf32> to vector<8x256xf32>
    %102 = arith.addf %99, %101 : vector<8x256xf32>
    %c0_31 = arith.constant 0 : index
    %c0_32 = arith.constant 0 : index
    %103 = vector.load %arg9[%c0_31, %c0_32] : memref<8x1xf32, #tpu.memory_space<vmem>>, vector<8x1xf32>
    %c0_33 = arith.constant 0 : index
    %c0_34 = arith.constant 0 : index
    %104 = vector.load %arg10[%c0_33, %c0_34] : memref<8x1xf32, #tpu.memory_space<vmem>>, vector<8x1xf32>
    %c0_35 = arith.constant 0 : index
    %c0_36 = arith.constant 0 : index
    %105 = vector.load %arg11[%c0_35, %c0_36] : memref<8x8xf32, #tpu.memory_space<vmem>>, vector<8x8xf32>
    %cst_37 = arith.constant dense<0.000000e+00> : vector<8x256xf32>
    %106 = tpu.matmul %105, %102, %cst_37 {dimension_numbers = #tpu.dot_dimension_numbers<[1], [0], [0], [1], [0, 0, 1, 1], [], []>} : vector<8x8xf32>, vector<8x256xf32>, vector<8x256xf32> -> vector<8x256xf32>
    %cst_38 = arith.constant dense<0.000000e+00> : vector<8xf32>
    %107 = vector.multi_reduction <add>, %106, %cst_38 [1] : vector<8x256xf32> to vector<8xf32>
    %108 = vector.shape_cast %107 : vector<8xf32> to vector<8x1xf32>
    %cst_39 = arith.constant 0.001953125 : f32
    %109 = vector.broadcast %cst_39 : f32 to vector<8x1xf32>
    %110 = arith.mulf %108, %109 : vector<8x1xf32>
    %111 = vector.broadcast %110 : vector<8x1xf32> to vector<8x256xf32>
    %112 = arith.subf %102, %111 : vector<8x256xf32>
    %113 = arith.mulf %112, %112 : vector<8x256xf32>
    %cst_40 = arith.constant dense<0.000000e+00> : vector<8x256xf32>
    %114 = tpu.matmul %105, %113, %cst_40 {dimension_numbers = #tpu.dot_dimension_numbers<[1], [0], [0], [1], [0, 0, 1, 1], [], []>} : vector<8x8xf32>, vector<8x256xf32>, vector<8x256xf32> -> vector<8x256xf32>
    %cst_41 = arith.constant dense<0.000000e+00> : vector<8xf32>
    %115 = vector.multi_reduction <add>, %114, %cst_41 [1] : vector<8x256xf32> to vector<8xf32>
    %116 = vector.shape_cast %115 : vector<8xf32> to vector<8x1xf32>
    %cst_42 = arith.constant 0.001953125 : f32
    %117 = vector.broadcast %cst_42 : f32 to vector<8x1xf32>
    %118 = arith.mulf %116, %117 : vector<8x1xf32>
    %cst_43 = arith.constant 9.99999997E-7 : f32
    %119 = vector.broadcast %cst_43 : f32 to vector<8x1xf32>
    %120 = arith.addf %118, %119 : vector<8x1xf32>
    %121 = math.rsqrt %120 : vector<8x1xf32>
    %122 = vector.broadcast %121 : vector<8x1xf32> to vector<8x256xf32>
    %123 = arith.mulf %112, %122 : vector<8x256xf32>
    %124 = vector.broadcast %103 : vector<8x1xf32> to vector<8x256xf32>
    %125 = arith.mulf %123, %124 : vector<8x256xf32>
    %126 = vector.broadcast %104 : vector<8x1xf32> to vector<8x256xf32>
    %127 = arith.addf %125, %126 : vector<8x256xf32>
    %128 = arith.negf %127 : vector<8x256xf32>
    %129 = math.exp %128 : vector<8x256xf32>
    %cst_44 = arith.constant 1.000000e+00 : f32
    %130 = vector.broadcast %cst_44 : f32 to vector<8x256xf32>
    %131 = arith.addf %130, %129 : vector<8x256xf32>
    %132 = arith.divf %130, %131 : vector<8x256xf32>
    %133 = arith.mulf %127, %132 : vector<8x256xf32>
    %c0_45 = arith.constant 0 : index
    %c0_46 = arith.constant 0 : index
    %134 = vector.load %arg12[%c0_45, %c0_46] : memref<8x72xf32, #tpu.memory_space<vmem>>, vector<8x72xf32>
    %135 = vector.extract_strided_slice %133 {offsets = [0, 239], sizes = [8, 17], strides = [1, 1]} : vector<8x256xf32> to vector<8x17xf32>
    %136 = vector.extract_strided_slice %133 {offsets = [0, 0], sizes = [8, 239], strides = [1, 1]} : vector<8x256xf32> to vector<8x239xf32>
    %137 = tpu.concatenate %135, %136 in 1 : vector<8x17xf32>, vector<8x239xf32> -> vector<8x256xf32>
    %138 = vector.extract_strided_slice %5 {offsets = [0, 0], sizes = [1, 256], strides = [1, 1]} : vector<9x256xf32> to vector<1x256xf32>
    %139 = vector.broadcast %138 : vector<1x256xf32> to vector<8x256xf32>
    %140 = arith.mulf %137, %139 : vector<8x256xf32>
    %141 = vector.extract_strided_slice %133 {offsets = [0, 240], sizes = [8, 16], strides = [1, 1]} : vector<8x256xf32> to vector<8x16xf32>
    %142 = vector.extract_strided_slice %133 {offsets = [0, 0], sizes = [8, 240], strides = [1, 1]} : vector<8x256xf32> to vector<8x240xf32>
    %143 = tpu.concatenate %141, %142 in 1 : vector<8x16xf32>, vector<8x240xf32> -> vector<8x256xf32>
    %144 = vector.extract_strided_slice %5 {offsets = [1, 0], sizes = [1, 256], strides = [1, 1]} : vector<9x256xf32> to vector<1x256xf32>
    %145 = vector.broadcast %144 : vector<1x256xf32> to vector<8x256xf32>
    %146 = arith.mulf %143, %145 : vector<8x256xf32>
    %147 = vector.extract_strided_slice %133 {offsets = [0, 241], sizes = [8, 15], strides = [1, 1]} : vector<8x256xf32> to vector<8x15xf32>
    %148 = vector.extract_strided_slice %133 {offsets = [0, 0], sizes = [8, 241], strides = [1, 1]} : vector<8x256xf32> to vector<8x241xf32>
    %149 = tpu.concatenate %147, %148 in 1 : vector<8x15xf32>, vector<8x241xf32> -> vector<8x256xf32>
    %150 = vector.extract_strided_slice %5 {offsets = [2, 0], sizes = [1, 256], strides = [1, 1]} : vector<9x256xf32> to vector<1x256xf32>
    %151 = vector.broadcast %150 : vector<1x256xf32> to vector<8x256xf32>
    %152 = arith.mulf %149, %151 : vector<8x256xf32>
    %153 = vector.extract_strided_slice %133 {offsets = [0, 255], sizes = [8, 1], strides = [1, 1]} : vector<8x256xf32> to vector<8x1xf32>
    %154 = vector.extract_strided_slice %133 {offsets = [0, 0], sizes = [8, 255], strides = [1, 1]} : vector<8x256xf32> to vector<8x255xf32>
    %155 = tpu.concatenate %153, %154 in 1 : vector<8x1xf32>, vector<8x255xf32> -> vector<8x256xf32>
    %156 = vector.extract_strided_slice %5 {offsets = [3, 0], sizes = [1, 256], strides = [1, 1]} : vector<9x256xf32> to vector<1x256xf32>
    %157 = vector.broadcast %156 : vector<1x256xf32> to vector<8x256xf32>
    %158 = arith.mulf %155, %157 : vector<8x256xf32>
    %159 = vector.extract_strided_slice %133 {offsets = [0, 1], sizes = [8, 255], strides = [1, 1]} : vector<8x256xf32> to vector<8x255xf32>
    %160 = vector.extract_strided_slice %133 {offsets = [0, 0], sizes = [8, 1], strides = [1, 1]} : vector<8x256xf32> to vector<8x1xf32>
    %161 = tpu.concatenate %159, %160 in 1 : vector<8x255xf32>, vector<8x1xf32> -> vector<8x256xf32>
    %162 = vector.extract_strided_slice %5 {offsets = [5, 0], sizes = [1, 256], strides = [1, 1]} : vector<9x256xf32> to vector<1x256xf32>
    %163 = vector.broadcast %162 : vector<1x256xf32> to vector<8x256xf32>
    %164 = arith.mulf %161, %163 : vector<8x256xf32>
    %165 = vector.extract_strided_slice %133 {offsets = [0, 15], sizes = [8, 241], strides = [1, 1]} : vector<8x256xf32> to vector<8x241xf32>
    %166 = vector.extract_strided_slice %133 {offsets = [0, 0], sizes = [8, 15], strides = [1, 1]} : vector<8x256xf32> to vector<8x15xf32>
    %167 = tpu.concatenate %165, %166 in 1 : vector<8x241xf32>, vector<8x15xf32> -> vector<8x256xf32>
    %168 = vector.extract_strided_slice %5 {offsets = [6, 0], sizes = [1, 256], strides = [1, 1]} : vector<9x256xf32> to vector<1x256xf32>
    %169 = vector.broadcast %168 : vector<1x256xf32> to vector<8x256xf32>
    %170 = arith.mulf %167, %169 : vector<8x256xf32>
    %171 = vector.extract_strided_slice %133 {offsets = [0, 16], sizes = [8, 240], strides = [1, 1]} : vector<8x256xf32> to vector<8x240xf32>
    %172 = vector.extract_strided_slice %133 {offsets = [0, 0], sizes = [8, 16], strides = [1, 1]} : vector<8x256xf32> to vector<8x16xf32>
    %173 = tpu.concatenate %171, %172 in 1 : vector<8x240xf32>, vector<8x16xf32> -> vector<8x256xf32>
    %174 = vector.extract_strided_slice %5 {offsets = [7, 0], sizes = [1, 256], strides = [1, 1]} : vector<9x256xf32> to vector<1x256xf32>
    %175 = vector.broadcast %174 : vector<1x256xf32> to vector<8x256xf32>
    %176 = arith.mulf %173, %175 : vector<8x256xf32>
    %177 = vector.extract_strided_slice %133 {offsets = [0, 17], sizes = [8, 239], strides = [1, 1]} : vector<8x256xf32> to vector<8x239xf32>
    %178 = vector.extract_strided_slice %133 {offsets = [0, 0], sizes = [8, 17], strides = [1, 1]} : vector<8x256xf32> to vector<8x17xf32>
    %179 = tpu.concatenate %177, %178 in 1 : vector<8x239xf32>, vector<8x17xf32> -> vector<8x256xf32>
    %180 = vector.extract_strided_slice %5 {offsets = [8, 0], sizes = [1, 256], strides = [1, 1]} : vector<9x256xf32> to vector<1x256xf32>
    %181 = vector.broadcast %180 : vector<1x256xf32> to vector<8x256xf32>
    %182 = arith.mulf %179, %181 : vector<8x256xf32>
    %183 = tpu.concatenate %140, %146, %152, %158, %133, %164, %170, %176, %182 in 0 : vector<8x256xf32>, vector<8x256xf32>, vector<8x256xf32>, vector<8x256xf32>, vector<8x256xf32>, vector<8x256xf32>, vector<8x256xf32>, vector<8x256xf32>, vector<8x256xf32> -> vector<72x256xf32>
    %cst_47 = arith.constant dense<0.000000e+00> : vector<8x256xf32>
    %184 = tpu.matmul %134, %183, %cst_47 {dimension_numbers = #tpu.dot_dimension_numbers<[1], [0], [0], [1], [0, 0, 1, 1], [], []>} : vector<8x72xf32>, vector<72x256xf32>, vector<8x256xf32> -> vector<8x256xf32>
    %c0_48 = arith.constant 0 : index
    %c0_49 = arith.constant 0 : index
    %185 = vector.load %arg13[%c0_48, %c0_49] : memref<8x16xf32, #tpu.memory_space<vmem>>, vector<8x16xf32>
    %cst_50 = arith.constant dense<0.000000e+00> : vector<8x256xf32>
    %186 = tpu.matmul %185, %4, %cst_50 {dimension_numbers = #tpu.dot_dimension_numbers<[1], [0], [0], [1], [0, 0, 1, 1], [], []>} : vector<8x16xf32>, vector<16x256xf32>, vector<8x256xf32> -> vector<8x256xf32>
    %187 = arith.addf %186, %184 : vector<8x256xf32>
    %c0_51 = arith.constant 0 : index
    %c0_52 = arith.constant 0 : index
    %188 = vector.load %arg14[%c0_51, %c0_52] : memref<8x1xf32, #tpu.memory_space<vmem>>, vector<8x1xf32>
    %189 = vector.broadcast %188 : vector<8x1xf32> to vector<8x256xf32>
    %190 = arith.addf %187, %189 : vector<8x256xf32>
    %c0_53 = arith.constant 0 : index
    %c0_54 = arith.constant 0 : index
    %c0_55 = arith.constant 0 : index
    %191 = vector.load %arg20[%c0_53, %c0_54, %c0_55] : memref<1x8x256xf32, #tpu.memory_space<vmem>>, vector<1x8x256xf32>
    %192 = vector.shape_cast %191 : vector<1x8x256xf32> to vector<8x256xf32>
    %193 = vector.shape_cast %190 : vector<8x256xf32> to vector<1x8x256xf32>
    tpu.vector_store %arg20[%c0_53, %c0_54, %c0_55], %193 {strides = array<i32>} : memref<1x8x256xf32, #tpu.memory_space<vmem>>, vector<1x8x256xf32>,
    %c0_56 = arith.constant 0 : index
    %c0_57 = arith.constant 0 : index
    %194 = vector.load %arg15[%c0_56, %c0_57] : memref<256x1024xf32, #tpu.memory_space<vmem>>, vector<256x1024xf32>
    %cst_58 = arith.constant dense<0.000000e+00> : vector<8x1024xf32>
    %195 = tpu.matmul %190, %194, %cst_58 {dimension_numbers = #tpu.dot_dimension_numbers<[1], [0], [0], [1], [0, 0, 1, 1], [], []>} : vector<8x256xf32>, vector<256x1024xf32>, vector<8x1024xf32> -> vector<8x1024xf32>
    %c0_59 = arith.constant 0 : index
    %c0_60 = arith.constant 0 : index
    %196 = vector.load %arg16[%c0_59, %c0_60] : memref<8x72xf32, #tpu.memory_space<vmem>>, vector<8x72xf32>
    %197 = vector.extract_strided_slice %195 {offsets = [0, 991], sizes = [8, 33], strides = [1, 1]} : vector<8x1024xf32> to vector<8x33xf32>
    %198 = vector.extract_strided_slice %195 {offsets = [0, 0], sizes = [8, 991], strides = [1, 1]} : vector<8x1024xf32> to vector<8x991xf32>
    %199 = tpu.concatenate %197, %198 in 1 : vector<8x33xf32>, vector<8x991xf32> -> vector<8x1024xf32>
    %200 = vector.extract_strided_slice %6 {offsets = [0, 0], sizes = [1, 1024], strides = [1, 1]} : vector<9x1024xf32> to vector<1x1024xf32>
    %201 = vector.broadcast %200 : vector<1x1024xf32> to vector<8x1024xf32>
    %202 = arith.mulf %199, %201 : vector<8x1024xf32>
    %203 = vector.extract_strided_slice %195 {offsets = [0, 992], sizes = [8, 32], strides = [1, 1]} : vector<8x1024xf32> to vector<8x32xf32>
    %204 = vector.extract_strided_slice %195 {offsets = [0, 0], sizes = [8, 992], strides = [1, 1]} : vector<8x1024xf32> to vector<8x992xf32>
    %205 = tpu.concatenate %203, %204 in 1 : vector<8x32xf32>, vector<8x992xf32> -> vector<8x1024xf32>
    %206 = vector.extract_strided_slice %6 {offsets = [1, 0], sizes = [1, 1024], strides = [1, 1]} : vector<9x1024xf32> to vector<1x1024xf32>
    %207 = vector.broadcast %206 : vector<1x1024xf32> to vector<8x1024xf32>
    %208 = arith.mulf %205, %207 : vector<8x1024xf32>
    %209 = vector.extract_strided_slice %195 {offsets = [0, 993], sizes = [8, 31], strides = [1, 1]} : vector<8x1024xf32> to vector<8x31xf32>
    %210 = vector.extract_strided_slice %195 {offsets = [0, 0], sizes = [8, 993], strides = [1, 1]} : vector<8x1024xf32> to vector<8x993xf32>
    %211 = tpu.concatenate %209, %210 in 1 : vector<8x31xf32>, vector<8x993xf32> -> vector<8x1024xf32>
    %212 = vector.extract_strided_slice %6 {offsets = [2, 0], sizes = [1, 1024], strides = [1, 1]} : vector<9x1024xf32> to vector<1x1024xf32>
    %213 = vector.broadcast %212 : vector<1x1024xf32> to vector<8x1024xf32>
    %214 = arith.mulf %211, %213 : vector<8x1024xf32>
    %215 = vector.extract_strided_slice %195 {offsets = [0, 1023], sizes = [8, 1], strides = [1, 1]} : vector<8x1024xf32> to vector<8x1xf32>
    %216 = vector.extract_strided_slice %195 {offsets = [0, 0], sizes = [8, 1023], strides = [1, 1]} : vector<8x1024xf32> to vector<8x1023xf32>
    %217 = tpu.concatenate %215, %216 in 1 : vector<8x1xf32>, vector<8x1023xf32> -> vector<8x1024xf32>
    %218 = vector.extract_strided_slice %6 {offsets = [3, 0], sizes = [1, 1024], strides = [1, 1]} : vector<9x1024xf32> to vector<1x1024xf32>
    %219 = vector.broadcast %218 : vector<1x1024xf32> to vector<8x1024xf32>
    %220 = arith.mulf %217, %219 : vector<8x1024xf32>
    %221 = vector.extract_strided_slice %195 {offsets = [0, 1], sizes = [8, 1023], strides = [1, 1]} : vector<8x1024xf32> to vector<8x1023xf32>
    %222 = vector.extract_strided_slice %195 {offsets = [0, 0], sizes = [8, 1], strides = [1, 1]} : vector<8x1024xf32> to vector<8x1xf32>
    %223 = tpu.concatenate %221, %222 in 1 : vector<8x1023xf32>, vector<8x1xf32> -> vector<8x1024xf32>
    %224 = vector.extract_strided_slice %6 {offsets = [5, 0], sizes = [1, 1024], strides = [1, 1]} : vector<9x1024xf32> to vector<1x1024xf32>
    %225 = vector.broadcast %224 : vector<1x1024xf32> to vector<8x1024xf32>
    %226 = arith.mulf %223, %225 : vector<8x1024xf32>
    %227 = vector.extract_strided_slice %195 {offsets = [0, 31], sizes = [8, 993], strides = [1, 1]} : vector<8x1024xf32> to vector<8x993xf32>
    %228 = vector.extract_strided_slice %195 {offsets = [0, 0], sizes = [8, 31], strides = [1, 1]} : vector<8x1024xf32> to vector<8x31xf32>
    %229 = tpu.concatenate %227, %228 in 1 : vector<8x993xf32>, vector<8x31xf32> -> vector<8x1024xf32>
    %230 = vector.extract_strided_slice %6 {offsets = [6, 0], sizes = [1, 1024], strides = [1, 1]} : vector<9x1024xf32> to vector<1x1024xf32>
    %231 = vector.broadcast %230 : vector<1x1024xf32> to vector<8x1024xf32>
    %232 = arith.mulf %229, %231 : vector<8x1024xf32>
    %233 = vector.extract_strided_slice %195 {offsets = [0, 32], sizes = [8, 992], strides = [1, 1]} : vector<8x1024xf32> to vector<8x992xf32>
    %234 = vector.extract_strided_slice %195 {offsets = [0, 0], sizes = [8, 32], strides = [1, 1]} : vector<8x1024xf32> to vector<8x32xf32>
    %235 = tpu.concatenate %233, %234 in 1 : vector<8x992xf32>, vector<8x32xf32> -> vector<8x1024xf32>
    %236 = vector.extract_strided_slice %6 {offsets = [7, 0], sizes = [1, 1024], strides = [1, 1]} : vector<9x1024xf32> to vector<1x1024xf32>
    %237 = vector.broadcast %236 : vector<1x1024xf32> to vector<8x1024xf32>
    %238 = arith.mulf %235, %237 : vector<8x1024xf32>
    %239 = vector.extract_strided_slice %195 {offsets = [0, 33], sizes = [8, 991], strides = [1, 1]} : vector<8x1024xf32> to vector<8x991xf32>
    %240 = vector.extract_strided_slice %195 {offsets = [0, 0], sizes = [8, 33], strides = [1, 1]} : vector<8x1024xf32> to vector<8x33xf32>
    %241 = tpu.concatenate %239, %240 in 1 : vector<8x991xf32>, vector<8x33xf32> -> vector<8x1024xf32>
    %242 = vector.extract_strided_slice %6 {offsets = [8, 0], sizes = [1, 1024], strides = [1, 1]} : vector<9x1024xf32> to vector<1x1024xf32>
    %243 = vector.broadcast %242 : vector<1x1024xf32> to vector<8x1024xf32>
    %244 = arith.mulf %241, %243 : vector<8x1024xf32>
    %245 = tpu.concatenate %202, %208, %214, %220, %195, %226, %232, %238, %244 in 0 : vector<8x1024xf32>, vector<8x1024xf32>, vector<8x1024xf32>, vector<8x1024xf32>, vector<8x1024xf32>, vector<8x1024xf32>, vector<8x1024xf32>, vector<8x1024xf32>, vector<8x1024xf32> -> vector<72x1024xf32>
    %cst_61 = arith.constant dense<0.000000e+00> : vector<8x1024xf32>
    %246 = tpu.matmul %196, %245, %cst_61 {dimension_numbers = #tpu.dot_dimension_numbers<[1], [0], [0], [1], [0, 0, 1, 1], [], []>} : vector<8x72xf32>, vector<72x1024xf32>, vector<8x1024xf32> -> vector<8x1024xf32>
    %c0_62 = arith.constant 0 : index
    %c0_63 = arith.constant 0 : index
    %247 = vector.load %arg17[%c0_62, %c0_63] : memref<8x1xf32, #tpu.memory_space<vmem>>, vector<8x1xf32>
    %248 = vector.broadcast %247 : vector<8x1xf32> to vector<8x1024xf32>
    %249 = arith.addf %246, %248 : vector<8x1024xf32>
    %c0_64 = arith.constant 0 : index
    %c0_65 = arith.constant 0 : index
    %c0_66 = arith.constant 0 : index
    %250 = vector.load %arg21[%c0_64, %c0_65, %c0_66] : memref<1x8x1024xf32, #tpu.memory_space<vmem>>, vector<1x8x1024xf32>
    %251 = vector.shape_cast %250 : vector<1x8x1024xf32> to vector<8x1024xf32>
    %252 = vector.shape_cast %249 : vector<8x1024xf32> to vector<1x8x1024xf32>
    tpu.vector_store %arg21[%c0_64, %c0_65, %c0_66], %252 {strides = array<i32>} : memref<1x8x1024xf32, #tpu.memory_space<vmem>>, vector<1x8x1024xf32>,
    return
  }
  func.func @transform_0(%arg0: i32) -> (i32, i32, i32) {
    %c0_i32 = arith.constant 0 : i32
    %c0_i32_0 = arith.constant 0 : i32
    %c0_i32_1 = arith.constant 0 : i32
    return %arg0, %c0_i32, %c0_i32_0 : i32, i32, i32
  }
  func.func @transform_1(%arg0: i32) -> (i32, i32, i32) {
    %c0_i32 = arith.constant 0 : i32
    %c0_i32_0 = arith.constant 0 : i32
    %c0_i32_1 = arith.constant 0 : i32
    return %arg0, %c0_i32, %c0_i32_0 : i32, i32, i32
  }
  func.func @transform_2(%arg0: i32) -> (i32, i32, i32) {
    %c0_i32 = arith.constant 0 : i32
    %c0_i32_0 = arith.constant 0 : i32
    %c0_i32_1 = arith.constant 0 : i32
    return %arg0, %c0_i32, %c0_i32_0 : i32, i32, i32
  }
  func.func @transform_3(%arg0: i32) -> (i32, i32) {
    %c0_i32 = arith.constant 0 : i32
    %c0_i32_0 = arith.constant 0 : i32
    %c0_i32_1 = arith.constant 0 : i32
    return %c0_i32, %c0_i32_0 : i32, i32
  }
  func.func @transform_4(%arg0: i32) -> (i32, i32) {
    %c0_i32 = arith.constant 0 : i32
    %c0_i32_0 = arith.constant 0 : i32
    %c0_i32_1 = arith.constant 0 : i32
    return %c0_i32, %c0_i32_0 : i32, i32
  }
  func.func @transform_5(%arg0: i32) -> (i32, i32) {
    %c0_i32 = arith.constant 0 : i32
    %c0_i32_0 = arith.constant 0 : i32
    %c0_i32_1 = arith.constant 0 : i32
    return %c0_i32, %c0_i32_0 : i32, i32
  }
  func.func @transform_6(%arg0: i32) -> (i32, i32) {
    %c0_i32 = arith.constant 0 : i32
    %c0_i32_0 = arith.constant 0 : i32
    %c0_i32_1 = arith.constant 0 : i32
    return %c0_i32, %c0_i32_0 : i32, i32
  }
  func.func @transform_7(%arg0: i32) -> (i32, i32) {
    %c0_i32 = arith.constant 0 : i32
    %c0_i32_0 = arith.constant 0 : i32
    %c0_i32_1 = arith.constant 0 : i32
    return %c0_i32, %c0_i32_0 : i32, i32
  }
  func.func @transform_8(%arg0: i32) -> (i32, i32) {
    %c0_i32 = arith.constant 0 : i32
    %c0_i32_0 = arith.constant 0 : i32
    %c0_i32_1 = arith.constant 0 : i32
    return %c0_i32, %c0_i32_0 : i32, i32
  }
  func.func @transform_9(%arg0: i32) -> (i32, i32) {
    %c0_i32 = arith.constant 0 : i32
    %c0_i32_0 = arith.constant 0 : i32
    %c0_i32_1 = arith.constant 0 : i32
    return %c0_i32, %c0_i32_0 : i32, i32
  }
  func.func @transform_10(%arg0: i32) -> (i32, i32) {
    %c0_i32 = arith.constant 0 : i32
    %c0_i32_0 = arith.constant 0 : i32
    %c0_i32_1 = arith.constant 0 : i32
    return %c0_i32, %c0_i32_0 : i32, i32
  }
  func.func @transform_11(%arg0: i32) -> (i32, i32) {
    %c0_i32 = arith.constant 0 : i32
    %c0_i32_0 = arith.constant 0 : i32
    %c0_i32_1 = arith.constant 0 : i32
    return %c0_i32, %c0_i32_0 : i32, i32
  }
  func.func @transform_12(%arg0: i32) -> (i32, i32) {
    %c0_i32 = arith.constant 0 : i32
    %c0_i32_0 = arith.constant 0 : i32
    %c0_i32_1 = arith.constant 0 : i32
    return %c0_i32, %c0_i32_0 : i32, i32
  }
  func.func @transform_13(%arg0: i32) -> (i32, i32) {
    %c0_i32 = arith.constant 0 : i32
    %c0_i32_0 = arith.constant 0 : i32
    %c0_i32_1 = arith.constant 0 : i32
    return %c0_i32, %c0_i32_0 : i32, i32
  }
  func.func @transform_14(%arg0: i32) -> (i32, i32) {
    %c0_i32 = arith.constant 0 : i32
    %c0_i32_0 = arith.constant 0 : i32
    %c0_i32_1 = arith.constant 0 : i32
    return %c0_i32, %c0_i32_0 : i32, i32
  }
  func.func @transform_15(%arg0: i32) -> (i32, i32) {
    %c0_i32 = arith.constant 0 : i32
    %c0_i32_0 = arith.constant 0 : i32
    %c0_i32_1 = arith.constant 0 : i32
    return %c0_i32, %c0_i32_0 : i32, i32
  }
  func.func @transform_16(%arg0: i32) -> (i32, i32) {
    %c0_i32 = arith.constant 0 : i32
    %c0_i32_0 = arith.constant 0 : i32
    %c0_i32_1 = arith.constant 0 : i32
    return %c0_i32, %c0_i32_0 : i32, i32
  }
  func.func @transform_17(%arg0: i32) -> (i32, i32) {
    %c0_i32 = arith.constant 0 : i32
    %c0_i32_0 = arith.constant 0 : i32
    %c0_i32_1 = arith.constant 0 : i32
    return %c0_i32, %c0_i32_0 : i32, i32
  }
  func.func @transform_18(%arg0: i32) -> (i32, i32) {
    %c0_i32 = arith.constant 0 : i32
    %c0_i32_0 = arith.constant 0 : i32
    %c0_i32_1 = arith.constant 0 : i32
    return %c0_i32, %c0_i32_0 : i32, i32
  }
  func.func @transform_19(%arg0: i32) -> (i32, i32, i32) {
    %c0_i32 = arith.constant 0 : i32
    %c0_i32_0 = arith.constant 0 : i32
    %c0_i32_1 = arith.constant 0 : i32
    return %arg0, %c0_i32, %c0_i32_0 : i32, i32, i32
  }
  func.func @transform_20(%arg0: i32) -> (i32, i32, i32) {
    %c0_i32 = arith.constant 0 : i32
    %c0_i32_0 = arith.constant 0 : i32
    %c0_i32_1 = arith.constant 0 : i32
    return %arg0, %c0_i32, %c0_i32_0 : i32, i32, i32
  }
}

</mosaic_0001>

<bundles_post_ra>
// kernel: upblock2d_forward.1
= control target key start
LH: loop header
LB: loop body
LE: loop exit
PB: predicated region body
PF: predicated region fallthrough
CT: control target
= control target key end

     0   :  { %s4281_s0 = inlined_call_operand.vmem [shape: f32[2,8,256], index: 0, kind: input, shape index: {}]   ;;  %s4282_s1 = inlined_call_operand.vmem [shape: f32[2,8,256], index: 1, kind: input, shape index: {}]   ;;  %s4283_s2 = inlined_call_operand.vmem [shape: f32[2,16,1], index: 2, kind: input, shape index: {}]   ;;  %s4284_s3 = inlined_call_operand.vmem [shape: f32[16,1], index: 3, kind: input, shape index: {}]   ;;  %s4285_s4 = inlined_call_operand.vmem [shape: f32[16,1], index: 4, kind: input, shape index: {}]   ;;  %s4286_s5 = inlined_call_operand.vmem [shape: f32[16,16], index: 5, kind: input, shape index: {}]   ;;  %s4287_s6 = inlined_call_operand.vmem [shape: f32[8,160], index: 6, kind: input, shape index: {}]   ;;  %s4288_s7 = inlined_call_operand.vmem [shape: f32[8,1], index: 7, kind: input, shape index: {}]   ;;  %s4289_s8 = inlined_call_operand.vmem [shape: f32[8,1], index: 8, kind: input, shape index: {}]   ;;  %s4290_s9 = inlined_call_operand.vmem [shape: f32[8,1], index: 9, kind: input, shape index: {}]   ;;  %s4291_s10 = inlined_call_operand.vmem [shape: f32[8,8], index: 10, kind: input, shape index: {}]   ;;  %s4292_s11 = inlined_call_operand.vmem [shape: f32[8,72], index: 11, kind: input, shape index: {}]   ;;  %s4293_s12 = inlined_call_operand.vmem [shape: f32[8,16], index: 12, kind: input, shape index: {}]   ;;  %s4294_s13 = inlined_call_operand.vmem [shape: f32[8,1], index: 13, kind: input, shape index: {}]   ;;  %s4295_s14 = inlined_call_operand.hbm [shape: f32[256,1024], index: 14, kind: input, shape index: {}]   ;;  %s4296_s15 = inlined_call_operand.vmem [shape: f32[8,72], index: 15, kind: input, shape index: {}]   ;;  %s4297_s16 = inlined_call_operand.vmem [shape: f32[8,1], index: 16, kind: input, shape index: {}]   ;;  %s4298_s17 = inlined_call_operand.vmem [shape: f32[9,256], index: 17, kind: input, shape index: {}]   ;;  %s4299_s18 = inlined_call_operand.vmem [shape: f32[9,1024], index: 18, kind: input, shape index: {}]   ;;  %s4300_s19 = inlined_call_operand.vmem [shape: f32[2,8,256], index: 19, kind: output, shape index: {0}]   ;;  %s4301_s20 = inlined_call_operand.vmem [shape: f32[2,8,1024], index: 20, kind: output, shape index: {1}]  }
   0x1   :  { %4315 = sst [smem:[#allocation5_spill]] %s4281_s0 }
   0x2   :  { %4316 = sst [smem:[#allocation6_spill]] %s4282_s1 }
   0x3   :  { %4317 = sst [smem:[#allocation7_spill]] %s4283_s2 }
   0x4   :  { %4318 = sst [smem:[#allocation8_spill]] %s4284_s3 }
   0x5   :  { %4319 = sst [smem:[#allocation9_spill]] %s4285_s4 }
   0x6   :  { %26 = vsyncpa [#allocation3], 0  ;;  %s3287_s1 = smov 0  }
   0x7 LB: > { %s547_s24 = sshll.u32 %s4295_s14, 4  ;;  %s2972_s2 = sadd.s32 4294967295, %s3162_s1   ;;  %s3162_s1 = sphi %s3287_s1, %s32_s1   ;;  %s548_s24 = int_to_ptr.hbm [resolvable:$true] %s547_s24 }
   0x8   : > { %p2974_p0 = scmp.ge.s32.totalorder %s3162_s1, 1  ;;  %p503_p1 = scmp.lt.s32.totalorder %s3162_s1, 3 }
   0x9   : > { %p3038_p2 = scmp.eq.s32.totalorder %s2972_s2, 0  ;;  %s3164_s25 = smov [#allocation2]  }
   0xa   : > { %p504_p3 = pnand %p2974_p0, %p503_p1  ;;  %s549_s3 = sshll.u32 %s3164_s25, 4  ;;  %s550_s3 = int_to_ptr.vmem [resolvable:$true] %s549_s3 }
   0xb   : > { %s3165_s26 = smov 1024   ;;  %s3166_s27 = smov 64  }
   0xc   : > { %p3034_p4 = pneg %p504_p3  ;;  %601 = sbr.rel (%p504_p3) target bundleno = 2364 (0x93c), region = 96 }
   0xe   : > { %p3035_p5 = pnand %p3038_p2, %p3034_p4 }
  0x10   : > { %3037 = dma.hbm_to_vmem [thread:$0]  (!%p3035_p5), %s548_s24, 32768, %s550_s3, [#allocation3], %s3165_s26, %s3165_s26, %s3166_s27  }
  0x11   : > { %3157 = dma.done.wait (%p3038_p2), [#allocation3], 32768  }
  0x12   : > { %3159 = vsyncadd (%p3038_p2), [#allocation3], 4294934528  ;;  %p675_p6 = scmp.lt.s32.totalorder %s2972_s2, 1  ;;  %s4320_s30 = sld [smem:[#allocation6_spill]]  ;;  %v728_v4 = vld [vmem:[%s4286_s5] sm:$0xff]  ;;  %vm730_vm0 = vcmask 130048  }
  0x13   : > { %s4321_s23 = sld [smem:[#allocation5_spill]]  ;;  %v729_v5 = vld [vmem:[%s4286_s5 + $0x8] sm:$0xff]  ;;  %v3167_v25 = vmov 0   ;;  %s4308_s21 = smov 112  }
  0x14   : > { %s4339_s2 = smov (!%p675_p6, %s2972_s2), 1  ;;  %3066 = vset.pattern.permute.xlu2 %v3167_v25  ;;  %3068 = vset.pattern.permute.xlu1 %v3167_v25  ;;  %s4323_s22 = sld [smem:[#allocation7_spill]] }
  0x15   : > { %s3301_s28 = sshll.u32 %s4339_s2, 4  ;;  %3067 = vset.pattern.permute.xlu0 %v3167_v25  ;;  %s4324_s3 = sld [smem:[#allocation9_spill]] }
  0x16   : > { %s4304_s24 = smov 17   ;;  %s3174_s26 = smov 16  }
  0x17   : > { %s3175_s27 = smov 111   ;;  %s4328_s29 = smov 127  }
  0x18   : > { %s684_s0 = scalar_lea.vmem %s4320_s30, %s3301_s28  ;;  %s4322_s30 = sld [smem:[#allocation8_spill]] }
  0x19   : > { %s679_s25 = scalar_lea.vmem %s4321_s23, %s3301_s28  ;;  %v3311_v0 = vld [vmem:[%s684_s0] sm:$0xff]  ;;  %v3313_v1 = vld [vmem:[%s684_s0 + $0x8] sm:$0xff]  ;;  %s3168_s0 = smov 113  }
  0x1a   : > { %v3315_v2 = vld [vmem:[%s679_s25] sm:$0xff]  ;;  %751 = vmatpush.msra.mxu0 %v3311_v0  ;;  %774 = vmatpush.msra.mxu1 %v3313_v1  ;;  %v3319_v3 = vld [vmem:[%s679_s25 + $0x8] sm:$0xff]  ;;  %s689_s23 = scalar_lea.vmem %s4323_s22, %s3301_s28  ;;  %s4310_s22 = smov 1  }
  0x1b   : > { %v987_v26 = vld [vmem:[%s689_s23] sm:$0xff]  ;;  %v988_v27 = vld [vmem:[%s689_s23 + $0x8] sm:$0xff]  ;;  %s4306_s23 = smov 127   ;;  %s3172_s25 = smov 15  }
  0x1c   : > { %752 = vmatpush.msra.mxu0 %v3315_v2  ;;  %775 = vmatpush.msra.mxu1 %v3319_v3  ;;  %v3001_v28 = vmul.f32 -1.442695, %v987_v26  ;;  %v3002_v29 = vmul.f32 -1.442695, %v988_v27  ;;  %v727_v41 = vld [vmem:[%s4324_s3 + $0x8] sm:$0xff]  ;;  %s3029_s4 = sshll.u32 %s4339_s2, 6 }
  0x1d   : > { %2989 = vmatmul.msk.f32.vlgmr.msra.gmra.mxu0 %vm730_vm0, %v728_v4  ;;  %2991 = vmatmul.msk.f32.vlgmr.msra.gmra.mxu1 %vm730_vm0, %v728_v4 }
  0x1e   : > { %v725_v24 = vld [vmem:[%s4322_s30 + $0x8] sm:$0xff]  ;;  %3084 = vpow2.f32 %v3001_v28  ;;  %v724_v42 = vld [vmem:[%s4322_s30] sm:$0xff] }
  0x1f   : > { %886 = vperm.xlu2 %3066, %v725_v24   ;;  %3086 = vpow2.f32 %v3002_v29 }
  0x24   : > { %v3085_v30 = vpop.eup %3084 }
  0x25   : > { %2990 = vmatmul.msk.f32.gmra.mxu0 %vm730_vm0, %v729_v5  ;;  %2992 = vmatmul.msk.f32.gmra.mxu1 %vm730_vm0, %v729_v5  ;;  %v3087_v31 = vpop.eup %3086  ;;  %v995_v32 = vadd.f32 1.0, %v3085_v30 }
  0x26   : > { %v996_v33 = vadd.f32 1.0, %v3087_v31 }
  0x27   : > { %3088 = vrcp.f32 %v995_v32  ;;  %vm1002_vm1 = vweird.f32 %v995_v32  ;;  %v1006_v44 = vand.u32 2147483647, %v995_v32  ;;  %881 = vperm.xlu2 %3066, %v724_v42   ;;  %v1008_v45 = vand.u32 2147483648, %v995_v32 }
  0x28   : > { %3090 = vrcp.f32 %v996_v33  ;;  %vm1017_vm3 = vweird.f32 %v996_v33  ;;  %v1021_v48 = vand.u32 2147483647, %v996_v33  ;;  %v1023_v49 = vand.u32 2147483648, %v996_v33 }
  0x29   : > { %v1009_v50 = vor.u32 1.1754944e-38, %v1008_v45  ;;  %vm1007_vm6 = vcmp.eq.f32.partialorder %v1006_v44, 8.507059e+37 }
  0x2a   : > { %v1024_v55 = vor.u32 1.1754944e-38, %v1023_v49  ;;  %vm1022_vm8 = vcmp.eq.f32.partialorder %v1021_v48, 8.507059e+37 }
  0x2d   : > { %v3089_v36 = vpop.eup %3088 }
  0x2e   : > { %v3091_v38 = vpop.eup %3090  ;;  %v998_v39 = vmul.f32 %v3089_v36, %v995_v32  ;;  %vm1003_vm2 = vweird.f32 %v3089_v36 }
  0x2f   : > { %v1013_v40 = vmul.f32 %v3091_v38, %v996_v33  ;;  %vm1018_vm4 = vweird.f32 %v3091_v38  ;;  %vm1004_vm5 = vmor %vm1002_vm1, %vm1003_vm2 }
  0x30   : > { %v999_v43 = vsub.f32 1.0, %v998_v39  ;;  %vm1019_vm7 = vmor %vm1017_vm3, %vm1018_vm4 }
  0x31   : > { %v1014_v46 = vsub.f32 1.0, %v1013_v40 }
  0x32   : > { %v1000_v47 = vmul.f32 %v3089_v36, %v999_v43 }
  0x33   : > { %v1015_v51 = vmul.f32 %v3091_v38, %v1014_v46 }
  0x34   : > { %v1001_v54 = vadd.f32 %v3089_v36, %v1000_v47 }
  0x35   : > { %v1016_v57 = vadd.f32 %v3091_v38, %v1015_v51 }
  0x36   : > { %v1005_v58 = vsel %vm1004_vm5, %v3089_v36, %v1001_v54 }
  0x37   : > { %v1010_v59 = vsel %vm1007_vm6, %v1009_v50, %v1005_v58  ;;  %v1020_v60 = vsel %vm1019_vm7, %v3091_v38, %v1016_v57 }
  0x38   : > { %v1025_v61 = vsel %vm1022_vm8, %v1024_v55, %v1020_v60  ;;  %v1027_v62 = vmul.f32 %v1010_v59, %v987_v26 }
  0x39   : > { %v1028_v63 = vmul.f32 %v1025_v61, %v988_v27 }
  0x9a   : > { %v754_v6 = vpop.f32.mrf.mxu0  ;;  %v777_v7 = vpop.f32.mrf.mxu1 }
  0x9b   : > { %v783_v11 = vadd.f32 %v777_v7, %v754_v6  ;;  %v887_v6 = vpop.permute.xlu2 %886 }
  0xa2   : > { %v757_v8 = vpop.f32.mrf.mxu0  ;;  %v780_v9 = vpop.f32.mrf.mxu1 }
  0xa3   : > { %v786_v10 = vadd.f32 %v780_v9, %v757_v8  ;;  %v882_v7 = vpop.permute.xlu2 %881 }
  0xa5   : > { %787 = vadd.xlane.f32.xlu0 %v786_v10 }
  0xad   : > { %784 = vadd.xlane.f32.xlu0 %v783_v11 }
  0xc1   : > { %900 = vperm.xlu0 %3067, %v727_v41  }
 0x118   : > { %v788_v12 = vpop.xlane.xlu0 %787 }
 0x119   : > { %v790_v13 = vmul.f32 0.0009765625, %v788_v12 }
 0x11b   : > { %v3334_v14 = vsub.f32 %v3311_v0, %v790_v13  ;;  %v3337_v15 = vsub.f32 %v3313_v1, %v790_v13 }
 0x11d   : > { %v797_v16 = vmul.f32 %v3334_v14, %v3334_v14  ;;  %v798_v17 = vmul.f32 %v3337_v15, %v3337_v15 }
 0x11f   : > { %813 = vmatpush.msra.mxu2 %v797_v16  ;;  %836 = vmatpush.msra.mxu3 %v798_v17 }
 0x120   : > { %v785_v18 = vpop.xlane.xlu0 %784 }
 0x121   : > { %v789_v19 = vmul.f32 0.0009765625, %v785_v18 }
 0x123   : > { %v3344_v20 = vsub.f32 %v3315_v2, %v789_v19  ;;  %v3347_v21 = vsub.f32 %v3319_v3, %v789_v19 }
 0x125   : > { %v795_v22 = vmul.f32 %v3344_v20, %v3344_v20  ;;  %v796_v23 = vmul.f32 %v3347_v21, %v3347_v21 }
 0x127   : > { %814 = vmatpush.msra.mxu2 %v795_v22  ;;  %837 = vmatpush.msra.mxu3 %v796_v23 }
 0x128   : > { %2993 = vmatmul.msk.f32.vlgmr.msra.gmra.mxu2 %vm730_vm0, %v728_v4  ;;  %2995 = vmatmul.msk.f32.vlgmr.msra.gmra.mxu3 %vm730_vm0, %v728_v4  ;;  %v3069_v4 = vpack.i.bf16 %v1027_v62, %v1028_v63 }
 0x12a   : > { %3070 = vperm.xlu2 %3066, %v3069_v4  }
 0x130   : > { %2994 = vmatmul.msk.f32.gmra.mxu2 %vm730_vm0, %v729_v5  ;;  %2996 = vmatmul.msk.f32.gmra.mxu3 %vm730_vm0, %v729_v5  ;;  %v726_v5 = vld [vmem:[%s4324_s3] sm:$0xff] }
 0x184   : > { %v3071_v8 = vpop.permute.xlu2 %3070 }
 0x185   : > { %v3072_v9 = vunpack.i.l.bf16 %v3071_v8  ;;  %v3073_v10 = vunpack.i.h.bf16 %v3071_v8 }
 0x187   : > { %1286 = vmatpush.msrb.mxu1 %v3072_v9  ;;  %1326 = vmatpush.msrb.mxu3 %v3072_v9 }
 0x189   : > { %1287 = vmatpush.msrb.mxu1 %v3073_v10  ;;  %1327 = vmatpush.msrb.mxu3 %v3073_v10 }
 0x1ab   : > { %v816_v34 = vpop.f32.mrf.mxu2  ;;  %v839_v35 = vpop.f32.mrf.mxu3 }
 0x1ac   : > { %v845_v37 = vadd.f32 %v839_v35, %v816_v34 }
 0x1ae   : > { %846 = vadd.xlane.f32.xlu1 %v845_v37 }
 0x1b3   : > { %v819_v52 = vpop.f32.mrf.mxu2  ;;  %v842_v53 = vpop.f32.mrf.mxu3 }
 0x1b4   : > { %v848_v56 = vadd.f32 %v842_v53, %v819_v52 }
 0x1b6   : > { %849 = vadd.xlane.f32.xlu1 %v848_v56 }
 0x1cf   : > { %895 = vperm.xlu1 %3068, %v726_v5  }
 0x221   : > { %v847_v11 = vpop.xlane.xlu1 %846 }
 0x222   : > { %v851_v12 = vmul.f32 0.0009765625, %v847_v11 }
 0x224   : > { %v853_v13 = vadd.f32 1e-06, %v851_v12 }
 0x226   : > { %3092 = vrsqrt.f32 %v853_v13  ;;  %vm861_vm10 = vweird.f32 %v853_v13 }
 0x229   : > { %v850_v16 = vpop.xlane.xlu1 %849 }
 0x22a   : > { %v852_v17 = vmul.f32 0.0009765625, %v850_v16 }
 0x22c   : > { %v3093_v18 = vpop.eup %3092  ;;  %v854_v19 = vadd.f32 1e-06, %v852_v17 }
 0x22d   : > { %v856_v22 = vmul.f32 %v3093_v18, %v853_v13  ;;  %vm862_vm9 = vweird.f32 %v3093_v18 }
 0x22e   : > { %3094 = vrsqrt.f32 %v854_v19  ;;  %vm863_vm11 = vmor %vm861_vm10, %vm862_vm9  ;;  %vm871_vm13 = vweird.f32 %v854_v19 }
 0x22f   : > { %v857_v23 = vmul.f32 %v3093_v18, %v856_v22 }
 0x231   : > { %v858_v24 = vmul.f32 0.5, %v857_v23 }
 0x233   : > { %v859_v25 = vsub.f32 1.5, %v858_v24 }
 0x234   : > { %v3095_v26 = vpop.eup %3094 }
 0x235   : > { %v866_v27 = vmul.f32 %v3095_v26, %v854_v19  ;;  %v860_v28 = vmul.f32 %v3093_v18, %v859_v25  ;;  %vm872_vm12 = vweird.f32 %v3095_v26 }
 0x236   : > { %vm873_vm14 = vmor %vm871_vm13, %vm872_vm12 }
 0x237   : > { %v867_v29 = vmul.f32 %v3095_v26, %v866_v27  ;;  %v864_v31 = vsel %vm863_vm11, %v3093_v18, %v860_v28 }
 0x238   : > { %v875_v33 = vmul.f32 %v864_v31, %v3344_v20  ;;  %v876_v34 = vmul.f32 %v864_v31, %v3347_v21  ;;  %v901_v20 = vpop.permute.xlu0 %900 }
 0x239   : > { %v868_v30 = vmul.f32 0.5, %v867_v29 }
 0x23a   : > { %v889_v36 = vmul.f32 %v882_v7, %v875_v33  ;;  %v890_v37 = vmul.f32 %v882_v7, %v876_v34 }
 0x23b   : > { %v869_v32 = vsub.f32 1.5, %v868_v30 }
 0x23d   : > { %v870_v35 = vmul.f32 %v3095_v26, %v869_v32 }
 0x23f   : > { %v874_v39 = vsel %vm873_vm14, %v3095_v26, %v870_v35 }
 0x240   : > { %v877_v44 = vmul.f32 %v874_v39, %v3334_v14  ;;  %v878_v21 = vmul.f32 %v874_v39, %v3337_v15 }
 0x241   : > { %v896_v38 = vpop.permute.xlu1 %895 }
 0x242   : > { %v903_v40 = vadd.f32 %v896_v38, %v889_v36  ;;  %v904_v41 = vadd.f32 %v896_v38, %v890_v37  ;;  %v891_v45 = vmul.f32 %v887_v6, %v877_v44  ;;  %v892_v51 = vmul.f32 %v887_v6, %v878_v21  ;;  %v1335_v21 = vld [vmem:[%s4290_s9] sm:$0xff] }
 0x244   : > { %v2997_v42 = vmul.f32 -1.442695, %v903_v40  ;;  %v2998_v43 = vmul.f32 -1.442695, %v904_v41  ;;  %v3377_v47 = vadd.f32 %v901_v20, %v891_v45  ;;  %v3380_v53 = vadd.f32 %v901_v20, %v892_v51  ;;  %v1244_v45 = vld [vmem:[%s4288_s7] sm:$0xff] }
 0x245   : > { %v1334_v20 = vld [vmem:[%s4289_s8] sm:$0xff] }
 0x246   : > { %3096 = vpow2.f32 %v2997_v42  ;;  %v2999_v52 = vmul.f32 -1.442695, %v3377_v47  ;;  %v3000_v15 = vmul.f32 -1.442695, %v3380_v53 }
 0x247   : > { %3098 = vpow2.f32 %v2998_v43 }
 0x24c   : > { %v3097_v46 = vpop.eup %3096 }
 0x24d   : > { %v3099_v48 = vpop.eup %3098  ;;  %v919_v49 = vadd.f32 1.0, %v3097_v46 }
 0x24e   : > { %v920_v50 = vadd.f32 1.0, %v3099_v48 }
 0x24f   : > { %3100 = vrcp.f32 %v919_v49  ;;  %v934_v58 = vand.u32 2147483648, %v919_v49  ;;  %v932_v62 = vand.u32 2147483647, %v919_v49  ;;  %vm928_vm2 = vweird.f32 %v919_v49 }
 0x250   : > { %3102 = vrcp.f32 %v920_v50  ;;  %v949_v63 = vand.u32 2147483648, %v920_v50  ;;  %v947_v5 = vand.u32 2147483647, %v920_v50  ;;  %vm943_vm4 = vweird.f32 %v920_v50 }
 0x251   : > { %3104 = vpow2.f32 %v2999_v52  ;;  %v935_v7 = vor.u32 1.1754944e-38, %v934_v58  ;;  %vm933_vm5 = vcmp.eq.f32.partialorder %v932_v62, 8.507059e+37 }
 0x252   : > { %3106 = vpow2.f32 %v3000_v15  ;;  %v950_v11 = vor.u32 1.1754944e-38, %v949_v63  ;;  %vm948_vm7 = vcmp.eq.f32.partialorder %v947_v5, 8.507059e+37  ;;  %v3484_v15 = vld [vmem:[%s4298_s17 + $0x8] sm:$0xff] }
 0x255   : > { %v3101_v14 = vpop.eup %3100 }
 0x256   : > { %v3103_v54 = vpop.eup %3102  ;;  %v924_v55 = vmul.f32 %v3101_v14, %v919_v49  ;;  %vm929_vm15 = vweird.f32 %v3101_v14 }
 0x257   : > { %v939_v56 = vmul.f32 %v3103_v54, %v920_v50  ;;  %v3105_v60 = vpop.eup %3104  ;;  %vm944_vm1 = vweird.f32 %v3103_v54  ;;  %vm930_vm3 = vmor %vm928_vm2, %vm929_vm15  ;;  %vm1175_vm2 = vcmask 924672  }
 0x258   : > { %v925_v57 = vsub.f32 1.0, %v924_v55  ;;  %v921_v9 = vadd.f32 1.0, %v3105_v60  ;;  %vm945_vm6 = vmor %vm943_vm4, %vm944_vm1  ;;  %v3107_v19 = vpop.eup %3106  ;;  %vm1200_vm1 = vcmask 916480   ;;  %vm1127_vm4 = vcmask 7168  }
 0x259   : > { %v940_v59 = vsub.f32 1.0, %v939_v56  ;;  %v922_v22 = vadd.f32 1.0, %v3107_v19 }
 0x25a   : > { %v926_v61 = vmul.f32 %v3101_v14, %v925_v57  ;;  %3108 = vrcp.f32 %v921_v9  ;;  %v964_v31 = vand.u32 2147483648, %v921_v9  ;;  %vm958_vm9 = vweird.f32 %v921_v9  ;;  %v3479_v57 = vld [vmem:[%s4298_s17] sm:$0xff] }
 0x25b   : > { %v941_v4 = vmul.f32 %v3103_v54, %v940_v59  ;;  %3110 = vrcp.f32 %v922_v22  ;;  %v962_v32 = vand.u32 2147483647, %v921_v9  ;;  %v979_v38 = vand.u32 2147483648, %v922_v22 }
 0x25c   : > { %v927_v6 = vadd.f32 %v3101_v14, %v926_v61  ;;  %v965_v35 = vor.u32 1.1754944e-38, %v964_v31  ;;  %vm973_vm13 = vweird.f32 %v922_v22  ;;  %v977_v39 = vand.u32 2147483647, %v922_v22 }
 0x25d   : > { %v942_v8 = vadd.f32 %v3103_v54, %v941_v4  ;;  %vm963_vm11 = vcmp.eq.f32.partialorder %v962_v32, 8.507059e+37  ;;  %v980_v42 = vor.u32 1.1754944e-38, %v979_v38  ;;  %v3489_v60 = vperm.slane %v3479_v57, 7 }
 0x25e   : > { %v931_v10 = vsel %vm930_vm3, %v3101_v14, %v927_v6  ;;  %vm978_vm15 = vcmp.eq.f32.partialorder %v977_v39, 8.507059e+37  ;;  %v3492_v61 = vperm.slane %v3484_v15, 7  ;;  %vm1150_vm3 = vcmask 1039360  }
 0x25f   : > { %v936_v12 = vsel %vm933_vm5, %v935_v7, %v931_v10  ;;  %v946_v13 = vsel %vm945_vm6, %v3103_v54, %v942_v8  ;;  %v3521_v32 = vperm.slane %v3479_v57, 5  ;;  %vm1102_vm5 = vcmask 121856  }
 0x260   : > { %v951_v16 = vsel %vm948_vm7, %v950_v11, %v946_v13  ;;  %v3383_v17 = vmul.f32 %v936_v12, %v903_v40  ;;  %v3109_v23 = vpop.eup %3108  ;;  %v3505_v13 = vperm.slane %v3479_v57, 6  ;;  %vm1053_vm6 = vcmask 138240  }
 0x261   : > { %v3385_v18 = vmul.f32 %v951_v16, %v904_v41  ;;  %v954_v24 = vmul.f32 %v3109_v23, %v921_v9  ;;  %v3111_v26 = vpop.eup %3110  ;;  %vm959_vm8 = vweird.f32 %v3109_v23  ;;  %v3508_v16 = vperm.slane %v3484_v15, 6 }
 0x262   : > { %1167 = vrot.lane.b32.xlu1 %v3383_v17, %s3168_s0  ;;  %1192 = vrot.lane.b32.xlu2 %v3383_v17, %s4308_s21  ;;  %v969_v28 = vmul.f32 %v3111_v26, %v922_v22  ;;  %vm960_vm10 = vmor %vm958_vm9, %vm959_vm8  ;;  %vm974_vm12 = vweird.f32 %v3111_v26  ;;  %vm1225_vm7 = vcmask 908288   ;;  %vm4312_vm8 = vcmask 261120  }
 0x263   : > { %1169 = vrot.lane.b32.xlu0 %v3385_v18, %s3168_s0  ;;  %v955_v25 = vsub.f32 1.0, %v954_v24  ;;  %vm975_vm14 = vmor %vm973_vm13, %vm974_vm12  ;;  %vm1337_vm9 = vcmask 64512  }
 0x264   : > { %v970_v30 = vsub.f32 1.0, %v969_v28 }
 0x265   : > { %v956_v27 = vmul.f32 %v3109_v23, %v955_v25 }
 0x266   : > { %v971_v34 = vmul.f32 %v3111_v26, %v970_v30 }
 0x267   : > { %v957_v29 = vadd.f32 %v3109_v23, %v956_v27 }
 0x268   : > { %v972_v37 = vadd.f32 %v3111_v26, %v971_v34 }
 0x269   : > { %v961_v33 = vsel %vm960_vm10, %v3109_v23, %v957_v29 }
 0x26a   : > { %1123 = vrot.lane.b32.xlu1 %v3383_v17, %s4310_s22  ;;  %1194 = vrot.lane.b32.xlu2 %v3385_v18, %s4308_s21  ;;  %v966_v36 = vsel %vm963_vm11, %v965_v35, %v961_v33  ;;  %v976_v41 = vsel %vm975_vm14, %v3111_v26, %v972_v37  ;;  %v3524_v33 = vperm.slane %v3484_v15, 5 }
 0x26b   : > { %1142 = vrot.lane.b32.xlu0 %v3383_v17, %s4306_s23  ;;  %v3412_v40 = vmul.f32 %v966_v36, %v3377_v47  ;;  %v981_v43 = vsel %vm978_vm15, %v980_v42, %v976_v41 }
 0x26c   : > { %v3421_v44 = vmul.f32 %v981_v43, %v3380_v53 }
 0x272   : > { %1092 = vrot.lane.b32.xlu1 %v3385_v18, %s3172_s25  ;;  %1144 = vrot.lane.b32.xlu2 %v3385_v18, %s4306_s23 }
 0x273   : > { %1098 = vrot.lane.b32.xlu0 %v3383_v17, %s3172_s25 }
 0x27a   : > { %1041 = vrot.lane.b32.xlu1 %v3385_v18, %s4304_s24  ;;  %1117 = vrot.lane.b32.xlu2 %v3385_v18, %s4310_s22 }
 0x27b   : > { %1068 = vrot.lane.b32.xlu0 %v3385_v18, %s3174_s26 }
 0x282   : > { %1074 = vrot.lane.b32.xlu2 %v3383_v17, %s3174_s26  ;;  %1171 = vrot.lane.b32.xlu1 %v3412_v40, %s3168_s0 }
 0x283   : > { %1049 = vrot.lane.b32.xlu0 %v3383_v17, %s4304_s24 }
 0x28a   : > { %1148 = vrot.lane.b32.xlu1 %v3421_v44, %s4306_s23  ;;  %1196 = vrot.lane.b32.xlu2 %v3412_v40, %s4308_s21 }
 0x28b   : > { %1125 = vrot.lane.b32.xlu0 %v3412_v40, %s4310_s22 }
 0x292   : > { %1119 = vrot.lane.b32.xlu1 %v3421_v44, %s4310_s22  ;;  %1198 = vrot.lane.b32.xlu2 %v3421_v44, %s4308_s21  ;;  %s3180_s21 = smov 32   ;;  %s3181_s22 = smov 33  }
 0x293   : > { %1094 = vrot.lane.b32.xlu0 %v3421_v44, %s3172_s25 }
 0x29a   : > { %1076 = vrot.lane.b32.xlu1 %v3412_v40, %s3174_s26  ;;  %1173 = vrot.lane.b32.xlu2 %v3421_v44, %s3168_s0 }
 0x29b   : > { %1051 = vrot.lane.b32.xlu0 %v3412_v40, %s4304_s24 }
 0x2a2   : > { %1043 = vrot.lane.b32.xlu1 %v3421_v44, %s4304_s24  ;;  %1146 = vrot.lane.b32.xlu2 %v3412_v40, %s4306_s23  ;;  %s4325_s23 = smov 1   ;;  %s4326_s24 = smov 112  }
 0x2a3   : > { %1217 = vrot.lane.b32.xlu0 %v3383_v17, %s3175_s27 }
 0x2aa   : > { %1223 = vrot.lane.b32.xlu1 %v3421_v44, %s3175_s27  ;;  %1100 = vrot.lane.b32.xlu2 %v3412_v40, %s3172_s25 }
 0x2b2   : > { %1247 = vperm.xlu1 %3068, %v1244_v45   ;;  %1070 = vrot.lane.b32.xlu2 %v3421_v44, %s3174_s26 }
 0x2ba   : > { %1448 = vperm.xlu1 %3068, %v1334_v20   ;;  %1221 = vrot.lane.b32.xlu2 %v3412_v40, %s3175_s27 }
 0x2bc   : > { %v1193_v46 = vpop.permute.xlu2 %1192 }
 0x2c2   : > { %1455 = vperm.xlu1 %3068, %v1335_v21   ;;  %1219 = vrot.lane.b32.xlu2 %v3385_v18, %s3175_s27 }
 0x2c4   : > { %v1195_v47 = vpop.permute.xlu2 %1194 }
 0x2c5   : > { %v1201_v62 = vsel %vm1200_vm1, %v1193_v46, %v1195_v47  ;;  %v1209_v63 = vsel %vm1200_vm1, %v1195_v47, %v1193_v46  ;;  %v3537_v46 = vperm.slane %v3479_v57, 3 }
 0x2c6   : > { %v1213_v9 = vmul.f32 %v3489_v60, %v1201_v62  ;;  %v1214_v10 = vmul.f32 %v3492_v61, %v1209_v63  ;;  %v3558_v63 = vperm.slane %v3479_v57, 2 }
 0x2cc   : > { %v1145_v48 = vpop.permute.xlu2 %1144 }
 0x2d4   : > { %v1168_v49 = vpop.permute.xlu1 %1167  ;;  %v3466_v50 = vpop.permute.xlu2 %1117 }
 0x2d5   : > { %v1170_v51 = vpop.permute.xlu0 %1169 }
 0x2d6   : > { %v1176_v19 = vsel %vm1175_vm2, %v1168_v49, %v1170_v51  ;;  %v1184_v22 = vsel %vm1175_vm2, %v1170_v51, %v1168_v49  ;;  %v3545_v51 = vperm.slane %v3484_v15, 3 }
 0x2d7   : > { %v1188_v28 = vmul.f32 %v3505_v13, %v1176_v19  ;;  %v1189_v29 = vmul.f32 %v3508_v16, %v1184_v22 }
 0x2dc   : > { %v3468_v52 = vpop.permute.xlu1 %1123  ;;  %v3470_v53 = vpop.permute.xlu2 %1074 }
 0x2dd   : > { %v1143_v14 = vpop.permute.xlu0 %1142  ;;  %v1134_v21 = vsel %vm1127_vm4, %v3466_v50, %v3468_v52 }
 0x2de   : > { %v1151_v34 = vsel %vm1150_vm3, %v1143_v14, %v1145_v48  ;;  %v1159_v35 = vsel %vm1150_vm3, %v1145_v48, %v1143_v14  ;;  %v1138_v62 = vmul.f32 %v3537_v46, %v1134_v21 }
 0x2df   : > { %v1163_v42 = vmul.f32 %v3521_v32, %v1151_v34  ;;  %v1164_v43 = vmul.f32 %v3524_v33, %v1159_v35 }
 0x2e4   : > { %v3472_v54 = vpop.permute.xlu1 %1092  ;;  %v1197_v55 = vpop.permute.xlu2 %1196 }
 0x2e5   : > { %v3474_v56 = vpop.permute.xlu0 %1098 }
 0x2ec   : > { %v3486_v58 = vpop.permute.xlu1 %1041  ;;  %v1199_v59 = vpop.permute.xlu2 %1198 }
 0x2ed   : > { %v1202_v4 = vsel %vm1200_vm1, %v1197_v55, %v1199_v59  ;;  %v1210_v5 = vsel %vm1200_vm1, %v1199_v59, %v1197_v55  ;;  %v3498_v6 = vpop.permute.xlu0 %1068 }
 0x2ee   : > { %v1215_v7 = vmul.f32 %v3489_v60, %v1202_v4  ;;  %v1216_v8 = vmul.f32 %v3492_v61, %v1210_v5  ;;  %v1078_v22 = vsel %vm730_vm0, %v3470_v53, %v3498_v6 }
 0x2f0   : > { %1254 = vmatpush.msrb.mxu0 %v1215_v7  ;;  %1294 = vmatpush.msrb.mxu2 %v1216_v8 }
 0x2f2   : > { %1255 = vmatpush.msrb.mxu0 %v1213_v9  ;;  %1295 = vmatpush.msrb.mxu2 %v1214_v10  ;;  %v3574_v10 = vperm.slane %v3479_v57, 1 }
 0x2f4   : > { %v1172_v11 = vpop.permute.xlu1 %1171  ;;  %v1174_v12 = vpop.permute.xlu2 %1173 }
 0x2f5   : > { %v1177_v23 = vsel %vm1175_vm2, %v1172_v11, %v1174_v12  ;;  %v1185_v24 = vsel %vm1175_vm2, %v1174_v12, %v1172_v11  ;;  %v3514_v25 = vpop.permute.xlu0 %1049  ;;  %v3577_v11 = vperm.slane %v3484_v15, 1 }
 0x2f6   : > { %v1190_v26 = vmul.f32 %v3505_v13, %v1177_v23  ;;  %v1191_v27 = vmul.f32 %v3508_v16, %v1185_v24  ;;  %v1060_v34 = vsel %vm1053_vm6, %v3486_v58, %v3514_v25 }
 0x2f8   : > { %1256 = vmatpush.msrb.mxu0 %v1190_v26  ;;  %1296 = vmatpush.msrb.mxu2 %v1191_v27 }
 0x2fa   : > { %1257 = vmatpush.msrb.mxu0 %v1188_v28  ;;  %1297 = vmatpush.msrb.mxu2 %v1189_v29  ;;  %v1089_v28 = vmul.f32 %v3577_v11, %v1078_v22 }
 0x2fc   : > { %v1149_v30 = vpop.permute.xlu1 %1148  ;;  %v1147_v31 = vpop.permute.xlu2 %1146 }
 0x2fd   : > { %v1152_v36 = vsel %vm1150_vm3, %v1147_v31, %v1149_v30  ;;  %v1160_v37 = vsel %vm1150_vm3, %v1149_v30, %v1147_v31  ;;  %v1126_v38 = vpop.permute.xlu0 %1125  ;;  %v1054_v31 = vsel %vm1053_vm6, %v3514_v25, %v3486_v58  ;;  %v3616_v58 = vld [vmem:[%s4298_s17 + $0x10] ss:$0 sm:$0xff]  ;;  %v3621_v25 = vld [vmem:[%s4298_s17 + $0x18] ss:$0 sm:$0xff] }
 0x2fe   : > { %v1165_v39 = vmul.f32 %v3521_v32, %v1152_v36  ;;  %v1166_v41 = vmul.f32 %v3524_v33, %v1160_v37 }
 0x300   : > { %1258 = vmatpush.msrb.mxu0 %v1165_v39  ;;  %1298 = vmatpush.msrb.mxu2 %v1166_v41  ;;  %v1242_v39 = vld [vmem:[%s4287_s6] sm:$0xff] }
 0x302   : > { %1259 = vmatpush.msrb.mxu0 %v1163_v42  ;;  %1299 = vmatpush.msrb.mxu2 %v1164_v43 }
 0x304   : > { %v1120_v45 = vpop.permute.xlu1 %1119  ;;  %v1101_v20 = vpop.permute.xlu2 %1100  ;;  %1260 = vmatpush.msrb.mxu0 %v3412_v40  ;;  %1300 = vmatpush.msrb.mxu2 %v3421_v44  ;;  %v1128_v40 = vsel %vm1127_vm4, %v3468_v52, %v3466_v50  ;;  %v3565_v50 = vperm.slane %v3484_v15, 2  ;;  %v1103_v52 = vsel %vm1102_vm5, %v3474_v56, %v3472_v54 }
 0x305   : > { %v1129_v47 = vsel %vm1127_vm4, %v1126_v38, %v1120_v45  ;;  %v1135_v48 = vsel %vm1127_vm4, %v1120_v45, %v1126_v38  ;;  %v1095_v49 = vpop.permute.xlu0 %1094 }
 0x306   : > { %1261 = vmatpush.msrb.mxu0 %v3383_v17  ;;  %1301 = vmatpush.msrb.mxu2 %v3385_v18  ;;  %v1140_v44 = vmul.f32 %v3537_v46, %v1135_v48  ;;  %v1110_v14 = vsel %vm1102_vm5, %v1095_v49, %v1101_v20  ;;  %v1141_v55 = vmul.f32 %v3545_v51, %v1129_v47 }
 0x307   : > { %v1104_v59 = vsel %vm1102_vm5, %v1101_v20, %v1095_v49  ;;  %v1109_v17 = vsel %vm1102_vm5, %v3472_v54, %v3474_v56  ;;  %v1139_v18 = vmul.f32 %v3545_v51, %v1128_v40  ;;  %v1115_v4 = vmul.f32 %v3558_v63, %v1110_v14 }
 0x308   : > { %1262 = vmatpush.msrb.mxu0 %v1140_v44  ;;  %1302 = vmatpush.msrb.mxu2 %v1141_v55  ;;  %v1116_v5 = vmul.f32 %v3565_v50, %v1104_v59  ;;  %v1113_v9 = vmul.f32 %v3558_v63, %v1109_v17  ;;  %v1084_v54 = vsel %vm730_vm0, %v3498_v6, %v3470_v53  ;;  %v3593_v53 = vperm.slane %v3479_v57, 0  ;;  %v1243_v44 = vld [vmem:[%s4287_s6 + $0x8] sm:$0xff] }
 0x309   : > { %v1114_v19 = vmul.f32 %v3565_v50, %v1103_v52  ;;  %v1088_v26 = vmul.f32 %v3574_v10, %v1084_v54  ;;  %v3596_v6 = vperm.slane %v3484_v15, 0 }
 0x30a   : > { %1263 = vmatpush.msrb.mxu0 %v1138_v62  ;;  %1303 = vmatpush.msrb.mxu2 %v1139_v18  ;;  %v1064_v15 = vmul.f32 %v3593_v53, %v1060_v34  ;;  %v1336_v18 = vld [vmem:[%s4291_s10] sm:$0xff] }
 0x30b   : > { %v1065_v38 = vmul.f32 %v3596_v6, %v1054_v31 }
 0x30c   : > { %v1077_v7 = vpop.permute.xlu1 %1076  ;;  %v1071_v8 = vpop.permute.xlu2 %1070  ;;  %1264 = vmatpush.msrb.mxu0 %v1115_v4  ;;  %1304 = vmatpush.msrb.mxu2 %v1116_v5 }
 0x30d   : > { %v1079_v56 = vsel %vm730_vm0, %v1077_v7, %v1071_v8  ;;  %v1085_v12 = vsel %vm730_vm0, %v1071_v8, %v1077_v7  ;;  %v1052_v27 = vpop.permute.xlu0 %1051 }
 0x30e   : > { %1265 = vmatpush.msrb.mxu0 %v1113_v9  ;;  %v1090_v23 = vmul.f32 %v3574_v10, %v1085_v12  ;;  %v1091_v24 = vmul.f32 %v3577_v11, %v1079_v56  ;;  %1305 = vmatpush.msrb.mxu2 %v1114_v19 }
 0x310   : > { %1266 = vmatpush.msrb.mxu0 %v1090_v23  ;;  %1306 = vmatpush.msrb.mxu2 %v1091_v24 }
 0x312   : > { %1267 = vmatpush.msrb.mxu0 %v1088_v26  ;;  %1307 = vmatpush.msrb.mxu2 %v1089_v28 }
 0x314   : > { %v1044_v29 = vpop.permute.xlu1 %1043  ;;  %v1222_v30 = vpop.permute.xlu2 %1221 }
 0x315   : > { %v1055_v35 = vsel %vm1053_vm6, %v1052_v27, %v1044_v29  ;;  %v1061_v36 = vsel %vm1053_vm6, %v1044_v29, %v1052_v27  ;;  %v1218_v41 = vpop.permute.xlu0 %1217 }
 0x316   : > { %v1066_v37 = vmul.f32 %v3593_v53, %v1061_v36  ;;  %v1067_v57 = vmul.f32 %v3596_v6, %v1055_v35 }
 0x318   : > { %1268 = vmatpush.msrb.mxu0 %v1066_v37  ;;  %1308 = vmatpush.msrb.mxu2 %v1067_v57 }
 0x31a   : > { %1269 = vmatpush.msrb.mxu0 %v1064_v15  ;;  %1309 = vmatpush.msrb.mxu2 %v1065_v38 }
 0x31b   : > { %1270 = vmatmul.f32.vlgmr.msrb.gmra.mxu0 %v1242_v39  ;;  %1310 = vmatmul.f32.vlgmr.msrb.gmra.mxu2 %v1242_v39 }
 0x31c   : > { %v1224_v42 = vpop.permute.xlu1 %1223  ;;  %v1220_v43 = vpop.permute.xlu2 %1219  ;;  %1653 = vmatpush.msra.mxu2 %v3311_v0 }
 0x31d   : > { %v1227_v45 = vsel %vm1225_vm7, %v1222_v30, %v1224_v42  ;;  %v1235_v20 = vsel %vm1225_vm7, %v1224_v42, %v1222_v30  ;;  %v1226_v21 = vsel %vm1225_vm7, %v1218_v41, %v1220_v43  ;;  %v1234_v47 = vsel %vm1225_vm7, %v1220_v43, %v1218_v41 }
 0x31e   : > { %v1240_v48 = vmul.f32 %v3616_v58, %v1227_v45  ;;  %v1241_v49 = vmul.f32 %v3621_v25, %v1235_v20  ;;  %1654 = vmatpush.msra.mxu2 %v3315_v2  ;;  %v1238_v40 = vmul.f32 %v3616_v58, %v1226_v21  ;;  %v1239_v0 = vmul.f32 %v3621_v25, %v1234_v47 }
 0x320   : > { %1288 = vmatpush.msrb.mxu1 %v1240_v48  ;;  %1328 = vmatpush.msrb.mxu3 %v1241_v49 }
 0x322   : > { %1289 = vmatpush.msrb.mxu1 %v1238_v40  ;;  %1329 = vmatpush.msrb.mxu3 %v1239_v0 }
 0x323   : > { %3003 = vmatmul.msk.f32.vlgmr.msrb.gmra.mxu1 %vm4312_vm8, %v1243_v44  ;;  %3004 = vmatmul.msk.f32.vlgmr.msrb.gmra.mxu3 %vm4312_vm8, %v1243_v44 }
 0x324   : > { %v1248_v55 = vpop.permute.xlu1 %1247 }
 0x32c   : > { %v1449_v36 = vpop.permute.xlu1 %1448 }
 0x334   : > { %v1456_v42 = vpop.permute.xlu1 %1455 }
 0x398   : > { %v1271_v14 = vpop.f32.mrf.mxu0 }
 0x399   : > { %v1272_v2 = vadd.f32 %v1271_v14, %v1248_v55 }
 0x39e   : > { %v1311_v17 = vpop.f32.mrf.mxu2 }
 0x39f   : > { %v1312_v52 = vadd.f32 %v1311_v17, %v1248_v55 }
 0x3a0   : > { %v1291_v59 = vpop.f32.mrf.mxu1 }
 0x3a1   : > { %v1292_v62 = vadd.f32 %v1291_v59, %v1272_v2 }
 0x3a3   : > { %1356 = vmatpush.msra.mxu1 %v1292_v62 }
 0x3a4   : > { %3005 = vmatmul.msk.f32.vlgmr.msra.gmra.mxu1 %vm1337_vm9, %v1336_v18 }
 0x3a6   : > { %v1331_v4 = vpop.f32.mrf.mxu3 }
 0x3a7   : > { %v1332_v5 = vadd.f32 %v1331_v4, %v1312_v52 }
 0x3a9   : > { %1376 = vmatpush.msra.mxu3 %v1332_v5 }
 0x3aa   : > { %3006 = vmatmul.msk.f32.vlgmr.msra.gmra.mxu3 %vm1337_vm9, %v1336_v18 }
 0x421   : > { %v1358_v7 = vpop.f32.mrf.mxu1 }
 0x42d   : > { %v1378_v8 = vpop.f32.mrf.mxu3 }
 0x42e   : > { %v1381_v9 = vadd.f32 %v1378_v8, %v1358_v7 }
 0x430   : > { %1382 = vadd.xlane.f32.xlu0 %v1381_v9 }
 0x4a3   : > { %v1383_v54 = vpop.xlane.xlu0 %1382 }
 0x4a4   : > { %v1384_v56 = vmul.f32 0.001953125, %v1383_v54 }
 0x4a6   : > { %v1385_v12 = vsub.f32 %v1292_v62, %v1384_v56  ;;  %v1386_v19 = vsub.f32 %v1332_v5, %v1384_v56 }
 0x4a8   : > { %v1387_v22 = vmul.f32 %v1385_v12, %v1385_v12  ;;  %v1388_v23 = vmul.f32 %v1386_v19, %v1386_v19 }
 0x4aa   : > { %1404 = vmatpush.msrb.mxu1 %v1387_v22  ;;  %1424 = vmatpush.msrb.mxu3 %v1388_v23 }
 0x4ab   : > { %3008 = vmatmul.msk.f32.vlgmr.msrb.gmra.mxu3 %vm1337_vm9, %v1336_v18  ;;  %3007 = vmatmul.msk.f32.vlgmr.msrb.gmra.mxu1 %vm1337_vm9, %v1336_v18 }
 0x4ac   : > { %1673 = vmatpush.msra.mxu3 %v3313_v1 }
 0x4ae   : > { %1674 = vmatpush.msra.mxu3 %v3319_v3 }
 0x528   : > { %v1406_v24 = vpop.f32.mrf.mxu1 }
 0x52e   : > { %v1426_v26 = vpop.f32.mrf.mxu3 }
 0x52f   : > { %v1429_v27 = vadd.f32 %v1426_v26, %v1406_v24  ;;  %v1679_v26 = vld [vmem:[%s4294_s13] sm:$0xff] }
 0x531   : > { %1430 = vadd.xlane.f32.xlu2 %v1429_v27 }
 0x5a4   : > { %v1431_v28 = vpop.xlane.xlu2 %1430 }
 0x5a5   : > { %v1432_v29 = vmul.f32 0.001953125, %v1431_v28 }
 0x5a7   : > { %v1433_v30 = vadd.f32 1e-06, %v1432_v29 }
 0x5a9   : > { %3112 = vrsqrt.f32 %v1433_v30  ;;  %vm1440_vm11 = vweird.f32 %v1433_v30 }
 0x5af   : > { %v3113_v31 = vpop.eup %3112 }
 0x5b0   : > { %v1435_v34 = vmul.f32 %v3113_v31, %v1433_v30  ;;  %vm1441_vm10 = vweird.f32 %v3113_v31 }
 0x5b1   : > { %vm1442_vm12 = vmor %vm1440_vm11, %vm1441_vm10 }
 0x5b2   : > { %v1436_v35 = vmul.f32 %v3113_v31, %v1435_v34 }
 0x5b4   : > { %v1437_v37 = vmul.f32 0.5, %v1436_v35 }
 0x5b6   : > { %v1438_v57 = vsub.f32 1.5, %v1437_v37 }
 0x5b8   : > { %v1439_v15 = vmul.f32 %v3113_v31, %v1438_v57 }
 0x5ba   : > { %v1443_v1 = vsel %vm1442_vm12, %v3113_v31, %v1439_v15 }
 0x5bb   : > { %v1444_v3 = vmul.f32 %v1443_v1, %v1385_v12  ;;  %v1445_v38 = vmul.f32 %v1443_v1, %v1386_v19 }
 0x5bd   : > { %v1451_v39 = vmul.f32 %v1449_v36, %v1444_v3  ;;  %v1452_v41 = vmul.f32 %v1449_v36, %v1445_v38 }
 0x5bf   : > { %v1458_v43 = vadd.f32 %v1456_v42, %v1451_v39  ;;  %v1459_v45 = vadd.f32 %v1456_v42, %v1452_v41  ;;  %v1635_v42 = vld [vmem:[%s4293_s12] sm:$0xff] }
 0x5c0   : > { %3013 = vmatmul.msk.f32.vlgmr.msra.gmra.mxu2 %vm730_vm0, %v1635_v42  ;;  %3014 = vmatmul.msk.f32.vlgmr.msra.gmra.mxu3 %vm730_vm0, %v1635_v42  ;;  %v1810_v42 = vld [vmem:[#allocation2 + $0x3c8] sm:$0xff] }
 0x5c1   : > { %v3009_v20 = vmul.f32 -1.442695, %v1458_v43  ;;  %v3010_v21 = vmul.f32 -1.442695, %v1459_v45 }
 0x5c3   : > { %3114 = vpow2.f32 %v3009_v20 }
 0x5c4   : > { %3116 = vpow2.f32 %v3010_v21  ;;  %v1793_v21 = vld [vmem:[#allocation2 + $0x340] sm:$0xff] }
 0x5c9   : > { %v3115_v47 = vpop.eup %3114 }
 0x5ca   : > { %v3117_v48 = vpop.eup %3116  ;;  %v1466_v49 = vadd.f32 1.0, %v3115_v47  ;;  %v1921_v47 = vld [vmem:[#allocation2 + $0x740] sm:$0xff] }
 0x5cb   : > { %v1467_v40 = vadd.f32 1.0, %v3117_v48 }
 0x5cc   : > { %3118 = vrcp.f32 %v1466_v49  ;;  %v1479_v59 = vand.u32 2147483648, %v1466_v49  ;;  %v1477_v18 = vand.u32 2147483647, %v1466_v49  ;;  %vm1473_vm15 = vweird.f32 %v1466_v49 }
 0x5cd   : > { %3120 = vrcp.f32 %v1467_v40  ;;  %v1494_v52 = vand.u32 2147483648, %v1467_v40  ;;  %v1492_v5 = vand.u32 2147483647, %v1467_v40  ;;  %vm1488_vm10 = vweird.f32 %v1467_v40 }
 0x5ce   : > { %v1480_v8 = vor.u32 1.1754944e-38, %v1479_v59  ;;  %vm1478_vm11 = vcmp.eq.f32.partialorder %v1477_v18, 8.507059e+37 }
 0x5cf   : > { %v1495_v56 = vor.u32 1.1754944e-38, %v1494_v52  ;;  %vm1493_vm8 = vcmp.eq.f32.partialorder %v1492_v5, 8.507059e+37  ;;  %v1761_v52 = vld [vmem:[#allocation2 + $0x240] sm:$0xff] }
 0x5d2   : > { %v3119_v0 = vpop.eup %3118 }
 0x5d3   : > { %v3121_v44 = vpop.eup %3120  ;;  %v1469_v14 = vmul.f32 %v3119_v0, %v1466_v49  ;;  %vm1474_vm13 = vweird.f32 %v3119_v0 }
 0x5d4   : > { %v1484_v55 = vmul.f32 %v3121_v44, %v1467_v40  ;;  %vm1489_vm14 = vweird.f32 %v3121_v44  ;;  %vm1475_vm9 = vmor %vm1473_vm15, %vm1474_vm13 }
 0x5d5   : > { %v1470_v2 = vsub.f32 1.0, %v1469_v14  ;;  %vm1490_vm12 = vmor %vm1488_vm10, %vm1489_vm14  ;;  %v1913_v14 = vld [vmem:[#allocation2 + $0x700] sm:$0xff] }
 0x5d6   : > { %v1485_v62 = vsub.f32 1.0, %v1484_v55  ;;  %v1777_v55 = vld [vmem:[#allocation2 + $0x2c0] sm:$0xff] }
 0x5d7   : > { %v1471_v17 = vmul.f32 %v3119_v0, %v1470_v2  ;;  %v1905_v2 = vld [vmem:[#allocation2 + $0x6c0] sm:$0xff] }
 0x5d8   : > { %v1486_v4 = vmul.f32 %v3121_v44, %v1485_v62 }
 0x5d9   : > { %v1472_v7 = vadd.f32 %v3119_v0, %v1471_v17  ;;  %v1769_v17 = vld [vmem:[#allocation2 + $0x280] sm:$0xff] }
 0x5da   : > { %v1487_v9 = vadd.f32 %v3121_v44, %v1486_v4  ;;  %v1889_v4 = vld [vmem:[#allocation2 + $0x640] sm:$0xff] }
 0x5db   : > { %v1476_v54 = vsel %vm1475_vm9, %v3119_v0, %v1472_v7 }
 0x5dc   : > { %v1481_v12 = vsel %vm1478_vm11, %v1480_v8, %v1476_v54  ;;  %v1491_v19 = vsel %vm1490_vm12, %v3121_v44, %v1487_v9  ;;  %v1785_v44 = vld [vmem:[#allocation2 + $0x300] sm:$0xff] }
 0x5dd   : > { %v1496_v22 = vsel %vm1493_vm8, %v1495_v56, %v1491_v19  ;;  %v3647_v23 = vmul.f32 %v1481_v12, %v1458_v43  ;;  %v1753_v56 = vld [vmem:[#allocation2 + $0x200] sm:$0xff]  ;;  %vm4330_vm8 = vcmask 261120  }
 0x5de   : > { %v3649_v24 = vmul.f32 %v1496_v22, %v1459_v45  ;;  %v1809_v45 = vld [vmem:[#allocation2 + $0x3c0] sm:$0xff]  ;;  %vm4331_vm13 = vmmov %vm4330_vm8 }
 0x5df   : > { %1558 = vrot.lane.b32.xlu2 %v3647_v23, %s3168_s0  ;;  %1580 = vrot.lane.b32.xlu1 %v3647_v23, %s3175_s27  ;;  %v1881_v12 = vld [vmem:[#allocation2 + $0x600] sm:$0xff]  ;;  %vm4332_vm14 = vmmov %vm4330_vm8 }
 0x5e0   : > { %1560 = vrot.lane.b32.xlu0 %v3649_v24, %s3168_s0  ;;  %1945 = vmatpush.msrb.mxu2 %v1809_v45  ;;  %v1817_v45 = vld [vmem:[#allocation2 + $0x400] sm:$0xff]  ;;  %s694_s0 = scalar_lea.vmem %s4300_s19, %s3301_s28  ;;  %s3176_s28 = smov 31   ;;  %vm4333_vm15 = vmmov %vm4330_vm8 }
 0x5e1   : > { %vm4334_vm9 = vmmov %vm4330_vm8 }
 0x5e7   : > { %1525 = vrot.lane.b32.xlu2 %v3649_v24, %s3172_s25  ;;  %1582 = vrot.lane.b32.xlu1 %v3649_v24, %s3175_s27  ;;  %s4327_s27 = smov 17  }
 0x5e8   : > { %1536 = vrot.lane.b32.xlu0 %v3649_v24, %s4325_s23 }
 0x5ef   : > { %1517 = vrot.lane.b32.xlu2 %v3647_v23, %s3174_s26  ;;  %1569 = vrot.lane.b32.xlu1 %v3647_v23, %s4326_s24 }
 0x5f0   : > { %1528 = vrot.lane.b32.xlu0 %v3647_v23, %s3172_s25  ;;  %s4313_s25 = smov 96  }
 0x5f7   : > { %1682 = vperm.xlu2 %3066, %v1679_v26   ;;  %1571 = vrot.lane.b32.xlu1 %v3649_v24, %s4326_s24  ;;  %v1737_v26 = vld [vmem:[#allocation2 + $0x180] sm:$0xff]  ;;  %s4329_s24 = smov 96  }
 0x5f8   : > { %1502 = vrot.lane.b32.xlu0 %v3649_v24, %s4327_s27 }
 0x5ff   : > { %1547 = vrot.lane.b32.xlu1 %v3647_v23, %s4328_s29 }
 0x607   : > { %1549 = vrot.lane.b32.xlu1 %v3649_v24, %s4328_s29 }
 0x60f   : > { %1539 = vrot.lane.b32.xlu1 %v3647_v23, %s4325_s23 }
 0x617   : > { %1514 = vrot.lane.b32.xlu1 %v3649_v24, %s3174_s26  ;;  %s3179_s26 = smov 97  }
 0x61f   : > { %1506 = vrot.lane.b32.xlu1 %v3647_v23, %s4327_s27  ;;  %s3177_s27 = smov 95  }
 0x639   : > { %v1559_v37 = vpop.permute.xlu2 %1558 }
 0x641   : > { %v1526_v62 = vpop.permute.xlu2 %1525 }
 0x651   : > { %v1581_v27 = vpop.permute.xlu1 %1580 }
 0x652   : > { %v1561_v36 = vpop.permute.xlu0 %1560 }
 0x653   : > { %v1562_v15 = vsel %vm1175_vm2, %v1559_v37, %v1561_v36  ;;  %v1566_v1 = vsel %vm1175_vm2, %v1561_v36, %v1559_v37  ;;  %v1713_v36 = vld [vmem:[#allocation2 + $0xc0] sm:$0xff]  ;;  %vm2587_vm2 = vcmask 785408  }
 0x654   : > { %v1568_v41 = vmul.f32 %v1566_v1, %v3508_v16  ;;  %v1929_v16 = vld [vmem:[#allocation2 + $0x780] sm:$0xff] }
 0x655   : > { %v1841_v37 = vld [vmem:[#allocation2 + $0x4c0] sm:$0xff] }
 0x659   : > { %v1583_v28 = vpop.permute.xlu1 %1582 }
 0x65a   : > { %v1584_v29 = vsel %vm1225_vm7, %v1581_v27, %v1583_v28  ;;  %v1588_v30 = vsel %vm1225_vm7, %v1583_v28, %v1581_v27  ;;  %v1729_v28 = vld [vmem:[#allocation2 + $0x140] sm:$0xff]  ;;  %vm2291_vm7 = vcmask 269312  }
 0x65b   : > { %v1589_v31 = vmul.f32 %v3616_v58, %v1584_v29  ;;  %v1590_v34 = vmul.f32 %v3621_v25, %v1588_v30  ;;  %v1567_v25 = vmul.f32 %v1562_v15, %v3505_v13  ;;  %v1801_v13 = vld [vmem:[#allocation2 + $0x380] sm:$0xff] }
 0x65c   : > { %1946 = vmatpush.msrb.mxu2 %v1801_v13  ;;  %v1857_v29 = vld [vmem:[#allocation2 + $0x540] sm:$0xff]  ;;  %v1939_v13 = vld [vmem:[#allocation2 + $0x7d0] sm:$0xff] }
 0x65d   : > { %1602 = vmatpush.msra.mxu0 %v1589_v31  ;;  %1622 = vmatpush.msra.mxu1 %v1590_v34  ;;  %v1721_v34 = vld [vmem:[#allocation2 + $0x100] sm:$0xff] }
 0x65e   : > { %1947 = vmatpush.msrb.mxu2 %v1793_v21  ;;  %v1833_v15 = vld [vmem:[#allocation2 + $0x480] sm:$0xff]  ;;  %v1803_v21 = vld [vmem:[#allocation2 + $0x390] sm:$0xff] }
 0x660   : > { %1948 = vmatpush.msrb.mxu2 %v1785_v44  ;;  %v1778_v44 = vld [vmem:[#allocation2 + $0x2c8] sm:$0xff] }
 0x661   : > { %v1570_v35 = vpop.permute.xlu1 %1569 }
 0x662   : > { %1949 = vmatpush.msrb.mxu2 %v1777_v55  ;;  %v1787_v55 = vld [vmem:[#allocation2 + $0x310] sm:$0xff] }
 0x664   : > { %1950 = vmatpush.msrb.mxu2 %v1769_v17  ;;  %v1779_v17 = vld [vmem:[#allocation2 + $0x2d0] sm:$0xff] }
 0x666   : > { %1951 = vmatpush.msrb.mxu2 %v1761_v52  ;;  %v1771_v52 = vld [vmem:[#allocation2 + $0x290] sm:$0xff] }
 0x668   : > { %1952 = vmatpush.msrb.mxu2 %v1753_v56  ;;  %v1874_v56 = vld [vmem:[#allocation2 + $0x5c8] sm:$0xff] }
 0x669   : > { %v1572_v57 = vpop.permute.xlu1 %1571 }
 0x66a   : > { %v1573_v3 = vsel %vm1200_vm1, %v1570_v35, %v1572_v57  ;;  %v1577_v38 = vsel %vm1200_vm1, %v1572_v57, %v1570_v35  ;;  %v1849_v35 = vld [vmem:[#allocation2 + $0x500] sm:$0xff]  ;;  %vm2637_vm1 = vcmask 777216  }
 0x66b   : > { %v1578_v39 = vmul.f32 %v1573_v3, %v3489_v60  ;;  %v1579_v58 = vmul.f32 %v1577_v38, %v3492_v61  ;;  %v1537_v60 = vpop.permute.xlu0 %1536  ;;  %v1937_v61 = vld [vmem:[#allocation2 + $0x7c0] sm:$0xff] }
 0x66c   : > { %1965 = vmatpush.msrb.mxu3 %v1937_v61  ;;  %v1705_v57 = vld [vmem:[#allocation2 + $0x80] sm:$0xff]  ;;  %v1930_v61 = vld [vmem:[#allocation2 + $0x788] sm:$0xff] }
 0x66d   : > { %1603 = vmatpush.msra.mxu0 %v1578_v39  ;;  %1623 = vmatpush.msra.mxu1 %v1579_v58  ;;  %v1697_v38 = vld [vmem:[#allocation2 + $0x40] sm:$0xff] }
 0x66e   : > { %1966 = vmatpush.msrb.mxu3 %v1929_v16  ;;  %v1794_v16 = vld [vmem:[#allocation2 + $0x348] sm:$0xff] }
 0x66f   : > { %1604 = vmatpush.msra.mxu0 %v1567_v25  ;;  %1624 = vmatpush.msra.mxu1 %v1568_v41  ;;  %v1500_v41 = vld [vmem:[%s4292_s11] sm:$0xff] }
 0x670   : > { %1967 = vmatpush.msrb.mxu3 %v1921_v47  ;;  %v1931_v47 = vld [vmem:[#allocation2 + $0x790] sm:$0xff] }
 0x671   : > { %v1548_v43 = vpop.permute.xlu1 %1547 }
 0x672   : > { %1968 = vmatpush.msrb.mxu3 %v1913_v14  ;;  %v1906_v14 = vld [vmem:[#allocation2 + $0x6c8] sm:$0xff] }
 0x673   : > { %v1529_v59 = vpop.permute.xlu0 %1528 }
 0x674   : > { %1969 = vmatpush.msrb.mxu3 %v1905_v2  ;;  %v1533_v5 = vsel %vm1102_vm5, %v1526_v62, %v1529_v59  ;;  %v1915_v2 = vld [vmem:[#allocation2 + $0x710] sm:$0xff] }
 0x675   : > { %v1534_v19 = vmul.f32 %v1533_v5, %v3558_v63  ;;  %v1754_v5 = vld [vmem:[#allocation2 + $0x208] sm:$0xff] }
 0x679   : > { %v1550_v20 = vpop.permute.xlu1 %1549 }
 0x67a   : > { %v1551_v48 = vsel %vm1150_vm3, %v1548_v43, %v1550_v20  ;;  %v1555_v49 = vsel %vm1150_vm3, %v1550_v20, %v1548_v43  ;;  %v1938_v43 = vld [vmem:[#allocation2 + $0x7c8] sm:$0xff] }
 0x67b   : > { %v1556_v40 = vmul.f32 %v1551_v48, %v3521_v32  ;;  %v1557_v0 = vmul.f32 %v1555_v49, %v3524_v33  ;;  %v1897_v32 = vld [vmem:[#allocation2 + $0x680] sm:$0xff]  ;;  %v1530_v33 = vsel %vm1102_vm5, %v1529_v59, %v1526_v62  ;;  %v1503_v1 = vpop.permute.xlu0 %1502  ;;  %v1922_v20 = vld [vmem:[#allocation2 + $0x748] sm:$0xff]  ;;  %vm2537_vm5 = vcmask 793600  }
 0x67c   : > { %1970 = vmatpush.msrb.mxu3 %v1897_v32  ;;  %v1535_v22 = vmul.f32 %v1530_v33, %v3565_v50  ;;  %v1786_v48 = vld [vmem:[#allocation2 + $0x308] sm:$0xff]  ;;  %v1907_v32 = vld [vmem:[#allocation2 + $0x6d0] sm:$0xff] }
 0x67d   : > { %1605 = vmatpush.msra.mxu0 %v1556_v40  ;;  %1625 = vmatpush.msra.mxu1 %v1557_v0  ;;  %v1914_v49 = vld [vmem:[#allocation2 + $0x708] sm:$0xff]  ;;  %v1795_v40 = vld [vmem:[#allocation2 + $0x350] sm:$0xff] }
 0x67e   : > { %1971 = vmatpush.msrb.mxu3 %v1889_v4  ;;  %v1923_v0 = vld [vmem:[#allocation2 + $0x750] sm:$0xff]  ;;  %v1770_v59 = vld [vmem:[#allocation2 + $0x288] sm:$0xff] }
 0x67f   : > { %1606 = vmatpush.msra.mxu0 %v3647_v23  ;;  %1626 = vmatpush.msra.mxu1 %v3649_v24  ;;  %v1745_v23 = vld [vmem:[#allocation2 + $0x1c0] sm:$0xff]  ;;  %v1898_v62 = vld [vmem:[#allocation2 + $0x688] sm:$0xff]  ;;  %v1899_v4 = vld [vmem:[#allocation2 + $0x690] sm:$0xff] }
 0x680   : > { %v1873_v24 = vld [vmem:[#allocation2 + $0x5c0] sm:$0xff]  ;;  %1972 = vmatpush.msrb.mxu3 %v1881_v12  ;;  %1953 = vmatpush.msrb.mxu2 %v1745_v23  ;;  %v1762_v33 = vld [vmem:[#allocation2 + $0x248] sm:$0xff]  ;;  %v1755_v12 = vld [vmem:[#allocation2 + $0x210] sm:$0xff] }
 0x681   : > { %v1540_v18 = vpop.permute.xlu1 %1539  ;;  %v1866_v23 = vld [vmem:[#allocation2 + $0x588] sm:$0xff] }
 0x682   : > { %v1541_v7 = vsel %vm1127_vm4, %v1540_v18, %v1537_v60  ;;  %v1544_v8 = vsel %vm1127_vm4, %v1537_v60, %v1540_v18  ;;  %1973 = vmatpush.msrb.mxu3 %v1873_v24  ;;  %1954 = vmatpush.msrb.mxu2 %v1737_v26  ;;  %v1689_v60 = vld [vmem:[#allocation2] sm:$0xff]  ;;  %v1890_v18 = vld [vmem:[#allocation2 + $0x648] sm:$0xff]  ;;  %v1747_v24 = vld [vmem:[#allocation2 + $0x1d0] sm:$0xff] }
 0x683   : > { %v1545_v9 = vmul.f32 %v1544_v8, %v3537_v46  ;;  %v1546_v54 = vmul.f32 %v1541_v7, %v3545_v51  ;;  %v1865_v46 = vld [vmem:[#allocation2 + $0x580] sm:$0xff]  ;;  %v1518_v51 = vpop.permute.xlu2 %1517  ;;  %v1882_v7 = vld [vmem:[#allocation2 + $0x608] sm:$0xff]  ;;  %v1763_v8 = vld [vmem:[#allocation2 + $0x250] sm:$0xff] }
 0x684   : > { %1974 = vmatpush.msrb.mxu3 %v1865_v46  ;;  %1955 = vmatpush.msrb.mxu2 %v1729_v28  ;;  %v1875_v26 = vld [vmem:[#allocation2 + $0x5d0] sm:$0xff]  ;;  %v1730_v46 = vld [vmem:[#allocation2 + $0x148] sm:$0xff] }
 0x685   : > { %1607 = vmatpush.msra.mxu0 %v1545_v9  ;;  %1627 = vmatpush.msra.mxu1 %v1546_v54  ;;  %v1891_v9 = vld [vmem:[#allocation2 + $0x650] sm:$0xff]  ;;  %v1746_v54 = vld [vmem:[#allocation2 + $0x1c8] sm:$0xff] }
 0x686   : > { %1975 = vmatpush.msrb.mxu3 %v1857_v29  ;;  %1956 = vmatpush.msrb.mxu2 %v1721_v34  ;;  %v1867_v28 = vld [vmem:[#allocation2 + $0x590] sm:$0xff]  ;;  %v1722_v29 = vld [vmem:[#allocation2 + $0x108] sm:$0xff] }
 0x687   : > { %1608 = vmatpush.msra.mxu0 %v1534_v19  ;;  %1628 = vmatpush.msra.mxu1 %v1535_v22  ;;  %v1883_v19 = vld [vmem:[#allocation2 + $0x610] sm:$0xff]  ;;  %v1738_v22 = vld [vmem:[#allocation2 + $0x188] sm:$0xff] }
 0x688   : > { %1976 = vmatpush.msrb.mxu3 %v1849_v35  ;;  %1957 = vmatpush.msrb.mxu2 %v1713_v36  ;;  %v1842_v34 = vld [vmem:[#allocation2 + $0x4c8] sm:$0xff]  ;;  %v1723_v35 = vld [vmem:[#allocation2 + $0x110] sm:$0xff] }
 0x689   : > { %v1515_v27 = vpop.permute.xlu1 %1514  ;;  %v1851_v36 = vld [vmem:[#allocation2 + $0x510] sm:$0xff] }
 0x68a   : > { %v1519_v63 = vsel %vm730_vm0, %v1518_v51, %v1515_v27  ;;  %v1522_v50 = vsel %vm730_vm0, %v1515_v27, %v1518_v51  ;;  %1977 = vmatpush.msrb.mxu3 %v1841_v37  ;;  %1958 = vmatpush.msrb.mxu2 %v1705_v57  ;;  %vm1591_vm0 = vcmask 588800   ;;  %v1858_v51 = vld [vmem:[#allocation2 + $0x548] sm:$0xff]  ;;  %v1739_v27 = vld [vmem:[#allocation2 + $0x190] sm:$0xff] }
 0x68b   : > { %v1523_v30 = vmul.f32 %v1522_v50, %v3574_v10  ;;  %v1524_v31 = vmul.f32 %v1519_v63, %v3577_v11  ;;  %v1825_v10 = vld [vmem:[#allocation2 + $0x440] sm:$0xff]  ;;  %v1850_v63 = vld [vmem:[#allocation2 + $0x508] sm:$0xff]  ;;  %v1731_v50 = vld [vmem:[#allocation2 + $0x150] sm:$0xff] }
 0x68c   : > { %1978 = vmatpush.msrb.mxu3 %v1833_v15  ;;  %1959 = vmatpush.msrb.mxu2 %v1697_v38  ;;  %v1706_v37 = vld [vmem:[#allocation2 + $0x88] sm:$0xff]  ;;  %v1715_v15 = vld [vmem:[#allocation2 + $0xd0] sm:$0xff] }
 0x68d   : > { %1609 = vmatpush.msra.mxu0 %v1523_v30  ;;  %1629 = vmatpush.msra.mxu1 %v1524_v31  ;;  %v1859_v30 = vld [vmem:[#allocation2 + $0x550] sm:$0xff]  ;;  %v1714_v31 = vld [vmem:[#allocation2 + $0xc8] sm:$0xff] }
 0x68e   : > { %1979 = vmatpush.msrb.mxu3 %v1825_v10  ;;  %1960 = vmatpush.msrb.mxu2 %v1689_v60  ;;  %v1834_v57 = vld [vmem:[#allocation2 + $0x488] sm:$0xff]  ;;  %v1788_v60 = vld [vmem:[#allocation2 + $0x318] sm:$0xff] }
 0x68f   : > { %v1826_v38 = vld [vmem:[#allocation2 + $0x448] sm:$0xff] }
 0x690   : > { %1980 = vmatpush.msrb.mxu3 %v1817_v45  ;;  %v1690_v10 = vld [vmem:[#allocation2 + $0x8] sm:$0xff]  ;;  %v1916_v45 = vld [vmem:[#allocation2 + $0x718] sm:$0xff] }
 0x691   : > { %v1507_v3 = vpop.permute.xlu1 %1506 }
 0x692   : > { %v1508_v11 = vsel %vm1053_vm6, %v1507_v3, %v1503_v1  ;;  %v1511_v39 = vsel %vm1053_vm6, %v1503_v1, %v1507_v3  ;;  %2045 = vmatpush.msra.mxu3 %v1939_v13  ;;  %v1843_v1 = vld [vmem:[#allocation2 + $0x4d0] sm:$0xff]  ;;  %v1698_v3 = vld [vmem:[#allocation2 + $0x48] sm:$0xff]  ;;  %v1900_v13 = vld [vmem:[#allocation2 + $0x698] sm:$0xff]  ;;  %vm2390_vm6 = vcmask 252928  }
 0x693   : > { %v1512_v58 = vmul.f32 %v1511_v39, %v3593_v53  ;;  %v1513_v25 = vmul.f32 %v1508_v11, %v3596_v6  ;;  %v1802_v53 = vld [vmem:[#allocation2 + $0x388] sm:$0xff]  ;;  %v1811_v6 = vld [vmem:[#allocation2 + $0x3d0] sm:$0xff]  ;;  %v1812_v39 = vld [vmem:[#allocation2 + $0x3d8] sm:$0xff] }
 0x694   : > { %2025 = vmatpush.msra.mxu2 %v1811_v6  ;;  %2046 = vmatpush.msra.mxu3 %v1931_v47  ;;  %v1818_v11 = vld [vmem:[#allocation2 + $0x408] sm:$0xff]  ;;  %v1772_v6 = vld [vmem:[#allocation2 + $0x298] sm:$0xff] }
 0x695   : > { %1610 = vmatpush.msra.mxu0 %v1512_v58  ;;  %1630 = vmatpush.msra.mxu1 %v1513_v25  ;;  %v1940_v58 = vld [vmem:[#allocation2 + $0x7d8] sm:$0xff] }
 0x696   : > { %3011 = vmatmul.msk.f32.vlgmr.msra.gmra.mxu0 %vm1591_vm0, %v1500_v41  ;;  %3012 = vmatmul.msk.f32.vlgmr.msra.gmra.mxu1 %vm1591_vm0, %v1500_v41  ;;  %v1804_v25 = vld [vmem:[#allocation2 + $0x398] sm:$0xff] }
 0x697   : > { %1985 = vmatpush.msrb.mxu0 %v1810_v42  ;;  %2005 = vmatpush.msrb.mxu1 %v1938_v43  ;;  %v1932_v41 = vld [vmem:[#allocation2 + $0x798] sm:$0xff] }
 0x698   : > { %2026 = vmatpush.msra.mxu2 %v1803_v21  ;;  %2047 = vmatpush.msra.mxu3 %v1923_v0  ;;  %v1796_v42 = vld [vmem:[#allocation2 + $0x358] sm:$0xff] }
 0x699   : > { %1986 = vmatpush.msrb.mxu0 %v1802_v53  ;;  %2006 = vmatpush.msrb.mxu1 %v1930_v61  ;;  %v1924_v43 = vld [vmem:[#allocation2 + $0x758] sm:$0xff] }
 0x69a   : > { %2027 = vmatpush.msra.mxu2 %v1795_v40  ;;  %2048 = vmatpush.msra.mxu3 %v1915_v2  ;;  %v1780_v53 = vld [vmem:[#allocation2 + $0x2d8] sm:$0xff] }
 0x69b   : > { %1987 = vmatpush.msrb.mxu0 %v1794_v16  ;;  %2007 = vmatpush.msrb.mxu1 %v1922_v20  ;;  %v1908_v61 = vld [vmem:[#allocation2 + $0x6d8] sm:$0xff] }
 0x69c   : > { %2028 = vmatpush.msra.mxu2 %v1787_v55  ;;  %2049 = vmatpush.msra.mxu3 %v1907_v32  ;;  %v1764_v16 = vld [vmem:[#allocation2 + $0x258] sm:$0xff]  ;;  %v1835_v32 = vld [vmem:[#allocation2 + $0x490] sm:$0xff] }
 0x69d   : > { %1988 = vmatpush.msrb.mxu0 %v1786_v48  ;;  %2008 = vmatpush.msrb.mxu1 %v1914_v49  ;;  %v1892_v20 = vld [vmem:[#allocation2 + $0x658] sm:$0xff] }
 0x69e   : > { %2029 = vmatpush.msra.mxu2 %v1779_v17  ;;  %2050 = vmatpush.msra.mxu3 %v1899_v4  ;;  %v1756_v21 = vld [vmem:[#allocation2 + $0x218] sm:$0xff]  ;;  %v1707_v17 = vld [vmem:[#allocation2 + $0x90] sm:$0xff] }
 0x69f   : > { %1989 = vmatpush.msrb.mxu0 %v1778_v44  ;;  %2009 = vmatpush.msrb.mxu1 %v1906_v14  ;;  %v1884_v47 = vld [vmem:[#allocation2 + $0x618] sm:$0xff]  ;;  %v1827_v4 = vld [vmem:[#allocation2 + $0x450] sm:$0xff] }
 0x6a0   : > { %2030 = vmatpush.msra.mxu2 %v1771_v52  ;;  %2051 = vmatpush.msra.mxu3 %v1891_v9  ;;  %v1748_v48 = vld [vmem:[#allocation2 + $0x1d8] sm:$0xff]  ;;  %v1699_v52 = vld [vmem:[#allocation2 + $0x50] sm:$0xff] }
 0x6a1   : > { %1990 = vmatpush.msrb.mxu0 %v1770_v59  ;;  %2010 = vmatpush.msrb.mxu1 %v1898_v62  ;;  %v1876_v49 = vld [vmem:[#allocation2 + $0x5d8] sm:$0xff]  ;;  %v1819_v9 = vld [vmem:[#allocation2 + $0x410] sm:$0xff] }
 0x6a2   : > { %2031 = vmatpush.msra.mxu2 %v1763_v8  ;;  %2052 = vmatpush.msra.mxu3 %v1883_v19  ;;  %v1740_v40 = vld [vmem:[#allocation2 + $0x198] sm:$0xff]  ;;  %v1691_v8 = vld [vmem:[#allocation2 + $0x10] sm:$0xff]  ;;  %v1676_v19 = vpop.f32.mrf.mxu3 }
 0x6a3   : > { %1991 = vmatpush.msrb.mxu0 %v1762_v33  ;;  %2011 = vmatpush.msrb.mxu1 %v1890_v18  ;;  %v1868_v0 = vld [vmem:[#allocation2 + $0x598] sm:$0xff] }
 0x6a4   : > { %2032 = vmatpush.msra.mxu2 %v1755_v12  ;;  %2053 = vmatpush.msra.mxu3 %v1875_v26  ;;  %v1732_v44 = vld [vmem:[#allocation2 + $0x158] sm:$0xff]  ;;  %v1656_v12 = vpop.f32.mrf.mxu2 }
 0x6a5   : > { %1992 = vmatpush.msrb.mxu0 %v1754_v5  ;;  %2012 = vmatpush.msrb.mxu1 %v1882_v7  ;;  %v1860_v14 = vld [vmem:[#allocation2 + $0x558] sm:$0xff] }
 0x6a6   : > { %2033 = vmatpush.msra.mxu2 %v1747_v24  ;;  %2054 = vmatpush.msra.mxu3 %v1867_v28  ;;  %v1724_v55 = vld [vmem:[#allocation2 + $0x118] sm:$0xff]  ;;  %v1813_v28 = vld [vmem:[#allocation2 + $0x3e0] sm:$0xff] }
 0x6a7   : > { %1993 = vmatpush.msrb.mxu0 %v1746_v54  ;;  %2013 = vmatpush.msrb.mxu1 %v1874_v56  ;;  %v1852_v2 = vld [vmem:[#allocation2 + $0x518] sm:$0xff] }
 0x6a8   : > { %2034 = vmatpush.msra.mxu2 %v1739_v27  ;;  %2055 = vmatpush.msra.mxu3 %v1859_v30  ;;  %v1716_v59 = vld [vmem:[#allocation2 + $0xd8] sm:$0xff]  ;;  %v1805_v30 = vld [vmem:[#allocation2 + $0x3a0] sm:$0xff] }
 0x6a9   : > { %1994 = vmatpush.msrb.mxu0 %v1738_v22  ;;  %2014 = vmatpush.msrb.mxu1 %v1866_v23  ;;  %v1844_v62 = vld [vmem:[#allocation2 + $0x4d8] sm:$0xff] }
 0x6aa   : > { %2035 = vmatpush.msra.mxu2 %v1731_v50  ;;  %2056 = vmatpush.msra.mxu3 %v1851_v36  ;;  %v1708_v33 = vld [vmem:[#allocation2 + $0x98] sm:$0xff]  ;;  %v1942_v50 = vld [vmem:[#allocation2 + $0x7e8] sm:$0xff]  ;;  %v1797_v36 = vld [vmem:[#allocation2 + $0x360] sm:$0xff] }
 0x6ab   : > { %1995 = vmatpush.msrb.mxu0 %v1730_v46  ;;  %2015 = vmatpush.msrb.mxu1 %v1858_v51  ;;  %v1836_v18 = vld [vmem:[#allocation2 + $0x498] sm:$0xff]  ;;  %v1683_v46 = vpop.permute.xlu2 %1682 }
 0x6ac   : > { %2036 = vmatpush.msra.mxu2 %v1723_v35  ;;  %2057 = vmatpush.msra.mxu3 %v1843_v1  ;;  %v1700_v5 = vld [vmem:[#allocation2 + $0x58] sm:$0xff]  ;;  %v1934_v35 = vld [vmem:[#allocation2 + $0x7a8] sm:$0xff]  ;;  %v1789_v1 = vld [vmem:[#allocation2 + $0x320] sm:$0xff] }
 0x6ad   : > { %1996 = vmatpush.msrb.mxu0 %v1722_v29  ;;  %2016 = vmatpush.msrb.mxu1 %v1850_v63  ;;  %v1828_v7 = vld [vmem:[#allocation2 + $0x458] sm:$0xff]  ;;  %v1941_v29 = vld [vmem:[#allocation2 + $0x7e0] sm:$0xff]  ;;  %v1814_v63 = vld [vmem:[#allocation2 + $0x3e8] sm:$0xff] }
 0x6ae   : > { %2037 = vmatpush.msra.mxu2 %v1715_v15  ;;  %2058 = vmatpush.msra.mxu3 %v1835_v32  ;;  %v1692_v54 = vld [vmem:[#allocation2 + $0x18] sm:$0xff]  ;;  %v1926_v15 = vld [vmem:[#allocation2 + $0x768] sm:$0xff]  ;;  %v1725_v32 = vld [vmem:[#allocation2 + $0x120] sm:$0xff] }
 0x6af   : > { %1997 = vmatpush.msrb.mxu0 %v1714_v31  ;;  %2017 = vmatpush.msrb.mxu1 %v1842_v34  ;;  %v1820_v56 = vld [vmem:[#allocation2 + $0x418] sm:$0xff]  ;;  %v1933_v31 = vld [vmem:[#allocation2 + $0x7a0] sm:$0xff]  ;;  %v1806_v34 = vld [vmem:[#allocation2 + $0x3a8] sm:$0xff] }
 0x6b0   : > { %2038 = vmatpush.msra.mxu2 %v1707_v17  ;;  %2059 = vmatpush.msra.mxu3 %v1827_v4  ;;  %v1862_v17 = vld [vmem:[#allocation2 + $0x568] sm:$0xff]  ;;  %v1717_v4 = vld [vmem:[#allocation2 + $0xe0] sm:$0xff] }
 0x6b1   : > { %1998 = vmatpush.msrb.mxu0 %v1706_v37  ;;  %2018 = vmatpush.msrb.mxu1 %v1834_v57  ;;  %v1925_v37 = vld [vmem:[#allocation2 + $0x760] sm:$0xff]  ;;  %v1798_v57 = vld [vmem:[#allocation2 + $0x368] sm:$0xff] }
 0x6b2   : > { %2039 = vmatpush.msra.mxu2 %v1699_v52  ;;  %2060 = vmatpush.msra.mxu3 %v1819_v9  ;;  %v1854_v52 = vld [vmem:[#allocation2 + $0x528] sm:$0xff]  ;;  %v1709_v9 = vld [vmem:[#allocation2 + $0xa0] sm:$0xff] }
 0x6b3   : > { %1999 = vmatpush.msrb.mxu0 %v1698_v3  ;;  %2019 = vmatpush.msrb.mxu1 %v1826_v38  ;;  %v1917_v3 = vld [vmem:[#allocation2 + $0x720] sm:$0xff]  ;;  %v1790_v38 = vld [vmem:[#allocation2 + $0x328] sm:$0xff] }
 0x6b4   : > { %2040 = vmatpush.msra.mxu2 %v1691_v8  ;;  %v1846_v8 = vld [vmem:[#allocation2 + $0x4e8] sm:$0xff] }
 0x6b5   : > { %2000 = vmatpush.msrb.mxu0 %v1690_v10  ;;  %2020 = vmatpush.msrb.mxu1 %v1818_v11  ;;  %v1918_v10 = vld [vmem:[#allocation2 + $0x728] sm:$0xff]  ;;  %v1781_v11 = vld [vmem:[#allocation2 + $0x2e0] sm:$0xff] }
 0x6b7   : > { %2065 = vmatpush.msra.mxu0 %v1812_v39  ;;  %2085 = vmatpush.msra.mxu1 %v1940_v58  ;;  %v1909_v39 = vld [vmem:[#allocation2 + $0x6e0] sm:$0xff]  ;;  %v1782_v58 = vld [vmem:[#allocation2 + $0x2e8] sm:$0xff] }
 0x6b9   : > { %2066 = vmatpush.msra.mxu0 %v1804_v25  ;;  %2086 = vmatpush.msra.mxu1 %v1932_v41  ;;  %v1910_v25 = vld [vmem:[#allocation2 + $0x6e8] sm:$0xff]  ;;  %v1773_v41 = vld [vmem:[#allocation2 + $0x2a0] sm:$0xff] }
 0x6bb   : > { %2067 = vmatpush.msra.mxu0 %v1796_v42  ;;  %2087 = vmatpush.msra.mxu1 %v1924_v43  ;;  %v1901_v42 = vld [vmem:[#allocation2 + $0x6a0] sm:$0xff]  ;;  %v1774_v43 = vld [vmem:[#allocation2 + $0x2a8] sm:$0xff] }
 0x6bd   : > { %2068 = vmatpush.msra.mxu0 %v1788_v60  ;;  %2088 = vmatpush.msra.mxu1 %v1916_v45  ;;  %v1902_v60 = vld [vmem:[#allocation2 + $0x6a8] sm:$0xff]  ;;  %v1765_v45 = vld [vmem:[#allocation2 + $0x260] sm:$0xff] }
 0x6bf   : > { %2069 = vmatpush.msra.mxu0 %v1780_v53  ;;  %2089 = vmatpush.msra.mxu1 %v1908_v61  ;;  %v1893_v53 = vld [vmem:[#allocation2 + $0x660] sm:$0xff]  ;;  %v1766_v61 = vld [vmem:[#allocation2 + $0x268] sm:$0xff] }
 0x6c1   : > { %2070 = vmatpush.msra.mxu0 %v1772_v6  ;;  %2090 = vmatpush.msra.mxu1 %v1900_v13  ;;  %v1894_v6 = vld [vmem:[#allocation2 + $0x668] sm:$0xff]  ;;  %v1757_v13 = vld [vmem:[#allocation2 + $0x220] sm:$0xff] }
 0x6c3   : > { %2071 = vmatpush.msra.mxu0 %v1764_v16  ;;  %2091 = vmatpush.msra.mxu1 %v1892_v20  ;;  %v1885_v16 = vld [vmem:[#allocation2 + $0x620] sm:$0xff]  ;;  %v1758_v20 = vld [vmem:[#allocation2 + $0x228] sm:$0xff] }
 0x6c5   : > { %2072 = vmatpush.msra.mxu0 %v1756_v21  ;;  %2092 = vmatpush.msra.mxu1 %v1884_v47  ;;  %v1886_v21 = vld [vmem:[#allocation2 + $0x628] sm:$0xff]  ;;  %v1749_v47 = vld [vmem:[#allocation2 + $0x1e0] sm:$0xff] }
 0x6c7   : > { %2073 = vmatpush.msra.mxu0 %v1748_v48  ;;  %2093 = vmatpush.msra.mxu1 %v1876_v49  ;;  %v1877_v48 = vld [vmem:[#allocation2 + $0x5e0] sm:$0xff]  ;;  %v1750_v49 = vld [vmem:[#allocation2 + $0x1e8] sm:$0xff] }
 0x6c9   : > { %2074 = vmatpush.msra.mxu0 %v1740_v40  ;;  %2094 = vmatpush.msra.mxu1 %v1868_v0  ;;  %v1878_v40 = vld [vmem:[#allocation2 + $0x5e8] sm:$0xff]  ;;  %v1741_v0 = vld [vmem:[#allocation2 + $0x1a0] sm:$0xff] }
 0x6cb   : > { %2075 = vmatpush.msra.mxu0 %v1732_v44  ;;  %2095 = vmatpush.msra.mxu1 %v1860_v14  ;;  %v1869_v44 = vld [vmem:[#allocation2 + $0x5a0] sm:$0xff]  ;;  %v1742_v14 = vld [vmem:[#allocation2 + $0x1a8] sm:$0xff] }
 0x6cd   : > { %2076 = vmatpush.msra.mxu0 %v1724_v55  ;;  %2096 = vmatpush.msra.mxu1 %v1852_v2  ;;  %v1870_v55 = vld [vmem:[#allocation2 + $0x5a8] sm:$0xff]  ;;  %v1733_v2 = vld [vmem:[#allocation2 + $0x160] sm:$0xff] }
 0x6cf   : > { %2077 = vmatpush.msra.mxu0 %v1716_v59  ;;  %2097 = vmatpush.msra.mxu1 %v1844_v62  ;;  %v1861_v59 = vld [vmem:[#allocation2 + $0x560] sm:$0xff]  ;;  %v1734_v62 = vld [vmem:[#allocation2 + $0x168] sm:$0xff] }
 0x6d1   : > { %2078 = vmatpush.msra.mxu0 %v1708_v33  ;;  %2098 = vmatpush.msra.mxu1 %v1836_v18  ;;  %v1853_v33 = vld [vmem:[#allocation2 + $0x520] sm:$0xff]  ;;  %v1726_v18 = vld [vmem:[#allocation2 + $0x128] sm:$0xff] }
 0x6d3   : > { %2079 = vmatpush.msra.mxu0 %v1700_v5  ;;  %2099 = vmatpush.msra.mxu1 %v1828_v7  ;;  %v1845_v5 = vld [vmem:[#allocation2 + $0x4e0] sm:$0xff]  ;;  %v1718_v7 = vld [vmem:[#allocation2 + $0xe8] sm:$0xff] }
 0x6d5   : > { %2080 = vmatpush.msra.mxu0 %v1692_v54  ;;  %2100 = vmatpush.msra.mxu1 %v1820_v56  ;;  %v1837_v54 = vld [vmem:[#allocation2 + $0x4a0] sm:$0xff]  ;;  %v1710_v56 = vld [vmem:[#allocation2 + $0xa8] sm:$0xff] }
 0x713   : > { %v1612_v22 = vpop.f32.mrf.mxu0  ;;  %v1632_v23 = vpop.f32.mrf.mxu1 }
 0x714   : > { %v1657_v24 = vadd.f32 %v1656_v12, %v1612_v22  ;;  %v1677_v26 = vadd.f32 %v1676_v19, %v1632_v23  ;;  %v1838_v12 = vld [vmem:[#allocation2 + $0x4a8] sm:$0xff]  ;;  %v1701_v19 = vld [vmem:[#allocation2 + $0x60] sm:$0xff] }
 0x715   : > { %v1829_v22 = vld [vmem:[#allocation2 + $0x460] sm:$0xff]  ;;  %v1702_v23 = vld [vmem:[#allocation2 + $0x68] sm:$0xff] }
 0x716   : > { %v3734_v51 = vadd.f32 %v1683_v46, %v1657_v24  ;;  %v3736_v27 = vadd.f32 %v1683_v46, %v1677_v26  ;;  %v1830_v24 = vld [vmem:[#allocation2 + $0x468] sm:$0xff]  ;;  %v1693_v26 = vld [vmem:[#allocation2 + $0x20] sm:$0xff] }
 0x717   : > { %v1821_v46 = vld [vmem:[#allocation2 + $0x420] sm:$0xff] }
 0x718   : > { %1687 = vst [vmem:[%s694_s0] sm:$0xff] %v3734_v51  ;;  %1961 = vmatmul.f32.vlgmr.msrb.gmra.mxu2 %v3734_v51  ;;  %1981 = vmatmul.f32.vlgmr.msrb.gmra.mxu3 %v3736_v27 }
 0x719   : > { %1688 = vst [vmem:[%s694_s0 + $0x8] sm:$0xff] %v3736_v27  ;;  %2001 = vmatmul.f32.vlgmr.msrb.gmra.mxu0 %v3734_v51  ;;  %2021 = vmatmul.f32.vlgmr.msrb.gmra.mxu1 %v3736_v27  ;;  %s699_s0 = scalar_lea.vmem %s4301_s20, %s3029_s4 }
 0x71a   : > { %2105 = vmatpush.msrb.mxu2 %v1813_v28  ;;  %2125 = vmatpush.msrb.mxu3 %v1941_v29  ;;  %v1694_v28 = vld [vmem:[#allocation2 + $0x28] sm:$0xff] }
 0x71b   : > { %2145 = vmatpush.msrb.mxu0 %v1814_v63  ;;  %2165 = vmatpush.msrb.mxu1 %v1942_v50  ;;  %v1822_v29 = vld [vmem:[#allocation2 + $0x428] sm:$0xff]  ;;  %v1815_v63 = vld [vmem:[#allocation2 + $0x3f0] sm:$0xff] }
 0x71c   : > { %2106 = vmatpush.msrb.mxu2 %v1805_v30  ;;  %2126 = vmatpush.msrb.mxu3 %v1933_v31  ;;  %v1943_v50 = vld [vmem:[#allocation2 + $0x7f0] sm:$0xff]  ;;  %v1816_v30 = vld [vmem:[#allocation2 + $0x3f8] sm:$0xff] }
 0x71d   : > { %2146 = vmatpush.msrb.mxu0 %v1806_v34  ;;  %2166 = vmatpush.msrb.mxu1 %v1934_v35  ;;  %v1944_v31 = vld [vmem:[#allocation2 + $0x7f8] sm:$0xff]  ;;  %v1807_v34 = vld [vmem:[#allocation2 + $0x3b0] sm:$0xff] }
 0x71e   : > { %2107 = vmatpush.msrb.mxu2 %v1797_v36  ;;  %2127 = vmatpush.msrb.mxu3 %v1925_v37  ;;  %v1935_v35 = vld [vmem:[#allocation2 + $0x7b0] sm:$0xff]  ;;  %v1808_v36 = vld [vmem:[#allocation2 + $0x3b8] sm:$0xff] }
 0x71f   : > { %2147 = vmatpush.msrb.mxu0 %v1798_v57  ;;  %2167 = vmatpush.msrb.mxu1 %v1926_v15  ;;  %v1936_v37 = vld [vmem:[#allocation2 + $0x7b8] sm:$0xff]  ;;  %v1799_v57 = vld [vmem:[#allocation2 + $0x370] sm:$0xff] }
 0x720   : > { %2108 = vmatpush.msrb.mxu2 %v1789_v1  ;;  %2128 = vmatpush.msrb.mxu3 %v1917_v3  ;;  %v1927_v15 = vld [vmem:[#allocation2 + $0x770] sm:$0xff]  ;;  %v1800_v1 = vld [vmem:[#allocation2 + $0x378] sm:$0xff] }
 0x721   : > { %2148 = vmatpush.msrb.mxu0 %v1790_v38  ;;  %2168 = vmatpush.msrb.mxu1 %v1918_v10  ;;  %v1928_v3 = vld [vmem:[#allocation2 + $0x778] sm:$0xff]  ;;  %v1791_v38 = vld [vmem:[#allocation2 + $0x330] sm:$0xff] }
 0x722   : > { %2041 = vmatmul.f32.vlgmr.msra.gmra.mxu2 %v3734_v51  ;;  %2061 = vmatmul.f32.vlgmr.msra.gmra.mxu3 %v3736_v27  ;;  %v1919_v10 = vld [vmem:[#allocation2 + $0x730] sm:$0xff] }
 0x723   : > { %2081 = vmatmul.f32.vlgmr.msra.gmra.mxu0 %v3734_v51  ;;  %2101 = vmatmul.f32.vlgmr.msra.gmra.mxu1 %v3736_v27 }
 0x724   : > { %2109 = vmatpush.msrb.mxu2 %v1781_v11  ;;  %2129 = vmatpush.msrb.mxu3 %v1909_v39  ;;  %v1792_v11 = vld [vmem:[#allocation2 + $0x338] sm:$0xff] }
 0x725   : > { %2149 = vmatpush.msrb.mxu0 %v1782_v58  ;;  %2169 = vmatpush.msrb.mxu1 %v1910_v25  ;;  %v1920_v39 = vld [vmem:[#allocation2 + $0x738] sm:$0xff]  ;;  %v1783_v58 = vld [vmem:[#allocation2 + $0x2f0] sm:$0xff] }
 0x726   : > { %2110 = vmatpush.msrb.mxu2 %v1773_v41  ;;  %2130 = vmatpush.msrb.mxu3 %v1901_v42  ;;  %v1911_v25 = vld [vmem:[#allocation2 + $0x6f0] sm:$0xff]  ;;  %v1784_v41 = vld [vmem:[#allocation2 + $0x2f8] sm:$0xff] }
 0x727   : > { %2150 = vmatpush.msrb.mxu0 %v1774_v43  ;;  %2170 = vmatpush.msrb.mxu1 %v1902_v60  ;;  %v1912_v42 = vld [vmem:[#allocation2 + $0x6f8] sm:$0xff]  ;;  %v1775_v43 = vld [vmem:[#allocation2 + $0x2b0] sm:$0xff] }
 0x728   : > { %2111 = vmatpush.msrb.mxu2 %v1765_v45  ;;  %2131 = vmatpush.msrb.mxu3 %v1893_v53  ;;  %v1903_v60 = vld [vmem:[#allocation2 + $0x6b0] sm:$0xff]  ;;  %v1776_v45 = vld [vmem:[#allocation2 + $0x2b8] sm:$0xff] }
 0x729   : > { %2151 = vmatpush.msrb.mxu0 %v1766_v61  ;;  %2171 = vmatpush.msrb.mxu1 %v1894_v6  ;;  %v1904_v53 = vld [vmem:[#allocation2 + $0x6b8] sm:$0xff]  ;;  %v1767_v61 = vld [vmem:[#allocation2 + $0x270] sm:$0xff] }
 0x72a   : > { %2112 = vmatpush.msrb.mxu2 %v1757_v13  ;;  %2132 = vmatpush.msrb.mxu3 %v1885_v16  ;;  %v1895_v6 = vld [vmem:[#allocation2 + $0x670] sm:$0xff]  ;;  %v1768_v13 = vld [vmem:[#allocation2 + $0x278] sm:$0xff] }
 0x72b   : > { %2152 = vmatpush.msrb.mxu0 %v1758_v20  ;;  %2172 = vmatpush.msrb.mxu1 %v1886_v21  ;;  %v1896_v16 = vld [vmem:[#allocation2 + $0x678] sm:$0xff]  ;;  %v1759_v20 = vld [vmem:[#allocation2 + $0x230] sm:$0xff] }
 0x72c   : > { %2113 = vmatpush.msrb.mxu2 %v1749_v47  ;;  %2133 = vmatpush.msrb.mxu3 %v1877_v48  ;;  %v1887_v21 = vld [vmem:[#allocation2 + $0x630] sm:$0xff]  ;;  %v1760_v47 = vld [vmem:[#allocation2 + $0x238] sm:$0xff] }
 0x72d   : > { %2153 = vmatpush.msrb.mxu0 %v1750_v49  ;;  %2173 = vmatpush.msrb.mxu1 %v1878_v40  ;;  %v1888_v48 = vld [vmem:[#allocation2 + $0x638] sm:$0xff]  ;;  %v1751_v49 = vld [vmem:[#allocation2 + $0x1f0] sm:$0xff] }
 0x72e   : > { %2114 = vmatpush.msrb.mxu2 %v1741_v0  ;;  %2134 = vmatpush.msrb.mxu3 %v1869_v44  ;;  %v1879_v40 = vld [vmem:[#allocation2 + $0x5f0] sm:$0xff]  ;;  %v1752_v0 = vld [vmem:[#allocation2 + $0x1f8] sm:$0xff] }
 0x72f   : > { %2154 = vmatpush.msrb.mxu0 %v1742_v14  ;;  %2174 = vmatpush.msrb.mxu1 %v1870_v55  ;;  %v1880_v44 = vld [vmem:[#allocation2 + $0x5f8] sm:$0xff]  ;;  %v1743_v14 = vld [vmem:[#allocation2 + $0x1b0] sm:$0xff] }
 0x730   : > { %2115 = vmatpush.msrb.mxu2 %v1733_v2  ;;  %2135 = vmatpush.msrb.mxu3 %v1861_v59  ;;  %v1871_v55 = vld [vmem:[#allocation2 + $0x5b0] sm:$0xff]  ;;  %v1744_v2 = vld [vmem:[#allocation2 + $0x1b8] sm:$0xff] }
 0x731   : > { %2155 = vmatpush.msrb.mxu0 %v1734_v62  ;;  %2175 = vmatpush.msrb.mxu1 %v1862_v17  ;;  %v1872_v59 = vld [vmem:[#allocation2 + $0x5b8] sm:$0xff]  ;;  %v1735_v62 = vld [vmem:[#allocation2 + $0x170] sm:$0xff] }
 0x732   : > { %2116 = vmatpush.msrb.mxu2 %v1725_v32  ;;  %2136 = vmatpush.msrb.mxu3 %v1853_v33  ;;  %v1863_v17 = vld [vmem:[#allocation2 + $0x570] sm:$0xff]  ;;  %v1736_v32 = vld [vmem:[#allocation2 + $0x178] sm:$0xff] }
 0x733   : > { %2156 = vmatpush.msrb.mxu0 %v1726_v18  ;;  %2176 = vmatpush.msrb.mxu1 %v1854_v52  ;;  %v1864_v33 = vld [vmem:[#allocation2 + $0x578] sm:$0xff]  ;;  %v1727_v18 = vld [vmem:[#allocation2 + $0x130] sm:$0xff] }
 0x734   : > { %2117 = vmatpush.msrb.mxu2 %v1717_v4  ;;  %2137 = vmatpush.msrb.mxu3 %v1845_v5  ;;  %v1855_v52 = vld [vmem:[#allocation2 + $0x530] sm:$0xff]  ;;  %v1728_v4 = vld [vmem:[#allocation2 + $0x138] sm:$0xff] }
 0x735   : > { %2157 = vmatpush.msrb.mxu0 %v1718_v7  ;;  %2177 = vmatpush.msrb.mxu1 %v1846_v8  ;;  %v1856_v5 = vld [vmem:[#allocation2 + $0x538] sm:$0xff]  ;;  %v1719_v7 = vld [vmem:[#allocation2 + $0xf0] sm:$0xff] }
 0x736   : > { %2118 = vmatpush.msrb.mxu2 %v1709_v9  ;;  %2138 = vmatpush.msrb.mxu3 %v1837_v54  ;;  %v1847_v8 = vld [vmem:[#allocation2 + $0x4f0] sm:$0xff]  ;;  %v1720_v9 = vld [vmem:[#allocation2 + $0xf8] sm:$0xff] }
 0x737   : > { %2158 = vmatpush.msrb.mxu0 %v1710_v56  ;;  %2178 = vmatpush.msrb.mxu1 %v1838_v12  ;;  %v1848_v54 = vld [vmem:[#allocation2 + $0x4f8] sm:$0xff]  ;;  %v1711_v56 = vld [vmem:[#allocation2 + $0xb0] sm:$0xff] }
 0x738   : > { %2119 = vmatpush.msrb.mxu2 %v1701_v19  ;;  %2139 = vmatpush.msrb.mxu3 %v1829_v22  ;;  %v1839_v12 = vld [vmem:[#allocation2 + $0x4b0] sm:$0xff]  ;;  %v1712_v19 = vld [vmem:[#allocation2 + $0xb8] sm:$0xff] }
 0x739   : > { %2159 = vmatpush.msrb.mxu0 %v1702_v23  ;;  %2179 = vmatpush.msrb.mxu1 %v1830_v24  ;;  %v1840_v22 = vld [vmem:[#allocation2 + $0x4b8] sm:$0xff]  ;;  %v1703_v23 = vld [vmem:[#allocation2 + $0x70] sm:$0xff] }
 0x73a   : > { %2120 = vmatpush.msrb.mxu2 %v1693_v26  ;;  %2140 = vmatpush.msrb.mxu3 %v1821_v46  ;;  %v1831_v24 = vld [vmem:[#allocation2 + $0x470] sm:$0xff]  ;;  %v1704_v26 = vld [vmem:[#allocation2 + $0x78] sm:$0xff] }
 0x73b   : > { %2160 = vmatpush.msrb.mxu0 %v1694_v28  ;;  %2180 = vmatpush.msrb.mxu1 %v1822_v29  ;;  %v1832_v46 = vld [vmem:[#allocation2 + $0x478] sm:$0xff]  ;;  %v1695_v28 = vld [vmem:[#allocation2 + $0x30] sm:$0xff] }
 0x73c   : > { %2121 = vmatmul.f32.vlgmr.msrb.gmra.mxu2 %v3734_v51  ;;  %2141 = vmatmul.f32.vlgmr.msrb.gmra.mxu3 %v3736_v27  ;;  %v1823_v29 = vld [vmem:[#allocation2 + $0x430] sm:$0xff] }
 0x73d   : > { %2161 = vmatmul.f32.vlgmr.msrb.gmra.mxu0 %v3734_v51  ;;  %2181 = vmatmul.f32.vlgmr.msrb.gmra.mxu1 %v3736_v27 }
 0x73e   : > { %2185 = vmatpush.msra.mxu2 %v1815_v63  ;;  %2205 = vmatpush.msra.mxu3 %v1943_v50  ;;  %v1696_v63 = vld [vmem:[#allocation2 + $0x38] sm:$0xff] }
 0x73f   : > { %2225 = vmatpush.msra.mxu0 %v1816_v30  ;;  %2245 = vmatpush.msra.mxu1 %v1944_v31  ;;  %v1824_v50 = vld [vmem:[#allocation2 + $0x438] sm:$0xff] }
 0x740   : > { %2186 = vmatpush.msra.mxu2 %v1807_v34  ;;  %2206 = vmatpush.msra.mxu3 %v1935_v35 }
 0x741   : > { %2226 = vmatpush.msra.mxu0 %v1808_v36  ;;  %2246 = vmatpush.msra.mxu1 %v1936_v37 }
 0x742   : > { %2187 = vmatpush.msra.mxu2 %v1799_v57  ;;  %2207 = vmatpush.msra.mxu3 %v1927_v15 }
 0x743   : > { %2227 = vmatpush.msra.mxu0 %v1800_v1  ;;  %2247 = vmatpush.msra.mxu1 %v1928_v3 }
 0x744   : > { %2188 = vmatpush.msra.mxu2 %v1791_v38  ;;  %2208 = vmatpush.msra.mxu3 %v1919_v10 }
 0x745   : > { %2228 = vmatpush.msra.mxu0 %v1792_v11  ;;  %2248 = vmatpush.msra.mxu1 %v1920_v39 }
 0x746   : > { %2189 = vmatpush.msra.mxu2 %v1783_v58  ;;  %2209 = vmatpush.msra.mxu3 %v1911_v25 }
 0x747   : > { %2229 = vmatpush.msra.mxu0 %v1784_v41  ;;  %2249 = vmatpush.msra.mxu1 %v1912_v42 }
 0x748   : > { %2190 = vmatpush.msra.mxu2 %v1775_v43  ;;  %2210 = vmatpush.msra.mxu3 %v1903_v60 }
 0x749   : > { %2230 = vmatpush.msra.mxu0 %v1776_v45  ;;  %2250 = vmatpush.msra.mxu1 %v1904_v53 }
 0x74a   : > { %2191 = vmatpush.msra.mxu2 %v1767_v61  ;;  %2211 = vmatpush.msra.mxu3 %v1895_v6 }
 0x74b   : > { %2231 = vmatpush.msra.mxu0 %v1768_v13  ;;  %2251 = vmatpush.msra.mxu1 %v1896_v16  ;;  %v3076_v16 = vld [vmem:[%s4299_s18 + $0x48] ss:$0 sm:$0xff] }
 0x74c   : > { %2192 = vmatpush.msra.mxu2 %v1759_v20  ;;  %2212 = vmatpush.msra.mxu3 %v1887_v21  ;;  %v3077_v20 = vld [vmem:[%s4299_s18 + $0x40] ss:$0 sm:$0xff] }
 0x74d   : > { %2232 = vmatpush.msra.mxu0 %v1760_v47  ;;  %2252 = vmatpush.msra.mxu1 %v1888_v48 }
 0x74e   : > { %2193 = vmatpush.msra.mxu2 %v1751_v49  ;;  %2213 = vmatpush.msra.mxu3 %v1879_v40 }
 0x74f   : > { %2233 = vmatpush.msra.mxu0 %v1752_v0  ;;  %2253 = vmatpush.msra.mxu1 %v1880_v44 }
 0x750   : > { %2194 = vmatpush.msra.mxu2 %v1743_v14  ;;  %2214 = vmatpush.msra.mxu3 %v1871_v55  ;;  %v3893_v14 = vld [vmem:[%s4299_s18] sm:$0xff]  ;;  %v3898_v55 = vld [vmem:[%s4299_s18 + $0x8] sm:$0xff] }
 0x751   : > { %2234 = vmatpush.msra.mxu0 %v1744_v2  ;;  %2254 = vmatpush.msra.mxu1 %v1872_v59  ;;  %v2606_v2 = vperm.slane %v3898_v55, 7  ;;  %v2605_v59 = vperm.slane %v3893_v14, 7 }
 0x752   : > { %2195 = vmatpush.msra.mxu2 %v1735_v62  ;;  %2215 = vmatpush.msra.mxu3 %v1863_v17 }
 0x753   : > { %2235 = vmatpush.msra.mxu0 %v1736_v32  ;;  %2255 = vmatpush.msra.mxu1 %v1864_v33 }
 0x754   : > { %2196 = vmatpush.msra.mxu2 %v1727_v18  ;;  %2216 = vmatpush.msra.mxu3 %v1855_v52 }
 0x755   : > { %2236 = vmatpush.msra.mxu0 %v1728_v4  ;;  %2256 = vmatpush.msra.mxu1 %v1856_v5 }
 0x756   : > { %2197 = vmatpush.msra.mxu2 %v1719_v7  ;;  %2217 = vmatpush.msra.mxu3 %v1847_v8 }
 0x757   : > { %2237 = vmatpush.msra.mxu0 %v1720_v9  ;;  %2257 = vmatpush.msra.mxu1 %v1848_v54  ;;  %v2556_v9 = vperm.slane %v3898_v55, 6  ;;  %v2555_v54 = vperm.slane %v3893_v14, 6 }
 0x758   : > { %2198 = vmatpush.msra.mxu2 %v1711_v56  ;;  %2218 = vmatpush.msra.mxu3 %v1839_v12 }
 0x759   : > { %2238 = vmatpush.msra.mxu0 %v1712_v19  ;;  %2258 = vmatpush.msra.mxu1 %v1840_v22 }
 0x75a   : > { %2199 = vmatpush.msra.mxu2 %v1703_v23  ;;  %2219 = vmatpush.msra.mxu3 %v1831_v24 }
 0x75b   : > { %2239 = vmatpush.msra.mxu0 %v1704_v26  ;;  %2259 = vmatpush.msra.mxu1 %v1832_v46  ;;  %v2506_v46 = vperm.slane %v3898_v55, 5 }
 0x75c   : > { %2200 = vmatpush.msra.mxu2 %v1695_v28  ;;  %2220 = vmatpush.msra.mxu3 %v1823_v29  ;;  %v2505_v28 = vperm.slane %v3893_v14, 5 }
 0x75d   : > { %2240 = vmatpush.msra.mxu0 %v1696_v63  ;;  %2260 = vmatpush.msra.mxu1 %v1824_v50 }
 0x75e   : > { %2201 = vmatmul.f32.vlgmr.msra.gmra.mxu2 %v3734_v51  ;;  %2221 = vmatmul.f32.vlgmr.msra.gmra.mxu3 %v3736_v27 }
 0x75f   : > { %2241 = vmatmul.f32.vlgmr.msra.gmra.mxu0 %v3734_v51  ;;  %2261 = vmatmul.f32.vlgmr.msra.gmra.mxu1 %v3736_v27 }
 0x796   : > { %v2002_v30 = vpop.f32.mrf.mxu0  ;;  %v2022_v31 = vpop.f32.mrf.mxu1 }
 0x797   : > { %v3756_v34 = vadd.f32 %v2022_v31, %v2002_v30 }
 0x799   : > { %2378 = vrot.lane.b32.xlu0 %v3756_v34, %s3176_s28  ;;  %2428 = vrot.lane.b32.xlu2 %v3756_v34, %s4325_s23 }
 0x79a   : > { %2623 = vrot.lane.b32.xlu1 %v3756_v34, %s3177_s27 }
 0x79b   : > { %v1962_v35 = vpop.f32.mrf.mxu2  ;;  %v1982_v36 = vpop.f32.mrf.mxu3 }
 0x79c   : > { %v3764_v51 = vadd.f32 %v1982_v36, %v1962_v35 }
 0x7a0   : > { %v2082_v27 = vpop.f32.mrf.mxu0  ;;  %v2102_v37 = vpop.f32.mrf.mxu1 }
 0x7a1   : > { %2376 = vrot.lane.b32.xlu2 %v3764_v51, %s3176_s28  ;;  %2621 = vrot.lane.b32.xlu0 %v3764_v51, %s3177_s27  ;;  %v3772_v57 = vadd.f32 %v2102_v37, %v2082_v27 }
 0x7a2   : > { %2573 = vrot.lane.b32.xlu1 %v3756_v34, %s4313_s25 }
 0x7a5   : > { %v2042_v15 = vpop.f32.mrf.mxu2  ;;  %v2062_v1 = vpop.f32.mrf.mxu3 }
 0x7a6   : > { %v3786_v3 = vadd.f32 %v2062_v1, %v2042_v15 }
 0x7a9   : > { %2577 = vrot.lane.b32.xlu2 %v3772_v57, %s4313_s25  ;;  %2571 = vrot.lane.b32.xlu0 %v3764_v51, %s4313_s25 }
 0x7aa   : > { %2523 = vrot.lane.b32.xlu1 %v3756_v34, %s3179_s26 }
 0x7b1   : > { %2333 = vrot.lane.b32.xlu2 %v3772_v57, %s3180_s21  ;;  %2521 = vrot.lane.b32.xlu0 %v3764_v51, %s3179_s26 }
 0x7b2   : > { %2474 = vrot.lane.b32.xlu1 %v3756_v34, %s4328_s29 }
 0x7b9   : > { %2625 = vrot.lane.b32.xlu2 %v3786_v3, %s3177_s27  ;;  %2472 = vrot.lane.b32.xlu0 %v3764_v51, %s4328_s29 }
 0x7ba   : > { %2329 = vrot.lane.b32.xlu1 %v3756_v34, %s3180_s21  ;;  %v2162_v38 = vpop.f32.mrf.mxu0  ;;  %v2182_v10 = vpop.f32.mrf.mxu1 }
 0x7bb   : > { %v3824_v11 = vadd.f32 %v2182_v10, %v2162_v38  ;;  %v2408_v38 = vperm.slane %v3898_v55, 2 }
 0x7bf   : > { %v2122_v58 = vpop.f32.mrf.mxu2  ;;  %v2142_v25 = vpop.f32.mrf.mxu3 }
 0x7c0   : > { %v3840_v41 = vadd.f32 %v2142_v25, %v2122_v58 }
 0x7c1   : > { %2575 = vrot.lane.b32.xlu2 %v3786_v3, %s4313_s25  ;;  %2327 = vrot.lane.b32.xlu0 %v3764_v51, %s3180_s21 }
 0x7c2   : > { %2279 = vrot.lane.b32.xlu1 %v3756_v34, %s3181_s22 }
 0x7c9   : > { %2525 = vrot.lane.b32.xlu2 %v3786_v3, %s3179_s26  ;;  %2277 = vrot.lane.b32.xlu0 %v3764_v51, %s3181_s22 }
 0x7ca   : > { %2426 = vrot.lane.b32.xlu1 %v3764_v51, %s4325_s23 }
 0x7d1   : > { %2476 = vrot.lane.b32.xlu2 %v3786_v3, %s4328_s29  ;;  %2627 = vrot.lane.b32.xlu0 %v3772_v57, %s3177_s27 }
 0x7d2   : > { %2478 = vrot.lane.b32.xlu1 %v3772_v57, %s4328_s29 }
 0x7d9   : > { %2430 = vrot.lane.b32.xlu2 %v3786_v3, %s4325_s23  ;;  %2527 = vrot.lane.b32.xlu0 %v3772_v57, %s3179_s26 }
 0x7da   : > { %2283 = vrot.lane.b32.xlu1 %v3772_v57, %s3181_s22 }
 0x7dc   : > { %v2242_v60 = vpop.f32.mrf.mxu0  ;;  %v2262_v45 = vpop.f32.mrf.mxu1 }
 0x7dd   : > { %v3858_v53 = vadd.f32 %v2262_v45, %v2242_v60  ;;  %v2358_v60 = vperm.slane %v3898_v55, 1 }
 0x7e1   : > { %2380 = vrot.lane.b32.xlu2 %v3786_v3, %s3176_s28  ;;  %2432 = vrot.lane.b32.xlu0 %v3772_v57, %s4325_s23  ;;  %v2202_v62 = vpop.f32.mrf.mxu2  ;;  %v2222_v33 = vpop.f32.mrf.mxu3 }
 0x7e2   : > { %2331 = vrot.lane.b32.xlu1 %v3786_v3, %s3180_s21  ;;  %v3916_v8 = vadd.f32 %v2222_v33, %v2202_v62 }
 0x7e9   : > { %2581 = vrot.lane.b32.xlu2 %v3824_v11, %s4313_s25  ;;  %2382 = vrot.lane.b32.xlu0 %v3772_v57, %s3176_s28 }
 0x7ea   : > { %2631 = vrot.lane.b32.xlu1 %v3824_v11, %s3177_s27 }
 0x7f1   : > { %2482 = vrot.lane.b32.xlu2 %v3824_v11, %s4328_s29  ;;  %2281 = vrot.lane.b32.xlu0 %v3786_v3, %s3181_s22 }
 0x7f2   : > { %2386 = vrot.lane.b32.xlu1 %v3824_v11, %s3176_s28 }
 0x7f3   : > { %v3838_v39 = vpop.permute.xlu2 %2428 }
 0x7f9   : > { %2436 = vrot.lane.b32.xlu2 %v3824_v11, %s4325_s23  ;;  %2531 = vrot.lane.b32.xlu0 %v3824_v11, %s3179_s26 }
 0x7fa   : > { %2629 = vrot.lane.b32.xlu1 %v3840_v41, %s3177_s27 }
 0x7fb   : > { %v3848_v42 = vpop.permute.xlu2 %2376 }
 0x801   : > { %2480 = vrot.lane.b32.xlu2 %v3840_v41, %s4328_s29  ;;  %2579 = vrot.lane.b32.xlu0 %v3840_v41, %s4313_s25 }
 0x802   : > { %2529 = vrot.lane.b32.xlu1 %v3840_v41, %s3179_s26 }
 0x803   : > { %v3856_v43 = vpop.permute.xlu2 %2577 }
 0x809   : > { %2324 = vrot.lane.b32.xlu2 %v3858_v53, %s3180_s21  ;;  %2384 = vrot.lane.b32.xlu0 %v3840_v41, %s3176_s28 }
 0x80a   : > { %2434 = vrot.lane.b32.xlu1 %v3840_v41, %s4325_s23 }
 0x80b   : > { %v3866_v61 = vpop.permute.xlu0 %2378  ;;  %v3868_v6 = vpop.permute.xlu2 %2333 }
 0x80c   : > { %v2624_v13 = vpop.permute.xlu1 %2623  ;;  %v2391_v58 = vsel %vm2390_vm6, %v3848_v42, %v3866_v61 }
 0x811   : > { %2267 = vrot.lane.b32.xlu2 %v3858_v53, %s3181_s22  ;;  %2423 = vrot.lane.b32.xlu0 %v3858_v53, %s4325_s23 }
 0x812   : > { %2373 = vrot.lane.b32.xlu1 %v3858_v53, %s3176_s28 }
 0x813   : > { %v3882_v21 = vpop.permute.xlu2 %2625  ;;  %v3884_v47 = vpop.permute.xlu0 %2621 }
 0x814   : > { %v2574_v48 = vpop.permute.xlu1 %2573  ;;  %v2639_v49 = vsel %vm2637_vm1, %v2624_v13, %v3882_v21  ;;  %v2638_v40 = vsel %vm2637_vm1, %v3884_v47, %v2624_v13 }
 0x815   : > { %v2664_v0 = vmul.f32 %v3076_v16, %v2639_v49  ;;  %v2663_v44 = vmul.f32 %v3077_v20, %v2638_v40  ;;  %v2671_v16 = vld [vmem:[%s4297_s16] sm:$0xff]  ;;  %v2416_v20 = vmul.f32 %v2408_v38, %v2391_v58  ;;  %v2309_v49 = vperm.slane %v3898_v55, 0 }
 0x817   : > { %2687 = vmatpush.msrb.mxu2 %v2663_v44  ;;  %2707 = vmatpush.msrb.mxu3 %v2664_v0  ;;  %v3078_v0 = vld [vmem:[%s4299_s18 + $0x50] ss:$0 sm:$0xff] }
 0x819   : > { %2486 = vrot.lane.b32.xlu2 %v3858_v53, %s4328_s29  ;;  %2535 = vrot.lane.b32.xlu0 %v3858_v53, %s3179_s26 }
 0x81a   : > { %2635 = vrot.lane.b32.xlu1 %v3858_v53, %s3177_s27 }
 0x81b   : > { %v3908_v17 = vpop.permute.xlu2 %2575  ;;  %v3910_v32 = vpop.permute.xlu0 %2571 }
 0x81c   : > { %v2524_v18 = vpop.permute.xlu1 %2523  ;;  %v2589_v52 = vsel %vm2587_vm2, %v2574_v48, %v3908_v17  ;;  %v2588_v4 = vsel %vm2587_vm2, %v3910_v32, %v2574_v48  ;;  %v710_v48 = vld [vmem:[%s4299_s18 + $0x10] sm:$0xff] }
 0x81d   : > { %v2614_v5 = vmul.f32 %v2606_v2, %v2589_v52  ;;  %v2613_v7 = vmul.f32 %v2605_v59, %v2588_v4  ;;  %v2607_v2 = vperm.slane %v710_v48, 7  ;;  %v4017_v4 = vld [vmem:[%s4296_s15] sm:$0xff] }
 0x81f   : > { %2688 = vmatpush.msrb.mxu2 %v2613_v7  ;;  %2708 = vmatpush.msrb.mxu3 %v2614_v5 }
 0x821   : > { %2633 = vrot.lane.b32.xlu2 %v3916_v8, %s3177_s27  ;;  %2337 = vrot.lane.b32.xlu0 %v3824_v11, %s3180_s21 }
 0x822   : > { %2585 = vrot.lane.b32.xlu1 %v3858_v53, %s4329_s24 }
 0x823   : > { %v3926_v56 = vpop.permute.xlu2 %2525  ;;  %v3928_v12 = vpop.permute.xlu0 %2521 }
 0x824   : > { %v2475_v19 = vpop.permute.xlu1 %2474  ;;  %v2539_v22 = vsel %vm2537_vm5, %v2524_v18, %v3926_v56  ;;  %v2538_v23 = vsel %vm2537_vm5, %v3928_v12, %v2524_v18 }
 0x825   : > { %v2564_v24 = vmul.f32 %v2556_v9, %v2539_v22  ;;  %v2563_v26 = vmul.f32 %v2555_v54, %v2538_v23  ;;  %v2507_v9 = vperm.slane %v710_v48, 5 }
 0x827   : > { %2689 = vmatpush.msrb.mxu2 %v2563_v26  ;;  %2709 = vmatpush.msrb.mxu3 %v2564_v24  ;;  %v2458_v26 = vperm.slane %v710_v48, 3 }
 0x829   : > { %2335 = vrot.lane.b32.xlu2 %v3840_v41, %s3180_s21  ;;  %2583 = vrot.lane.b32.xlu0 %v3916_v8, %s4329_s24 }
 0x82a   : > { %2533 = vrot.lane.b32.xlu1 %v3916_v8, %s3179_s26 }
 0x82b   : > { %v3942_v29 = vpop.permute.xlu2 %2476  ;;  %v3944_v63 = vpop.permute.xlu0 %2472 }
 0x82c   : > { %v3946_v50 = vpop.permute.xlu1 %2329  ;;  %v2489_v30 = vsel %vm1150_vm3, %v2475_v19, %v3942_v29  ;;  %v2488_v31 = vsel %vm1150_vm3, %v3944_v63, %v2475_v19 }
 0x82d   : > { %v2514_v35 = vmul.f32 %v2506_v46, %v2489_v30  ;;  %v2513_v36 = vmul.f32 %v2505_v28, %v2488_v31  ;;  %v2409_v30 = vperm.slane %v710_v48, 2 }
 0x82f   : > { %2690 = vmatpush.msrb.mxu2 %v2513_v36  ;;  %2710 = vmatpush.msrb.mxu3 %v2514_v35  ;;  %v2359_v36 = vperm.slane %v710_v48, 1 }
 0x831   : > { %2287 = vrot.lane.b32.xlu2 %v3824_v11, %s3181_s22  ;;  %2711 = vmatpush.msrb.mxu3 %v3756_v34  ;;  %v2457_v34 = vperm.slane %v3898_v55, 3  ;;  %v2590_v55 = vsel %vm2587_vm2, %v3908_v17, %v3856_v43  ;;  %v2557_v17 = vperm.slane %v710_v48, 6 }
 0x832   : > { %2285 = vrot.lane.b32.xlu1 %v3840_v41, %s3181_s22  ;;  %2484 = vrot.lane.b32.xlu0 %v3916_v8, %s4328_s29  ;;  %v2615_v7 = vmul.f32 %v2607_v2, %v2590_v55 }
 0x833   : > { %2691 = vmatpush.msrb.mxu2 %v3764_v51  ;;  %v3960_v27 = vpop.permute.xlu2 %2430  ;;  %v3962_v37 = vpop.permute.xlu0 %2327 }
 0x834   : > { %v3964_v15 = vpop.permute.xlu1 %2279  ;;  %v2341_v13 = vsel %vm4330_vm8, %v3962_v37, %v3946_v50  ;;  %v2441_v28 = vsel %vm1127_vm4, %v3838_v39, %v3960_v27 }
 0x835   : > { %v2366_v44 = vmul.f32 %v2358_v60, %v2341_v13 }
 0x839   : > { %2339 = vrot.lane.b32.xlu2 %v3916_v8, %s3180_s21 }
 0x83a   : > { %2388 = vrot.lane.b32.xlu1 %v3916_v8, %s3176_s28  ;;  %2438 = vrot.lane.b32.xlu0 %v3916_v8, %s4325_s23 }
 0x83b   : > { %v3973_v1 = vpop.permute.xlu2 %2380  ;;  %v3975_v51 = vpop.permute.xlu0 %2277 }
 0x83c   : > { %v3978_v10 = vpop.permute.xlu1 %2426  ;;  %v2292_v40 = vsel %vm2291_vm7, %v3975_v51, %v3964_v15  ;;  %v2392_v31 = vsel %vm2390_vm6, %v3866_v61, %v3973_v1 }
 0x83d   : > { %v2440_v25 = vsel %vm1127_vm4, %v3978_v10, %v3838_v39  ;;  %v2317_v33 = vmul.f32 %v2309_v49, %v2292_v40  ;;  %v2417_v38 = vmul.f32 %v2409_v30, %v2392_v31  ;;  %v3079_v49 = vld [vmem:[%s4299_s18 + $0x58] ss:$0 sm:$0xff] }
 0x83e   : > { %v2465_v45 = vmul.f32 %v2457_v34, %v2440_v25 }
 0x840   : > { %2712 = vmatpush.msrb.mxu3 %v2465_v45  ;;  %v2310_v45 = vperm.slane %v710_v48, 0 }
 0x842   : > { %2674 = vperm.xlu1 %3068, %v2671_v16   ;;  %2713 = vmatpush.msrb.mxu3 %v2416_v20 }
 0x843   : > { %2289 = vrot.lane.b32.xlu0 %v3916_v8, %s3181_s22  ;;  %v4005_v59 = vpop.permute.xlu2 %2581  ;;  %v2628_v62 = vpop.permute.xlu0 %2627 }
 0x844   : > { %v4010_v18 = vpop.permute.xlu1 %2478  ;;  %2714 = vmatpush.msrb.mxu3 %v2366_v44  ;;  %v2640_v52 = vsel %vm2637_vm1, %v3882_v21, %v2628_v62 }
 0x845   : > { %v2665_v5 = vmul.f32 %v3078_v0, %v2640_v52  ;;  %v2490_v21 = vsel %vm1150_vm3, %v3942_v29, %v4010_v18  ;;  %v2466_v29 = vmul.f32 %v2458_v26, %v2441_v28  ;;  %v3081_v28 = vld [vmem:[%s4299_s18 + $0x68] ss:$0 sm:$0xff] }
 0x846   : > { %2715 = vmatpush.msrb.mxu3 %v2317_v33  ;;  %v2515_v46 = vmul.f32 %v2507_v9, %v2490_v21 }
 0x847   : > { %3016 = vmatmul.msk.f32.vlgmr.msrb.gmra.mxu3 %vm1591_vm0, %v4017_v4  ;;  %2727 = vmatpush.msrb.mxu0 %v2665_v5 }
 0x849   : > { %2728 = vmatpush.msrb.mxu0 %v2615_v7 }
 0x84b   : > { %v4021_v54 = vpop.permute.xlu2 %2482  ;;  %v2528_v19 = vpop.permute.xlu0 %2527 }
 0x84c   : > { %v4026_v22 = vpop.permute.xlu1 %2283  ;;  %v2540_v23 = vsel %vm2537_vm5, %v3926_v56, %v2528_v19 }
 0x84d   : > { %v2565_v24 = vmul.f32 %v2557_v17, %v2540_v23 }
 0x84f   : > { %2729 = vmatpush.msrb.mxu0 %v2565_v24 }
 0x851   : > { %2730 = vmatpush.msrb.mxu0 %v2515_v46 }
 0x853   : > { %v4036_v35 = vpop.permute.xlu2 %2436  ;;  %2731 = vmatpush.msrb.mxu0 %v3786_v3  ;;  %v4039_v56 = vpop.permute.xlu0 %2432 }
 0x854   : > { %v2332_v34 = vpop.permute.xlu1 %2331 }
 0x855   : > { %v2342_v58 = vsel %vm4331_vm13, %v3946_v50, %v2332_v34  ;;  %2732 = vmatpush.msrb.mxu0 %v2466_v29 }
 0x856   : > { %v2367_v39 = vmul.f32 %v2359_v36, %v2342_v58 }
 0x857   : > { %2733 = vmatpush.msrb.mxu0 %v2417_v38 }
 0x859   : > { %2734 = vmatpush.msrb.mxu0 %v2367_v39 }
 0x85b   : > { %v4043_v25 = vpop.permute.xlu2 %2480  ;;  %v4045_v61 = vpop.permute.xlu0 %2382 }
 0x85c   : > { %v4047_v60 = vpop.permute.xlu1 %2631  ;;  %v2491_v23 = vsel %vm1150_vm3, %v4010_v18, %v4043_v25  ;;  %v2393_v18 = vsel %vm2390_vm6, %v3973_v1, %v4045_v61 }
 0x863   : > { %v4049_v13 = vpop.permute.xlu2 %2324  ;;  %v2282_v3 = vpop.permute.xlu0 %2281 }
 0x864   : > { %v4051_v16 = vpop.permute.xlu1 %2386  ;;  %v2293_v20 = vsel %vm2291_vm7, %v3964_v15, %v2282_v3  ;;  %v711_v15 = vld [vmem:[%s4299_s18 + $0x18] sm:$0xff]  ;;  %v2294_v1 = vsel %vm2291_vm7, %v2282_v3, %v4026_v22 }
 0x865   : > { %v2318_v50 = vmul.f32 %v2310_v45, %v2293_v20  ;;  %v2608_v55 = vperm.slane %v711_v15, 7  ;;  %v2558_v52 = vperm.slane %v711_v15, 6  ;;  %v2508_v9 = vperm.slane %v711_v15, 5 }
 0x866   : > { %v2459_v26 = vperm.slane %v711_v15, 3  ;;  %v2410_v30 = vperm.slane %v711_v15, 2  ;;  %v2360_v38 = vperm.slane %v711_v15, 1  ;;  %v2311_v20 = vperm.slane %v711_v15, 0 }
 0x867   : > { %2735 = vmatpush.msrb.mxu0 %v2318_v50  ;;  %v2516_v46 = vmul.f32 %v2508_v9, %v2491_v23  ;;  %v2357_v15 = vperm.slane %v3893_v14, 1  ;;  %v2308_v9 = vperm.slane %v3893_v14, 0  ;;  %v3082_v23 = vld [vmem:[%s4299_s18 + $0x70] ss:$0 sm:$0xff] }
 0x868   : > { %3017 = vmatmul.msk.f32.vlgmr.msrb.gmra.mxu0 %vm1591_vm0, %v4017_v4  ;;  %v2418_v45 = vmul.f32 %v2410_v30, %v2393_v18 }
 0x86b   : > { %v4060_v40 = vpop.permute.xlu2 %2267  ;;  %v4062_v48 = vpop.permute.xlu0 %2531 }
 0x86c   : > { %v4064_v0 = vpop.permute.xlu1 %2629 }
 0x86d   : > { %v2641_v44 = vsel %vm2637_vm1, %v2628_v62, %v4064_v0 }
 0x86e   : > { %v2666_v2 = vmul.f32 %v3079_v49, %v2641_v44  ;;  %v2456_v49 = vperm.slane %v3893_v14, 3  ;;  %v2319_v44 = vmul.f32 %v2311_v20, %v2294_v1 }
 0x870   : > { %2747 = vmatpush.msrb.mxu1 %v2666_v2  ;;  %v2407_v2 = vperm.slane %v3893_v14, 2  ;;  %v2642_v14 = vsel %vm2637_vm1, %v4064_v0, %v4047_v60 }
 0x873   : > { %v4071_v33 = vpop.permute.xlu2 %2486  ;;  %v2580_v5 = vpop.permute.xlu0 %2579 }
 0x874   : > { %v4073_v7 = vpop.permute.xlu1 %2529  ;;  %v2591_v17 = vsel %vm2587_vm2, %v3856_v43, %v2580_v5  ;;  %v2442_v43 = vsel %vm1127_vm4, %v3960_v27, %v4039_v56  ;;  %v2343_v27 = vsel %vm4332_vm14, %v2332_v34, %v3868_v6 }
 0x875   : > { %v2541_v62 = vsel %vm2537_vm5, %v2528_v19, %v4073_v7  ;;  %v2616_v21 = vmul.f32 %v2608_v55, %v2591_v17  ;;  %v2467_v58 = vmul.f32 %v2459_v26, %v2442_v43  ;;  %v2368_v50 = vmul.f32 %v2360_v38, %v2343_v27 }
 0x876   : > { %v2566_v24 = vmul.f32 %v2558_v52, %v2541_v62  ;;  %v2356_v17 = vsel %vm4333_vm15, %v4049_v13, %v3962_v37  ;;  %v4130_v37 = vld [vmem:[%s4299_s18 + $0x20] sm:$0xff] }
 0x877   : > { %2748 = vmatpush.msrb.mxu1 %v2616_v21  ;;  %v2365_v21 = vmul.f32 %v2357_v15, %v2356_v17  ;;  %v2609_v26 = vperm.slane %v4130_v37, 7  ;;  %v2460_v20 = vperm.slane %v4130_v37, 3  ;;  %v2504_v17 = vsel %vm1150_vm3, %v4071_v33, %v3944_v63 }
 0x879   : > { %2749 = vmatpush.msrb.mxu1 %v2566_v24 }
 0x87b   : > { %v2634_v19 = vpop.permute.xlu2 %2633  ;;  %2750 = vmatpush.msrb.mxu1 %v2516_v46  ;;  %v4088_v31 = vpop.permute.xlu0 %2384 }
 0x87c   : > { %v2643_v29 = vsel %vm2637_vm1, %v4047_v60, %v2634_v19  ;;  %v4095_v36 = vpop.permute.xlu1 %2434  ;;  %v2559_v60 = vperm.slane %v4130_v37, 6 }
 0x87d   : > { %v2668_v39 = vmul.f32 %v3081_v28, %v2643_v29  ;;  %2751 = vmatpush.msrb.mxu1 %v3772_v57  ;;  %v2592_v28 = vsel %vm2587_vm2, %v2580_v5, %v4005_v59  ;;  %v2542_v29 = vsel %vm2537_vm5, %v4073_v7, %v4062_v48  ;;  %v2509_v5 = vperm.slane %v4130_v37, 5 }
 0x87e   : > { %v2567_v7 = vmul.f32 %v2559_v60, %v2542_v29 }
 0x87f   : > { %2752 = vmatpush.msrb.mxu1 %v2467_v58  ;;  %2787 = vmatpush.msra.mxu3 %v2668_v39  ;;  %v2617_v39 = vmul.f32 %v2609_v26, %v2592_v28 }
 0x881   : > { %2753 = vmatpush.msrb.mxu1 %v2418_v45 }
 0x883   : > { %2754 = vmatpush.msrb.mxu1 %v2368_v50  ;;  %v4104_v55 = vpop.permute.xlu0 %2423 }
 0x884   : > { %v4106_v57 = vpop.permute.xlu1 %2373  ;;  %v2455_v34 = vsel %vm1127_vm4, %v4104_v55, %v3978_v10  ;;  %v2307_v10 = vsel %vm2291_vm7, %v4060_v40, %v3975_v51  ;;  %v3083_v51 = vld [vmem:[%s4299_s18 + $0x78] ss:$0 sm:$0xff] }
 0x885   : > { %v2406_v3 = vsel %vm2390_vm6, %v4106_v57, %v3848_v42  ;;  %v2464_v52 = vmul.f32 %v2456_v49, %v2455_v34  ;;  %2755 = vmatpush.msrb.mxu1 %v2319_v44  ;;  %v3080_v42 = vld [vmem:[%s4299_s18 + $0x60] ss:$0 sm:$0xff]  ;;  %v2316_v24 = vmul.f32 %v2308_v9, %v2307_v10  ;;  %v2411_v44 = vperm.slane %v4130_v37, 2  ;;  %v4200_v10 = vld [vmem:[%s4299_s18 + $0x30] sm:$0xff] }
 0x886   : > { %3018 = vmatmul.msk.f32.vlgmr.msrb.gmra.mxu1 %vm1591_vm0, %v4017_v4  ;;  %v2415_v62 = vmul.f32 %v2407_v2, %v2406_v3  ;;  %v2667_v30 = vmul.f32 %v3080_v42, %v2642_v14  ;;  %v4173_v2 = vpop.permute.xlu2 %2335 }
 0x887   : > { %2692 = vmatpush.msrb.mxu2 %v2464_v52 }
 0x889   : > { %2693 = vmatpush.msrb.mxu2 %v2415_v62  ;;  %v2361_v62 = vperm.slane %v4130_v37, 1 }
 0x88b   : > { %2694 = vmatpush.msrb.mxu2 %v2365_v21  ;;  %v4142_v46 = vpop.permute.xlu0 %2535  ;;  %v2611_v21 = vperm.slane %v4200_v10, 7 }
 0x88c   : > { %v2636_v43 = vpop.permute.xlu1 %2635  ;;  %v2554_v34 = vsel %vm2537_vm5, %v4142_v46, %v3928_v12  ;;  %v2344_v12 = vsel %vm4334_vm9, %v3868_v6, %v4173_v2  ;;  %v2561_v6 = vperm.slane %v4200_v10, 6 }
 0x88d   : > { %v2644_v0 = vsel %vm2637_vm1, %v2634_v19, %v2636_v43  ;;  %v2654_v18 = vsel %vm2637_vm1, %v2636_v43, %v3884_v47  ;;  %2695 = vmatpush.msrb.mxu2 %v2316_v24  ;;  %v2492_v19 = vsel %vm1150_vm3, %v4043_v25, %v4021_v54  ;;  %v4162_v47 = vld [vmem:[%s4299_s18 + $0x38] sm:$0xff]  ;;  %v2443_v25 = vsel %vm1127_vm4, %v4039_v56, %v4095_v36 }
 0x88e   : > { %v2669_v38 = vmul.f32 %v3082_v23, %v2644_v0  ;;  %v2670_v58 = vmul.f32 %v3083_v51, %v2654_v18  ;;  %3015 = vmatmul.msk.f32.vlgmr.msrb.gmra.mxu2 %vm1591_vm0, %v4017_v4  ;;  %v2612_v27 = vperm.slane %v4162_v47, 7  ;;  %v2517_v45 = vmul.f32 %v2509_v5, %v2492_v19 }
 0x88f   : > { %2767 = vmatpush.msra.mxu2 %v2667_v30  ;;  %v2562_v50 = vperm.slane %v4162_v47, 6  ;;  %v2512_v3 = vperm.slane %v4162_v47, 5  ;;  %v2394_v56 = vsel %vm2390_vm6, %v4045_v61, %v4088_v31  ;;  %v2468_v9 = vmul.f32 %v2460_v20, %v2443_v25 }
 0x890   : > { %2807 = vmatpush.msra.mxu0 %v2669_v38  ;;  %2827 = vmatpush.msra.mxu1 %v2670_v58  ;;  %v2419_v63 = vmul.f32 %v2411_v44, %v2394_v56  ;;  %v2369_v14 = vmul.f32 %v2361_v62, %v2344_v12  ;;  %v4214_v38 = vpop.permute.xlu2 %2287  ;;  %v2511_v58 = vperm.slane %v4200_v10, 5  ;;  %v2444_v20 = vsel %vm1127_vm4, %v4095_v36, %v4036_v35 }
 0x891   : > { %2768 = vmatpush.msra.mxu2 %v2617_v39  ;;  %v2570_v61 = vmul.f32 %v2562_v50, %v2554_v34  ;;  %v2520_v42 = vmul.f32 %v2512_v3, %v2504_v17  ;;  %v2462_v50 = vperm.slane %v4200_v10, 3  ;;  %v2463_v36 = vperm.slane %v4162_v47, 3 }
 0x892   : > { %v2363_v44 = vperm.slane %v4200_v10, 1  ;;  %v2413_v3 = vperm.slane %v4200_v10, 2 }
 0x893   : > { %2769 = vmatpush.msra.mxu2 %v2567_v7  ;;  %v4166_v1 = vpop.permute.xlu0 %2337 }
 0x894   : > { %v2586_v49 = vpop.permute.xlu1 %2585 }
 0x895   : > { %v2604_v15 = vsel %vm2587_vm2, %v2586_v49, %v3910_v32  ;;  %2770 = vmatpush.msra.mxu2 %v2517_v45  ;;  %v4192_v32 = vld [vmem:[%s4299_s18 + $0x28] sm:$0xff] }
 0x896   : > { %v2620_v52 = vmul.f32 %v2612_v27, %v2604_v15  ;;  %v2560_v23 = vperm.slane %v4192_v32, 6  ;;  %v2461_v7 = vperm.slane %v4192_v32, 3  ;;  %v2412_v25 = vperm.slane %v4192_v32, 2 }
 0x897   : > { %2771 = vmatpush.msra.mxu2 %v3840_v41  ;;  %v2610_v41 = vperm.slane %v4192_v32, 7  ;;  %v2313_v15 = vperm.slane %v4192_v32, 0 }
 0x898   : > { %2828 = vmatpush.msra.mxu1 %v2620_v52 }
 0x899   : > { %2772 = vmatpush.msra.mxu2 %v2468_v9 }
 0x89a   : > { %2829 = vmatpush.msra.mxu1 %v2570_v61 }
 0x89b   : > { %2773 = vmatpush.msra.mxu2 %v2419_v63  ;;  %v2584_v51 = vpop.permute.xlu0 %2583  ;;  %v2364_v63 = vperm.slane %v4162_v47, 1 }
 0x89c   : > { %v2534_v24 = vpop.permute.xlu1 %2533  ;;  %2830 = vmatpush.msra.mxu1 %v2520_v42  ;;  %v2593_v26 = vsel %vm2587_vm2, %v4005_v59, %v2584_v51  ;;  %v2594_v28 = vsel %vm2587_vm2, %v2584_v51, %v2586_v49  ;;  %v2312_v59 = vperm.slane %v4130_v37, 0  ;;  %v2340_v49 = vpop.permute.xlu2 %2339 }
 0x89d   : > { %v2543_v43 = vsel %vm2537_vm5, %v4062_v48, %v2534_v24  ;;  %v2544_v30 = vsel %vm2537_vm5, %v2534_v24, %v4142_v46  ;;  %v2618_v60 = vmul.f32 %v2610_v41, %v2593_v26  ;;  %v2619_v0 = vmul.f32 %v2611_v21, %v2594_v28  ;;  %2774 = vmatpush.msra.mxu2 %v2369_v14 }
 0x89e   : > { %2831 = vmatpush.msra.mxu1 %v3858_v53  ;;  %v2568_v18 = vmul.f32 %v2560_v23, %v2543_v43  ;;  %v2569_v29 = vmul.f32 %v2561_v6, %v2544_v30  ;;  %v2510_v48 = vperm.slane %v4192_v32, 5  ;;  %v2315_v14 = vperm.slane %v4162_v47, 0 }
 0x89f   : > { %2788 = vmatpush.msra.mxu3 %v2618_v60  ;;  %2808 = vmatpush.msra.mxu0 %v2619_v0 }
 0x8a1   : > { %2789 = vmatpush.msra.mxu3 %v2568_v18  ;;  %2809 = vmatpush.msra.mxu0 %v2569_v29 }
 0x8a4   : > { %v2286_v46 = vpop.permute.xlu1 %2285  ;;  %v2485_v5 = vpop.permute.xlu0 %2484 }
 0x8a5   : > { %v2295_v39 = vsel %vm2291_vm7, %v4026_v22, %v2286_v46  ;;  %v2493_v53 = vsel %vm1150_vm3, %v4021_v54, %v2485_v5  ;;  %v2494_v19 = vsel %vm1150_vm3, %v2485_v5, %v4071_v33  ;;  %v2395_v54 = vsel %vm2390_vm6, %v4088_v31, %v4051_v16  ;;  %vm4335_vm3 = vmmov %vm4330_vm8 }
 0x8a6   : > { %v2320_v27 = vmul.f32 %v2312_v59, %v2295_v39  ;;  %v2518_v45 = vmul.f32 %v2510_v48, %v2493_v53  ;;  %v2519_v37 = vmul.f32 %v2511_v58, %v2494_v19  ;;  %v2469_v22 = vmul.f32 %v2461_v7, %v2444_v20  ;;  %vm4336_vm10 = vmmov %vm4335_vm3 }
 0x8a7   : > { %v2362_v33 = vperm.slane %v4192_v32, 1  ;;  %v2345_v31 = vsel %vm4335_vm3, %v4173_v2, %v4166_v1  ;;  %v2420_v34 = vmul.f32 %v2412_v25, %v2395_v54  ;;  %v2296_v17 = vsel %vm2291_vm7, %v2286_v46, %v4214_v38  ;;  %vm4337_vm11 = vmmov %vm4335_vm3 }
 0x8a8   : > { %2775 = vmatpush.msra.mxu2 %v2320_v27  ;;  %2790 = vmatpush.msra.mxu3 %v2518_v45  ;;  %v2346_v41 = vsel %vm4336_vm10, %v4166_v1, %v2340_v49  ;;  %v2321_v21 = vmul.f32 %v2313_v15, %v2296_v17  ;;  %v2314_v1 = vperm.slane %v4200_v10, 0 }
 0x8a9   : > { %2810 = vmatpush.msra.mxu0 %v2519_v37  ;;  %3019 = vmatmul.msk.f32.vlgmr.msra.gmra.mxu2 %vm1591_vm0, %v4017_v4  ;;  %v2370_v62 = vmul.f32 %v2362_v33, %v2345_v31  ;;  %v2371_v42 = vmul.f32 %v2363_v44, %v2346_v41 }
 0x8aa   : > { %2791 = vmatpush.msra.mxu3 %v3824_v11  ;;  %v2414_v11 = vperm.slane %v4162_v47, 2 }
 0x8ab   : > { %2811 = vmatpush.msra.mxu0 %v3916_v8 }
 0x8ac   : > { %v2389_v56 = vpop.permute.xlu1 %2388  ;;  %2792 = vmatpush.msra.mxu3 %v2469_v22  ;;  %v2439_v52 = vpop.permute.xlu0 %2438 }
 0x8ad   : > { %v2396_v9 = vsel %vm2390_vm6, %v4051_v16, %v2389_v56  ;;  %v2445_v2 = vsel %vm1127_vm4, %v4036_v35, %v2439_v52  ;;  %v2446_v8 = vsel %vm1127_vm4, %v2439_v52, %v4104_v55  ;;  %v2397_v32 = vsel %vm2390_vm6, %v2389_v56, %v4106_v57 }
 0x8ae   : > { %v2470_v12 = vmul.f32 %v2462_v50, %v2445_v2  ;;  %v2471_v61 = vmul.f32 %v2463_v36, %v2446_v8  ;;  %2793 = vmatpush.msra.mxu3 %v2420_v34  ;;  %v2347_v16 = vsel %vm4337_vm11, %v2340_v49, %v4049_v13  ;;  %v2421_v35 = vmul.f32 %v2413_v3, %v2396_v9 }
 0x8af   : > { %v2422_v55 = vmul.f32 %v2414_v11, %v2397_v32  ;;  %v2372_v57 = vmul.f32 %v2364_v63, %v2347_v16 }
 0x8b0   : > { %2794 = vmatpush.msra.mxu3 %v2370_v62  ;;  %2812 = vmatpush.msra.mxu0 %v2470_v12 }
 0x8b1   : > { %2832 = vmatpush.msra.mxu1 %v2471_v61 }
 0x8b2   : > { %2795 = vmatpush.msra.mxu3 %v2321_v21  ;;  %2813 = vmatpush.msra.mxu0 %v2421_v35 }
 0x8b3   : > { %2833 = vmatpush.msra.mxu1 %v2422_v55  ;;  %3020 = vmatmul.msk.f32.vlgmr.msra.gmra.mxu3 %vm1591_vm0, %v4017_v4 }
 0x8b4   : > { %2814 = vmatpush.msra.mxu0 %v2371_v42  ;;  %v2675_v47 = vpop.permute.xlu1 %2674 }
 0x8b5   : > { %2834 = vmatpush.msra.mxu1 %v2372_v57  ;;  %v2290_v13 = vpop.permute.xlu0 %2289 }
 0x8b6   : > { %v2297_v23 = vsel %vm2291_vm7, %v4214_v38, %v2290_v13  ;;  %v2298_v6 = vsel %vm2291_vm7, %v2290_v13, %v4060_v40 }
 0x8b7   : > { %v2322_v51 = vmul.f32 %v2314_v1, %v2297_v23  ;;  %v2323_v24 = vmul.f32 %v2315_v14, %v2298_v6 }
 0x8b9   : > { %2815 = vmatpush.msra.mxu0 %v2322_v51  ;;  %2835 = vmatpush.msra.mxu1 %v2323_v24 }
 0x8ba   : > { %3021 = vmatmul.msk.f32.vlgmr.msra.gmra.mxu0 %vm1591_vm0, %v4017_v4  ;;  %3022 = vmatmul.msk.f32.vlgmr.msra.gmra.mxu1 %vm1591_vm0, %v4017_v4 }
 0x8ca   : > { %v2717_v10 = vpop.f32.mrf.mxu3 }
 0x8cb   : > { %v2718_v26 = vadd.f32 %v2717_v10, %v2675_v47 }
 0x8cd   : > { %2841 = vst [vmem:[%s699_s0 + $0x8] sm:$0xff] %v2718_v26 }
 0x8e5   : > { %v2737_v40 = vpop.f32.mrf.mxu0 }
 0x8e6   : > { %v2738_v28 = vadd.f32 %v2737_v40, %v2675_v47 }
 0x8e8   : > { %2842 = vst [vmem:[%s699_s0 + $0x10] sm:$0xff] %v2738_v28 }
 0x903   : > { %v2757_v43 = vpop.f32.mrf.mxu1 }
 0x904   : > { %v2758_v30 = vadd.f32 %v2757_v43, %v2675_v47 }
 0x906   : > { %2843 = vst [vmem:[%s699_s0 + $0x18] sm:$0xff] %v2758_v30 }
 0x911   : > { %v2697_v60 = vpop.f32.mrf.mxu2 }
 0x912   : > { %v2698_v0 = vadd.f32 %v2697_v60, %v2675_v47 }
 0x914   : > { %2840 = vst [vmem:[%s699_s0] sm:$0xff] %v2698_v0 }
 0x92c   : > { %v2777_v18 = vpop.f32.mrf.mxu2 }
 0x92d   : > { %v2778_v4 = vadd.f32 %v2777_v18, %v2675_v47 }
 0x92f   : > { %2844 = vst [vmem:[%s699_s0 + $0x20] sm:$0xff] %v2778_v4 }
 0x936   : > { %v2797_v29 = vpop.f32.mrf.mxu3 }
 0x937   : > { %v2798_v38 = vadd.f32 %v2797_v29, %v2675_v47  ;;  %v2817_v59 = vpop.f32.mrf.mxu0  ;;  %v2837_v48 = vpop.f32.mrf.mxu1 }
 0x938   : > { %v2818_v58 = vadd.f32 %v2817_v59, %v2675_v47  ;;  %v2838_v46 = vadd.f32 %v2837_v48, %v2675_v47 }
 0x939   : > { %2845 = vst [vmem:[%s699_s0 + $0x28] sm:$0xff] %v2798_v38 }
 0x93a   : > { %2846 = vst [vmem:[%s699_s0 + $0x30] sm:$0xff] %v2818_v58 }
 0x93b   : > { %2847 = vst [vmem:[%s699_s0 + $0x38] sm:$0xff] %v2838_v46 }
 0x93c PF: > { %s32_s1 = sadd.s32 1, %s3162_s1  }
 0x93d   : > { %p29_p7 = scmp.ge.s32.totalorder %s32_s1, 4  }
 0x93f   :  { %31 = sbr.rel (!%p29_p7) target bundleno = 7 (0x7), region = 149 }
 0x944   :  { %2885 = vsyncpa [#allocation3], 1 }
 0x945   :  { %2887 = vsyncpa [#allocation3 + $0x1], 1 }

</bundles_post_ra>
